<compile_context>
chip_gen: v7x
topology: tpu7x:2x2x1
jax: 0.10.0
libtpu: 0.0.40
codegen_flags: <defaults>
</compile_context>

<pallas_src>
import functools

import jax
import jax.numpy as jnp
from jax.experimental import pallas as pl
from jax.experimental.pallas import tpu as pltpu


# ------------------------------ fused kernel -------------------------------

def _qnet_kernel(x_ref, intent_ref, w1_ref, b1_ref, w2k_ref, b2_ref, wcat_ref,
                 wint_ref, bfc1_ref, wfc2_ref, bfc2_ref, wfc3_ref, bfc3_ref,
                 o_ref, y1_scr, g_scr, *, W):
    """Whole QNetwork forward for a (small, static) batch in one kernel.

    Per batch element, activations are channel-major 2D tiles (channels in
    sublanes, flattened pixels in lanes).  conv2 is evaluated on the padded
    HxW frame (L = (Hp-1)*W + Wp lanes); out-of-window columns are killed by
    zero rows in the pre-permuted fc1 weight `wcat`.
    """
    N, C, HW = x_ref.shape          # batch, conv1 in-channels, H*W
    C1 = w1_ref.shape[0]            # conv1 out channels (32)
    C2 = b2_ref.shape[0]            # conv2 out channels (16)
    L = wcat_ref.shape[0]           # padded-frame pixel count for conv2 / fc1
    F1 = bfc1_ref.shape[1]          # fc1 width (64)

    # Loop-invariant weight / bias loads (hoisted out of the batch loop).
    w1 = w1_ref[...]                # (C1, C)
    b1 = b1_ref[...]                # (C1, 1)
    b2 = b2_ref[...]                # (C2, 1)
    wint = wint_ref[...]            # (dim_intention, F1)
    bfc1 = bfc1_ref[...]            # (1, F1)
    wfc2 = wfc2_ref[...]            # (F1, 32)
    bfc2 = bfc2_ref[...]            # (1, 32)
    wfc3 = wfc3_ref[...]            # (32, A)
    bfc3 = bfc3_ref[...]            # (1, A)

    for n in range(N):              # tiny static batch -> unrolled
        # ---- conv1 (1x1) + bias + ReLU ------------------------------------
        # K is tiny (C=4), so do it on the VPU as C broadcast FMAs instead of
        # a degenerate MXU matmul.
        x_n = x_ref[n]                                       # (C, HW)
        acc1 = jnp.zeros((C1, HW), jnp.float32)
        for ci in range(C):
            acc1 = acc1 + w1[:, ci:ci + 1] * x_n[ci:ci + 1, :]
        y1_scr[...] = jnp.maximum(acc1 + b1, 0.0)            # stays in VMEM

        # ---- conv2 (3x3 valid) + bias + ReLU ------------------------------
        # 9 accumulated matmuls over lane-shifted windows of y1 (no im2col).
        acc2 = jnp.zeros((C2, L), jnp.float32)
        for di in range(3):
            for dj in range(3):
                off = di * W + dj
                acc2 = acc2 + jnp.dot(
                    w2k_ref[di * 3 + dj],                    # (C2, C1)
                    y1_scr[:, off:off + L],                  # (C1, L)
                    preferred_element_type=jnp.float32)
        y2 = jnp.maximum(acc2 + b2, 0.0)                     # (C2, L)

        # ---- fc1: image part (single block matmul) + intention part --------
        # torch's flatten(1) + cat are folded into the pre-permuted `wcat`.
        g_scr[...] = jnp.dot(y2, wcat_ref[...],
                             preferred_element_type=jnp.float32)  # (C2, C2*F1)
        h1 = jnp.dot(intent_ref[n:n + 1, :], wint,
                     preferred_element_type=jnp.float32) + bfc1   # (1, F1)
        for co in range(C2):       # sum the diagonal (channel, channel) blocks
            h1 = h1 + g_scr[co:co + 1, co * F1:(co + 1) * F1]
        h1 = jnp.maximum(h1, 0.0)

        # ---- fc2 -> ReLU -> fc3 --------------------------------------------
        h2 = jnp.maximum(
            jnp.dot(h1, wfc2, preferred_element_type=jnp.float32) + bfc2, 0.0)
        out_n = jnp.dot(h2, wfc3, preferred_element_type=jnp.float32) + bfc3
        o_ref[n:n + 1, :] = out_n.astype(o_ref.dtype)


# ------------------------------ params -------------------------------------

def init_params(key, dim_state, dim_action, dim_intention):
    c_in, h, w = dim_state
    dim_flatten = 16 * (h - 2) * (w - 2) + dim_intention
    ks = jax.random.split(key, 10)
    u = lambda k, shape, scale: jax.random.uniform(
        k, shape, dtype=jnp.float32, minval=-scale, maxval=scale)
    return {
        # conv1: torch weight (32, c_in, 1, 1) -> stored as (c_in, 32)
        "w_conv1": u(ks[0], (c_in, 32), 0.5),
        "b_conv1": u(ks[1], (32,), 0.1),
        # conv2: torch weight layout (16, 32, 3, 3)
        "w_conv2": u(ks[2], (16, 32, 3, 3), 0.1),
        "b_conv2": u(ks[3], (16,), 0.1),
        # fc layers stored already transposed: (in, out)
        "w_fc1": u(ks[4], (dim_flatten, 64), 0.02),
        "b_fc1": u(ks[5], (64,), 0.02),
        "w_fc2": u(ks[6], (64, 32), 0.1),
        "b_fc2": u(ks[7], (32,), 0.1),
        "w_fc3": u(ks[8], (32, dim_action), 0.1),
        "b_fc3": u(ks[9], (dim_action,), 0.1),
    }


def prepare_params(params, dim_state):
    """One-time transform of torch-layout params into the kernel's layout."""
    c_in, H, W = dim_state
    Hp, Wp = H - 2, W - 2
    L = (Hp - 1) * W + Wp
    c2_out, c1_out = params["w_conv2"].shape[:2]       # 16, 32
    F1 = params["w_fc1"].shape[1]                      # 64
    n_img = c2_out * Hp * Wp

    # fc1 image rows, remapped to the kernel's padded-frame channel-major conv2
    # output: wcat[p, co*F1 + o] = w_fc1[co*Hp*Wp + i*Wp + j, o] for p = i*W + j
    # (valid), and 0 for padded columns j >= Wp.
    w_img = params["w_fc1"][:n_img].reshape(c2_out, Hp, Wp, F1)
    w_pad = jnp.zeros((c2_out, Hp, W, F1), w_img.dtype).at[:, :, :Wp, :].set(w_img)
    wcat = jnp.transpose(w_pad.reshape(c2_out, Hp * W, F1)[:, :L, :],
                         (1, 0, 2)).reshape(L, c2_out * F1)

    return {
        "w1": params["w_conv1"].T,                                    # (32, c_in)
        "b1": params["b_conv1"].reshape(-1, 1),                       # (32, 1)
        "w2k": jnp.transpose(params["w_conv2"],
                             (2, 3, 0, 1)).reshape(9, c2_out, c1_out),  # (9,16,32)
        "b2": params["b_conv2"].reshape(-1, 1),                       # (16, 1)
        "wcat": wcat,                                                 # (L, 16*64)
        "w_fc1_int": params["w_fc1"][n_img:],                         # (d_int, 64)
        "b_fc1": params["b_fc1"].reshape(1, -1),
        "w_fc2": params["w_fc2"],
        "b_fc2": params["b_fc2"].reshape(1, -1),
        "w_fc3": params["w_fc3"],
        "b_fc3": params["b_fc3"].reshape(1, -1),
    }


# ------------------------------ forward -------------------------------------

@jax.jit
def qnetwork_forward(prep, state, intention):
    """state: (N, C, H, W) or (C, H, W); intention: (N, d_int) or (d_int,)."""
    is_batch = state.ndim == 4
    if not is_batch:
        state = state[None]
        intention = intention[None]

    N, C, H, W = state.shape
    Hp, Wp = H - 2, W - 2
    C1 = prep["w1"].shape[0]            # 32
    C2 = prep["b2"].shape[0]            # 16
    F1 = prep["b_fc1"].shape[1]         # 64
    A = prep["w_fc3"].shape[1]
    d_int = intention.shape[1]

    x = state.reshape(N, C, H * W)      # free contiguous reshape, no transpose

    flops = 2 * N * (H * W * C * C1 + Hp * Wp * (C1 * 9) * C2
                     + (C2 * Hp * Wp + d_int) * F1 + F1 * 32 + 32 * A)
    bytes_accessed = int(
        sum(v.size * v.dtype.itemsize for v in prep.values())
        + x.size * x.dtype.itemsize
        + intention.size * intention.dtype.itemsize
        + N * A * 4)

    out = pl.pallas_call(
        functools.partial(_qnet_kernel, W=W),
        out_shape=jax.ShapeDtypeStruct((N, A), jnp.float32),
        in_specs=[pl.BlockSpec(memory_space=pltpu.MemorySpace.VMEM)] * 13,
        out_specs=pl.BlockSpec(memory_space=pltpu.MemorySpace.VMEM),
        scratch_shapes=[
            pltpu.VMEM((C1, H * W), jnp.float32),     # conv1 output (per batch)
            pltpu.VMEM((C2, C2 * F1), jnp.float32),   # fc1 block-matmul result
        ],
        cost_estimate=pl.CostEstimate(
            flops=flops, transcendentals=0, bytes_accessed=bytes_accessed),
    )(x, intention, prep["w1"], prep["b1"], prep["w2k"], prep["b2"],
      prep["wcat"], prep["w_fc1_int"], prep["b_fc1"],
      prep["w_fc2"], prep["b_fc2"], prep["w_fc3"], prep["b_fc3"])

    if not is_batch:
        out = out[0]
    return out


# --------------------------- plain-JAX reference ---------------------------

def qnetwork_reference(params, state, intention):
    N, C, H, W = state.shape
    # conv1 1x1
    x = jnp.einsum("nchw,ck->nkhw", state, params["w_conv1"])
    x = jax.nn.relu(x + params["b_conv1"][None, :, None, None])
    # conv2 3x3 valid
    x = jax.lax.conv_general_dilated(
        x, params["w_conv2"], window_strides=(1, 1), padding="VALID",
        dimension_numbers=("NCHW", "OIHW", "NCHW"))
    x = jax.nn.relu(x + params["b_conv2"][None, :, None, None])
    x = x.reshape(N, -1)
    x = jnp.concatenate([x, intention], axis=1)
    x = jax.nn.relu(x @ params["w_fc1"] + params["b_fc1"])
    x = jax.nn.relu(x @ params["w_fc2"] + params["b_fc2"])
    return x @ params["w_fc3"] + params["b_fc3"]


# ---------------------------------- main -----------------------------------

if __name__ == "__main__":
    dim_state = (4, 16, 16)   # (C, H, W)
    dim_action = 4
    dim_intention = 8
    batch = 2

    key = jax.random.PRNGKey(0)
    k_params, k_state, k_int = jax.random.split(key, 3)

    params = init_params(k_params, dim_state, dim_action, dim_intention)
    prep = prepare_params(params, dim_state)      # one-time weight transform
    state = jax.random.normal(k_state, (batch,) + dim_state, dtype=jnp.float32)
    intention = jax.random.normal(k_int, (batch, dim_intention), dtype=jnp.float32)

    out = qnetwork_forward(prep, state, intention)
    out = jax.block_until_ready(out)

    ref = qnetwork_reference(params, state, intention)
    assert out.shape == (batch, dim_action), out.shape
    assert jnp.allclose(out, ref, atol=1e-4, rtol=1e-4), (out, ref)

    print("KERNEL_OK")
</pallas_src>

<mosaic_0001>
module attributes {stable_mosaic.version = 11 : i64} {
  func.func @_qnet_kernel(%arg0: memref<2x4x256xf32, #tpu.memory_space<vmem>>, %arg1: memref<2x8xf32, #tpu.memory_space<vmem>>, %arg2: memref<32x4xf32, #tpu.memory_space<vmem>>, %arg3: memref<32x1xf32, #tpu.memory_space<vmem>>, %arg4: memref<9x16x32xf32, #tpu.memory_space<vmem>>, %arg5: memref<16x1xf32, #tpu.memory_space<vmem>>, %arg6: memref<222x1024xf32, #tpu.memory_space<vmem>>, %arg7: memref<8x64xf32, #tpu.memory_space<vmem>>, %arg8: memref<1x64xf32, #tpu.memory_space<vmem>>, %arg9: memref<64x32xf32, #tpu.memory_space<vmem>>, %arg10: memref<1x32xf32, #tpu.memory_space<vmem>>, %arg11: memref<32x4xf32, #tpu.memory_space<vmem>>, %arg12: memref<1x4xf32, #tpu.memory_space<vmem>>, %arg13: memref<2x4xf32, #tpu.memory_space<vmem>>, %arg14: memref<32x256xf32, #tpu.memory_space<vmem>>, %arg15: memref<16x1024xf32, #tpu.memory_space<vmem>>) attributes {dimension_semantics = [], scalar_prefetch = 0 : i64, scratch_operands = 2 : i64, tpu.core_type = #tpu.core_type<tc>} {
    %c0 = arith.constant 0 : index
    %c0_0 = arith.constant 0 : index
    %0 = vector.load %arg2[%c0, %c0_0] : memref<32x4xf32, #tpu.memory_space<vmem>>, vector<32x4xf32>
    %c0_1 = arith.constant 0 : index
    %c0_2 = arith.constant 0 : index
    %1 = vector.load %arg3[%c0_1, %c0_2] : memref<32x1xf32, #tpu.memory_space<vmem>>, vector<32x1xf32>
    %c0_3 = arith.constant 0 : index
    %c0_4 = arith.constant 0 : index
    %2 = vector.load %arg5[%c0_3, %c0_4] : memref<16x1xf32, #tpu.memory_space<vmem>>, vector<16x1xf32>
    %c0_5 = arith.constant 0 : index
    %c0_6 = arith.constant 0 : index
    %3 = vector.load %arg7[%c0_5, %c0_6] : memref<8x64xf32, #tpu.memory_space<vmem>>, vector<8x64xf32>
    %c0_7 = arith.constant 0 : index
    %c0_8 = arith.constant 0 : index
    %4 = vector.load %arg8[%c0_7, %c0_8] : memref<1x64xf32, #tpu.memory_space<vmem>>, vector<1x64xf32>
    %c0_9 = arith.constant 0 : index
    %c0_10 = arith.constant 0 : index
    %5 = vector.load %arg9[%c0_9, %c0_10] : memref<64x32xf32, #tpu.memory_space<vmem>>, vector<64x32xf32>
    %c0_11 = arith.constant 0 : index
    %c0_12 = arith.constant 0 : index
    %6 = vector.load %arg10[%c0_11, %c0_12] : memref<1x32xf32, #tpu.memory_space<vmem>>, vector<1x32xf32>
    %c0_13 = arith.constant 0 : index
    %c0_14 = arith.constant 0 : index
    %7 = vector.load %arg11[%c0_13, %c0_14] : memref<32x4xf32, #tpu.memory_space<vmem>>, vector<32x4xf32>
    %c0_15 = arith.constant 0 : index
    %c0_16 = arith.constant 0 : index
    %8 = vector.load %arg12[%c0_15, %c0_16] : memref<1x4xf32, #tpu.memory_space<vmem>>, vector<1x4xf32>
    %c0_17 = arith.constant 0 : index
    %c0_18 = arith.constant 0 : index
    %c0_19 = arith.constant 0 : index
    %9 = vector.load %arg0[%c0_17, %c0_18, %c0_19] : memref<2x4x256xf32, #tpu.memory_space<vmem>>, vector<1x4x256xf32>
    %10 = vector.shape_cast %9 : vector<1x4x256xf32> to vector<4x256xf32>
    %cst = arith.constant 0.000000e+00 : f32
    %11 = vector.broadcast %cst : f32 to vector<32x256xf32>
    %12 = vector.extract_strided_slice %0 {offsets = [0, 0], sizes = [32, 1], strides = [1, 1]} : vector<32x4xf32> to vector<32x1xf32>
    %13 = vector.extract_strided_slice %10 {offsets = [0, 0], sizes = [1, 256], strides = [1, 1]} : vector<4x256xf32> to vector<1x256xf32>
    %14 = vector.broadcast %12 : vector<32x1xf32> to vector<32x256xf32>
    %15 = vector.broadcast %13 : vector<1x256xf32> to vector<32x256xf32>
    %16 = arith.mulf %14, %15 : vector<32x256xf32>
    %17 = arith.addf %11, %16 : vector<32x256xf32>
    %18 = vector.extract_strided_slice %0 {offsets = [0, 1], sizes = [32, 1], strides = [1, 1]} : vector<32x4xf32> to vector<32x1xf32>
    %19 = vector.extract_strided_slice %10 {offsets = [1, 0], sizes = [1, 256], strides = [1, 1]} : vector<4x256xf32> to vector<1x256xf32>
    %20 = vector.broadcast %18 : vector<32x1xf32> to vector<32x256xf32>
    %21 = vector.broadcast %19 : vector<1x256xf32> to vector<32x256xf32>
    %22 = arith.mulf %20, %21 : vector<32x256xf32>
    %23 = arith.addf %17, %22 : vector<32x256xf32>
    %24 = vector.extract_strided_slice %0 {offsets = [0, 2], sizes = [32, 1], strides = [1, 1]} : vector<32x4xf32> to vector<32x1xf32>
    %25 = vector.extract_strided_slice %10 {offsets = [2, 0], sizes = [1, 256], strides = [1, 1]} : vector<4x256xf32> to vector<1x256xf32>
    %26 = vector.broadcast %24 : vector<32x1xf32> to vector<32x256xf32>
    %27 = vector.broadcast %25 : vector<1x256xf32> to vector<32x256xf32>
    %28 = arith.mulf %26, %27 : vector<32x256xf32>
    %29 = arith.addf %23, %28 : vector<32x256xf32>
    %30 = vector.extract_strided_slice %0 {offsets = [0, 3], sizes = [32, 1], strides = [1, 1]} : vector<32x4xf32> to vector<32x1xf32>
    %31 = vector.extract_strided_slice %10 {offsets = [3, 0], sizes = [1, 256], strides = [1, 1]} : vector<4x256xf32> to vector<1x256xf32>
    %32 = vector.broadcast %30 : vector<32x1xf32> to vector<32x256xf32>
    %33 = vector.broadcast %31 : vector<1x256xf32> to vector<32x256xf32>
    %34 = arith.mulf %32, %33 : vector<32x256xf32>
    %35 = arith.addf %29, %34 : vector<32x256xf32>
    %36 = vector.broadcast %1 : vector<32x1xf32> to vector<32x256xf32>
    %37 = arith.addf %35, %36 : vector<32x256xf32>
    %cst_20 = arith.constant 0.000000e+00 : f32
    %38 = vector.broadcast %cst_20 : f32 to vector<32x256xf32>
    %39 = arith.maximumf %37, %38 : vector<32x256xf32>
    %c0_21 = arith.constant 0 : index
    %c0_22 = arith.constant 0 : index
    %40 = vector.load %arg14[%c0_21, %c0_22] : memref<32x256xf32, #tpu.memory_space<vmem>>, vector<32x256xf32>
    tpu.vector_store %arg14[%c0_21, %c0_22], %39 {strides = array<i32>} : memref<32x256xf32, #tpu.memory_space<vmem>>, vector<32x256xf32>,
    %cst_23 = arith.constant 0.000000e+00 : f32
    %41 = vector.broadcast %cst_23 : f32 to vector<16x222xf32>
    %c0_24 = arith.constant 0 : index
    %c0_25 = arith.constant 0 : index
    %c0_26 = arith.constant 0 : index
    %42 = vector.load %arg4[%c0_24, %c0_25, %c0_26] : memref<9x16x32xf32, #tpu.memory_space<vmem>>, vector<1x16x32xf32>
    %43 = vector.shape_cast %42 : vector<1x16x32xf32> to vector<16x32xf32>
    %c0_27 = arith.constant 0 : index
    %c0_28 = arith.constant 0 : index
    %44 = vector.load %arg14[%c0_27, %c0_28] : memref<32x256xf32, #tpu.memory_space<vmem>>, vector<32x222xf32>
    %cst_29 = arith.constant dense<0.000000e+00> : vector<16x222xf32>
    %45 = tpu.matmul %43, %44, %cst_29 {dimension_numbers = #tpu.dot_dimension_numbers<[1], [0], [0], [1], [0, 0, 1, 1], [], []>} : vector<16x32xf32>, vector<32x222xf32>, vector<16x222xf32> -> vector<16x222xf32>
    %46 = arith.addf %41, %45 : vector<16x222xf32>
    %c1 = arith.constant 1 : index
    %c0_30 = arith.constant 0 : index
    %c0_31 = arith.constant 0 : index
    %47 = vector.load %arg4[%c1, %c0_30, %c0_31] : memref<9x16x32xf32, #tpu.memory_space<vmem>>, vector<1x16x32xf32>
    %48 = vector.shape_cast %47 : vector<1x16x32xf32> to vector<16x32xf32>
    %c0_32 = arith.constant 0 : index
    %c1_33 = arith.constant 1 : index
    %49 = vector.load %arg14[%c0_32, %c1_33] : memref<32x256xf32, #tpu.memory_space<vmem>>, vector<32x222xf32>
    %cst_34 = arith.constant dense<0.000000e+00> : vector<16x222xf32>
    %50 = tpu.matmul %48, %49, %cst_34 {dimension_numbers = #tpu.dot_dimension_numbers<[1], [0], [0], [1], [0, 0, 1, 1], [], []>} : vector<16x32xf32>, vector<32x222xf32>, vector<16x222xf32> -> vector<16x222xf32>
    %51 = arith.addf %46, %50 : vector<16x222xf32>
    %c2 = arith.constant 2 : index
    %c0_35 = arith.constant 0 : index
    %c0_36 = arith.constant 0 : index
    %52 = vector.load %arg4[%c2, %c0_35, %c0_36] : memref<9x16x32xf32, #tpu.memory_space<vmem>>, vector<1x16x32xf32>
    %53 = vector.shape_cast %52 : vector<1x16x32xf32> to vector<16x32xf32>
    %c0_37 = arith.constant 0 : index
    %c2_38 = arith.constant 2 : index
    %54 = vector.load %arg14[%c0_37, %c2_38] : memref<32x256xf32, #tpu.memory_space<vmem>>, vector<32x222xf32>
    %cst_39 = arith.constant dense<0.000000e+00> : vector<16x222xf32>
    %55 = tpu.matmul %53, %54, %cst_39 {dimension_numbers = #tpu.dot_dimension_numbers<[1], [0], [0], [1], [0, 0, 1, 1], [], []>} : vector<16x32xf32>, vector<32x222xf32>, vector<16x222xf32> -> vector<16x222xf32>
    %56 = arith.addf %51, %55 : vector<16x222xf32>
    %c3 = arith.constant 3 : index
    %c0_40 = arith.constant 0 : index
    %c0_41 = arith.constant 0 : index
    %57 = vector.load %arg4[%c3, %c0_40, %c0_41] : memref<9x16x32xf32, #tpu.memory_space<vmem>>, vector<1x16x32xf32>
    %58 = vector.shape_cast %57 : vector<1x16x32xf32> to vector<16x32xf32>
    %c0_42 = arith.constant 0 : index
    %c16 = arith.constant 16 : index
    %59 = vector.load %arg14[%c0_42, %c16] : memref<32x256xf32, #tpu.memory_space<vmem>>, vector<32x222xf32>
    %cst_43 = arith.constant dense<0.000000e+00> : vector<16x222xf32>
    %60 = tpu.matmul %58, %59, %cst_43 {dimension_numbers = #tpu.dot_dimension_numbers<[1], [0], [0], [1], [0, 0, 1, 1], [], []>} : vector<16x32xf32>, vector<32x222xf32>, vector<16x222xf32> -> vector<16x222xf32>
    %61 = arith.addf %56, %60 : vector<16x222xf32>
    %c4 = arith.constant 4 : index
    %c0_44 = arith.constant 0 : index
    %c0_45 = arith.constant 0 : index
    %62 = vector.load %arg4[%c4, %c0_44, %c0_45] : memref<9x16x32xf32, #tpu.memory_space<vmem>>, vector<1x16x32xf32>
    %63 = vector.shape_cast %62 : vector<1x16x32xf32> to vector<16x32xf32>
    %c0_46 = arith.constant 0 : index
    %c17 = arith.constant 17 : index
    %64 = vector.load %arg14[%c0_46, %c17] : memref<32x256xf32, #tpu.memory_space<vmem>>, vector<32x222xf32>
    %cst_47 = arith.constant dense<0.000000e+00> : vector<16x222xf32>
    %65 = tpu.matmul %63, %64, %cst_47 {dimension_numbers = #tpu.dot_dimension_numbers<[1], [0], [0], [1], [0, 0, 1, 1], [], []>} : vector<16x32xf32>, vector<32x222xf32>, vector<16x222xf32> -> vector<16x222xf32>
    %66 = arith.addf %61, %65 : vector<16x222xf32>
    %c5 = arith.constant 5 : index
    %c0_48 = arith.constant 0 : index
    %c0_49 = arith.constant 0 : index
    %67 = vector.load %arg4[%c5, %c0_48, %c0_49] : memref<9x16x32xf32, #tpu.memory_space<vmem>>, vector<1x16x32xf32>
    %68 = vector.shape_cast %67 : vector<1x16x32xf32> to vector<16x32xf32>
    %c0_50 = arith.constant 0 : index
    %c18 = arith.constant 18 : index
    %69 = vector.load %arg14[%c0_50, %c18] : memref<32x256xf32, #tpu.memory_space<vmem>>, vector<32x222xf32>
    %cst_51 = arith.constant dense<0.000000e+00> : vector<16x222xf32>
    %70 = tpu.matmul %68, %69, %cst_51 {dimension_numbers = #tpu.dot_dimension_numbers<[1], [0], [0], [1], [0, 0, 1, 1], [], []>} : vector<16x32xf32>, vector<32x222xf32>, vector<16x222xf32> -> vector<16x222xf32>
    %71 = arith.addf %66, %70 : vector<16x222xf32>
    %c6 = arith.constant 6 : index
    %c0_52 = arith.constant 0 : index
    %c0_53 = arith.constant 0 : index
    %72 = vector.load %arg4[%c6, %c0_52, %c0_53] : memref<9x16x32xf32, #tpu.memory_space<vmem>>, vector<1x16x32xf32>
    %73 = vector.shape_cast %72 : vector<1x16x32xf32> to vector<16x32xf32>
    %c0_54 = arith.constant 0 : index
    %c32 = arith.constant 32 : index
    %74 = vector.load %arg14[%c0_54, %c32] : memref<32x256xf32, #tpu.memory_space<vmem>>, vector<32x222xf32>
    %cst_55 = arith.constant dense<0.000000e+00> : vector<16x222xf32>
    %75 = tpu.matmul %73, %74, %cst_55 {dimension_numbers = #tpu.dot_dimension_numbers<[1], [0], [0], [1], [0, 0, 1, 1], [], []>} : vector<16x32xf32>, vector<32x222xf32>, vector<16x222xf32> -> vector<16x222xf32>
    %76 = arith.addf %71, %75 : vector<16x222xf32>
    %c7 = arith.constant 7 : index
    %c0_56 = arith.constant 0 : index
    %c0_57 = arith.constant 0 : index
    %77 = vector.load %arg4[%c7, %c0_56, %c0_57] : memref<9x16x32xf32, #tpu.memory_space<vmem>>, vector<1x16x32xf32>
    %78 = vector.shape_cast %77 : vector<1x16x32xf32> to vector<16x32xf32>
    %c0_58 = arith.constant 0 : index
    %c33 = arith.constant 33 : index
    %79 = vector.load %arg14[%c0_58, %c33] : memref<32x256xf32, #tpu.memory_space<vmem>>, vector<32x222xf32>
    %cst_59 = arith.constant dense<0.000000e+00> : vector<16x222xf32>
    %80 = tpu.matmul %78, %79, %cst_59 {dimension_numbers = #tpu.dot_dimension_numbers<[1], [0], [0], [1], [0, 0, 1, 1], [], []>} : vector<16x32xf32>, vector<32x222xf32>, vector<16x222xf32> -> vector<16x222xf32>
    %81 = arith.addf %76, %80 : vector<16x222xf32>
    %c8 = arith.constant 8 : index
    %c0_60 = arith.constant 0 : index
    %c0_61 = arith.constant 0 : index
    %82 = vector.load %arg4[%c8, %c0_60, %c0_61] : memref<9x16x32xf32, #tpu.memory_space<vmem>>, vector<1x16x32xf32>
    %83 = vector.shape_cast %82 : vector<1x16x32xf32> to vector<16x32xf32>
    %c0_62 = arith.constant 0 : index
    %c34 = arith.constant 34 : index
    %84 = vector.load %arg14[%c0_62, %c34] : memref<32x256xf32, #tpu.memory_space<vmem>>, vector<32x222xf32>
    %cst_63 = arith.constant dense<0.000000e+00> : vector<16x222xf32>
    %85 = tpu.matmul %83, %84, %cst_63 {dimension_numbers = #tpu.dot_dimension_numbers<[1], [0], [0], [1], [0, 0, 1, 1], [], []>} : vector<16x32xf32>, vector<32x222xf32>, vector<16x222xf32> -> vector<16x222xf32>
    %86 = arith.addf %81, %85 : vector<16x222xf32>
    %87 = vector.broadcast %2 : vector<16x1xf32> to vector<16x222xf32>
    %88 = arith.addf %86, %87 : vector<16x222xf32>
    %cst_64 = arith.constant 0.000000e+00 : f32
    %89 = vector.broadcast %cst_64 : f32 to vector<16x222xf32>
    %90 = arith.maximumf %88, %89 : vector<16x222xf32>
    %c0_65 = arith.constant 0 : index
    %c0_66 = arith.constant 0 : index
    %91 = vector.load %arg6[%c0_65, %c0_66] : memref<222x1024xf32, #tpu.memory_space<vmem>>, vector<222x1024xf32>
    %cst_67 = arith.constant dense<0.000000e+00> : vector<16x1024xf32>
    %92 = tpu.matmul %90, %91, %cst_67 {dimension_numbers = #tpu.dot_dimension_numbers<[1], [0], [0], [1], [0, 0, 1, 1], [], []>} : vector<16x222xf32>, vector<222x1024xf32>, vector<16x1024xf32> -> vector<16x1024xf32>
    %c0_68 = arith.constant 0 : index
    %c0_69 = arith.constant 0 : index
    %93 = vector.load %arg15[%c0_68, %c0_69] : memref<16x1024xf32, #tpu.memory_space<vmem>>, vector<16x1024xf32>
    tpu.vector_store %arg15[%c0_68, %c0_69], %92 {strides = array<i32>} : memref<16x1024xf32, #tpu.memory_space<vmem>>, vector<16x1024xf32>,
    %c0_70 = arith.constant 0 : index
    %c0_71 = arith.constant 0 : index
    %94 = vector.load %arg1[%c0_70, %c0_71] : memref<2x8xf32, #tpu.memory_space<vmem>>, vector<1x8xf32>
    %cst_72 = arith.constant dense<0.000000e+00> : vector<1x64xf32>
    %95 = tpu.matmul %94, %3, %cst_72 {dimension_numbers = #tpu.dot_dimension_numbers<[1], [0], [0], [1], [0, 0, 1, 1], [], []>} : vector<1x8xf32>, vector<8x64xf32>, vector<1x64xf32> -> vector<1x64xf32>
    %96 = arith.addf %95, %4 : vector<1x64xf32>
    %c0_73 = arith.constant 0 : index
    %c0_74 = arith.constant 0 : index
    %97 = vector.load %arg15[%c0_73, %c0_74] : memref<16x1024xf32, #tpu.memory_space<vmem>>, vector<1x64xf32>
    %98 = arith.addf %96, %97 : vector<1x64xf32>
    %c1_75 = arith.constant 1 : index
    %c64 = arith.constant 64 : index
    %99 = vector.load %arg15[%c1_75, %c64] : memref<16x1024xf32, #tpu.memory_space<vmem>>, vector<1x64xf32>
    %100 = arith.addf %98, %99 : vector<1x64xf32>
    %c2_76 = arith.constant 2 : index
    %c128 = arith.constant 128 : index
    %101 = vector.load %arg15[%c2_76, %c128] : memref<16x1024xf32, #tpu.memory_space<vmem>>, vector<1x64xf32>
    %102 = arith.addf %100, %101 : vector<1x64xf32>
    %c3_77 = arith.constant 3 : index
    %c192 = arith.constant 192 : index
    %103 = vector.load %arg15[%c3_77, %c192] : memref<16x1024xf32, #tpu.memory_space<vmem>>, vector<1x64xf32>
    %104 = arith.addf %102, %103 : vector<1x64xf32>
    %c4_78 = arith.constant 4 : index
    %c256 = arith.constant 256 : index
    %105 = vector.load %arg15[%c4_78, %c256] : memref<16x1024xf32, #tpu.memory_space<vmem>>, vector<1x64xf32>
    %106 = arith.addf %104, %105 : vector<1x64xf32>
    %c5_79 = arith.constant 5 : index
    %c320 = arith.constant 320 : index
    %107 = vector.load %arg15[%c5_79, %c320] : memref<16x1024xf32, #tpu.memory_space<vmem>>, vector<1x64xf32>
    %108 = arith.addf %106, %107 : vector<1x64xf32>
    %c6_80 = arith.constant 6 : index
    %c384 = arith.constant 384 : index
    %109 = vector.load %arg15[%c6_80, %c384] : memref<16x1024xf32, #tpu.memory_space<vmem>>, vector<1x64xf32>
    %110 = arith.addf %108, %109 : vector<1x64xf32>
    %c7_81 = arith.constant 7 : index
    %c448 = arith.constant 448 : index
    %111 = vector.load %arg15[%c7_81, %c448] : memref<16x1024xf32, #tpu.memory_space<vmem>>, vector<1x64xf32>
    %112 = arith.addf %110, %111 : vector<1x64xf32>
    %c8_82 = arith.constant 8 : index
    %c512 = arith.constant 512 : index
    %113 = vector.load %arg15[%c8_82, %c512] : memref<16x1024xf32, #tpu.memory_space<vmem>>, vector<1x64xf32>
    %114 = arith.addf %112, %113 : vector<1x64xf32>
    %c9 = arith.constant 9 : index
    %c576 = arith.constant 576 : index
    %115 = vector.load %arg15[%c9, %c576] : memref<16x1024xf32, #tpu.memory_space<vmem>>, vector<1x64xf32>
    %116 = arith.addf %114, %115 : vector<1x64xf32>
    %c10 = arith.constant 10 : index
    %c640 = arith.constant 640 : index
    %117 = vector.load %arg15[%c10, %c640] : memref<16x1024xf32, #tpu.memory_space<vmem>>, vector<1x64xf32>
    %118 = arith.addf %116, %117 : vector<1x64xf32>
    %c11 = arith.constant 11 : index
    %c704 = arith.constant 704 : index
    %119 = vector.load %arg15[%c11, %c704] : memref<16x1024xf32, #tpu.memory_space<vmem>>, vector<1x64xf32>
    %120 = arith.addf %118, %119 : vector<1x64xf32>
    %c12 = arith.constant 12 : index
    %c768 = arith.constant 768 : index
    %121 = vector.load %arg15[%c12, %c768] : memref<16x1024xf32, #tpu.memory_space<vmem>>, vector<1x64xf32>
    %122 = arith.addf %120, %121 : vector<1x64xf32>
    %c13 = arith.constant 13 : index
    %c832 = arith.constant 832 : index
    %123 = vector.load %arg15[%c13, %c832] : memref<16x1024xf32, #tpu.memory_space<vmem>>, vector<1x64xf32>
    %124 = arith.addf %122, %123 : vector<1x64xf32>
    %c14 = arith.constant 14 : index
    %c896 = arith.constant 896 : index
    %125 = vector.load %arg15[%c14, %c896] : memref<16x1024xf32, #tpu.memory_space<vmem>>, vector<1x64xf32>
    %126 = arith.addf %124, %125 : vector<1x64xf32>
    %c15 = arith.constant 15 : index
    %c960 = arith.constant 960 : index
    %127 = vector.load %arg15[%c15, %c960] : memref<16x1024xf32, #tpu.memory_space<vmem>>, vector<1x64xf32>
    %128 = arith.addf %126, %127 : vector<1x64xf32>
    %cst_83 = arith.constant 0.000000e+00 : f32
    %129 = vector.broadcast %cst_83 : f32 to vector<1x64xf32>
    %130 = arith.maximumf %128, %129 : vector<1x64xf32>
    %cst_84 = arith.constant dense<0.000000e+00> : vector<1x32xf32>
    %131 = tpu.matmul %130, %5, %cst_84 {dimension_numbers = #tpu.dot_dimension_numbers<[1], [0], [0], [1], [0, 0, 1, 1], [], []>} : vector<1x64xf32>, vector<64x32xf32>, vector<1x32xf32> -> vector<1x32xf32>
    %132 = arith.addf %131, %6 : vector<1x32xf32>
    %cst_85 = arith.constant 0.000000e+00 : f32
    %133 = vector.broadcast %cst_85 : f32 to vector<1x32xf32>
    %134 = arith.maximumf %132, %133 : vector<1x32xf32>
    %cst_86 = arith.constant dense<0.000000e+00> : vector<1x4xf32>
    %135 = tpu.matmul %134, %7, %cst_86 {dimension_numbers = #tpu.dot_dimension_numbers<[1], [0], [0], [1], [0, 0, 1, 1], [], []>} : vector<1x32xf32>, vector<32x4xf32>, vector<1x4xf32> -> vector<1x4xf32>
    %136 = arith.addf %135, %8 : vector<1x4xf32>
    %c0_87 = arith.constant 0 : index
    %c0_88 = arith.constant 0 : index
    %137 = vector.load %arg13[%c0_87, %c0_88] : memref<2x4xf32, #tpu.memory_space<vmem>>, vector<1x4xf32>
    tpu.vector_store %arg13[%c0_87, %c0_88], %136 {strides = array<i32>} : memref<2x4xf32, #tpu.memory_space<vmem>>, vector<1x4xf32>,
    %c1_89 = arith.constant 1 : index
    %c0_90 = arith.constant 0 : index
    %c0_91 = arith.constant 0 : index
    %138 = vector.load %arg0[%c1_89, %c0_90, %c0_91] : memref<2x4x256xf32, #tpu.memory_space<vmem>>, vector<1x4x256xf32>
    %139 = vector.shape_cast %138 : vector<1x4x256xf32> to vector<4x256xf32>
    %cst_92 = arith.constant 0.000000e+00 : f32
    %140 = vector.broadcast %cst_92 : f32 to vector<32x256xf32>
    %141 = vector.extract_strided_slice %0 {offsets = [0, 0], sizes = [32, 1], strides = [1, 1]} : vector<32x4xf32> to vector<32x1xf32>
    %142 = vector.extract_strided_slice %139 {offsets = [0, 0], sizes = [1, 256], strides = [1, 1]} : vector<4x256xf32> to vector<1x256xf32>
    %143 = vector.broadcast %141 : vector<32x1xf32> to vector<32x256xf32>
    %144 = vector.broadcast %142 : vector<1x256xf32> to vector<32x256xf32>
    %145 = arith.mulf %143, %144 : vector<32x256xf32>
    %146 = arith.addf %140, %145 : vector<32x256xf32>
    %147 = vector.extract_strided_slice %0 {offsets = [0, 1], sizes = [32, 1], strides = [1, 1]} : vector<32x4xf32> to vector<32x1xf32>
    %148 = vector.extract_strided_slice %139 {offsets = [1, 0], sizes = [1, 256], strides = [1, 1]} : vector<4x256xf32> to vector<1x256xf32>
    %149 = vector.broadcast %147 : vector<32x1xf32> to vector<32x256xf32>
    %150 = vector.broadcast %148 : vector<1x256xf32> to vector<32x256xf32>
    %151 = arith.mulf %149, %150 : vector<32x256xf32>
    %152 = arith.addf %146, %151 : vector<32x256xf32>
    %153 = vector.extract_strided_slice %0 {offsets = [0, 2], sizes = [32, 1], strides = [1, 1]} : vector<32x4xf32> to vector<32x1xf32>
    %154 = vector.extract_strided_slice %139 {offsets = [2, 0], sizes = [1, 256], strides = [1, 1]} : vector<4x256xf32> to vector<1x256xf32>
    %155 = vector.broadcast %153 : vector<32x1xf32> to vector<32x256xf32>
    %156 = vector.broadcast %154 : vector<1x256xf32> to vector<32x256xf32>
    %157 = arith.mulf %155, %156 : vector<32x256xf32>
    %158 = arith.addf %152, %157 : vector<32x256xf32>
    %159 = vector.extract_strided_slice %0 {offsets = [0, 3], sizes = [32, 1], strides = [1, 1]} : vector<32x4xf32> to vector<32x1xf32>
    %160 = vector.extract_strided_slice %139 {offsets = [3, 0], sizes = [1, 256], strides = [1, 1]} : vector<4x256xf32> to vector<1x256xf32>
    %161 = vector.broadcast %159 : vector<32x1xf32> to vector<32x256xf32>
    %162 = vector.broadcast %160 : vector<1x256xf32> to vector<32x256xf32>
    %163 = arith.mulf %161, %162 : vector<32x256xf32>
    %164 = arith.addf %158, %163 : vector<32x256xf32>
    %165 = vector.broadcast %1 : vector<32x1xf32> to vector<32x256xf32>
    %166 = arith.addf %164, %165 : vector<32x256xf32>
    %cst_93 = arith.constant 0.000000e+00 : f32
    %167 = vector.broadcast %cst_93 : f32 to vector<32x256xf32>
    %168 = arith.maximumf %166, %167 : vector<32x256xf32>
    %c0_94 = arith.constant 0 : index
    %c0_95 = arith.constant 0 : index
    %169 = vector.load %arg14[%c0_94, %c0_95] : memref<32x256xf32, #tpu.memory_space<vmem>>, vector<32x256xf32>
    tpu.vector_store %arg14[%c0_94, %c0_95], %168 {strides = array<i32>} : memref<32x256xf32, #tpu.memory_space<vmem>>, vector<32x256xf32>,
    %cst_96 = arith.constant 0.000000e+00 : f32
    %170 = vector.broadcast %cst_96 : f32 to vector<16x222xf32>
    %c0_97 = arith.constant 0 : index
    %c0_98 = arith.constant 0 : index
    %c0_99 = arith.constant 0 : index
    %171 = vector.load %arg4[%c0_97, %c0_98, %c0_99] : memref<9x16x32xf32, #tpu.memory_space<vmem>>, vector<1x16x32xf32>
    %172 = vector.shape_cast %171 : vector<1x16x32xf32> to vector<16x32xf32>
    %c0_100 = arith.constant 0 : index
    %c0_101 = arith.constant 0 : index
    %173 = vector.load %arg14[%c0_100, %c0_101] : memref<32x256xf32, #tpu.memory_space<vmem>>, vector<32x222xf32>
    %cst_102 = arith.constant dense<0.000000e+00> : vector<16x222xf32>
    %174 = tpu.matmul %172, %173, %cst_102 {dimension_numbers = #tpu.dot_dimension_numbers<[1], [0], [0], [1], [0, 0, 1, 1], [], []>} : vector<16x32xf32>, vector<32x222xf32>, vector<16x222xf32> -> vector<16x222xf32>
    %175 = arith.addf %170, %174 : vector<16x222xf32>
    %c1_103 = arith.constant 1 : index
    %c0_104 = arith.constant 0 : index
    %c0_105 = arith.constant 0 : index
    %176 = vector.load %arg4[%c1_103, %c0_104, %c0_105] : memref<9x16x32xf32, #tpu.memory_space<vmem>>, vector<1x16x32xf32>
    %177 = vector.shape_cast %176 : vector<1x16x32xf32> to vector<16x32xf32>
    %c0_106 = arith.constant 0 : index
    %c1_107 = arith.constant 1 : index
    %178 = vector.load %arg14[%c0_106, %c1_107] : memref<32x256xf32, #tpu.memory_space<vmem>>, vector<32x222xf32>
    %cst_108 = arith.constant dense<0.000000e+00> : vector<16x222xf32>
    %179 = tpu.matmul %177, %178, %cst_108 {dimension_numbers = #tpu.dot_dimension_numbers<[1], [0], [0], [1], [0, 0, 1, 1], [], []>} : vector<16x32xf32>, vector<32x222xf32>, vector<16x222xf32> -> vector<16x222xf32>
    %180 = arith.addf %175, %179 : vector<16x222xf32>
    %c2_109 = arith.constant 2 : index
    %c0_110 = arith.constant 0 : index
    %c0_111 = arith.constant 0 : index
    %181 = vector.load %arg4[%c2_109, %c0_110, %c0_111] : memref<9x16x32xf32, #tpu.memory_space<vmem>>, vector<1x16x32xf32>
    %182 = vector.shape_cast %181 : vector<1x16x32xf32> to vector<16x32xf32>
    %c0_112 = arith.constant 0 : index
    %c2_113 = arith.constant 2 : index
    %183 = vector.load %arg14[%c0_112, %c2_113] : memref<32x256xf32, #tpu.memory_space<vmem>>, vector<32x222xf32>
    %cst_114 = arith.constant dense<0.000000e+00> : vector<16x222xf32>
    %184 = tpu.matmul %182, %183, %cst_114 {dimension_numbers = #tpu.dot_dimension_numbers<[1], [0], [0], [1], [0, 0, 1, 1], [], []>} : vector<16x32xf32>, vector<32x222xf32>, vector<16x222xf32> -> vector<16x222xf32>
    %185 = arith.addf %180, %184 : vector<16x222xf32>
    %c3_115 = arith.constant 3 : index
    %c0_116 = arith.constant 0 : index
    %c0_117 = arith.constant 0 : index
    %186 = vector.load %arg4[%c3_115, %c0_116, %c0_117] : memref<9x16x32xf32, #tpu.memory_space<vmem>>, vector<1x16x32xf32>
    %187 = vector.shape_cast %186 : vector<1x16x32xf32> to vector<16x32xf32>
    %c0_118 = arith.constant 0 : index
    %c16_119 = arith.constant 16 : index
    %188 = vector.load %arg14[%c0_118, %c16_119] : memref<32x256xf32, #tpu.memory_space<vmem>>, vector<32x222xf32>
    %cst_120 = arith.constant dense<0.000000e+00> : vector<16x222xf32>
    %189 = tpu.matmul %187, %188, %cst_120 {dimension_numbers = #tpu.dot_dimension_numbers<[1], [0], [0], [1], [0, 0, 1, 1], [], []>} : vector<16x32xf32>, vector<32x222xf32>, vector<16x222xf32> -> vector<16x222xf32>
    %190 = arith.addf %185, %189 : vector<16x222xf32>
    %c4_121 = arith.constant 4 : index
    %c0_122 = arith.constant 0 : index
    %c0_123 = arith.constant 0 : index
    %191 = vector.load %arg4[%c4_121, %c0_122, %c0_123] : memref<9x16x32xf32, #tpu.memory_space<vmem>>, vector<1x16x32xf32>
    %192 = vector.shape_cast %191 : vector<1x16x32xf32> to vector<16x32xf32>
    %c0_124 = arith.constant 0 : index
    %c17_125 = arith.constant 17 : index
    %193 = vector.load %arg14[%c0_124, %c17_125] : memref<32x256xf32, #tpu.memory_space<vmem>>, vector<32x222xf32>
    %cst_126 = arith.constant dense<0.000000e+00> : vector<16x222xf32>
    %194 = tpu.matmul %192, %193, %cst_126 {dimension_numbers = #tpu.dot_dimension_numbers<[1], [0], [0], [1], [0, 0, 1, 1], [], []>} : vector<16x32xf32>, vector<32x222xf32>, vector<16x222xf32> -> vector<16x222xf32>
    %195 = arith.addf %190, %194 : vector<16x222xf32>
    %c5_127 = arith.constant 5 : index
    %c0_128 = arith.constant 0 : index
    %c0_129 = arith.constant 0 : index
    %196 = vector.load %arg4[%c5_127, %c0_128, %c0_129] : memref<9x16x32xf32, #tpu.memory_space<vmem>>, vector<1x16x32xf32>
    %197 = vector.shape_cast %196 : vector<1x16x32xf32> to vector<16x32xf32>
    %c0_130 = arith.constant 0 : index
    %c18_131 = arith.constant 18 : index
    %198 = vector.load %arg14[%c0_130, %c18_131] : memref<32x256xf32, #tpu.memory_space<vmem>>, vector<32x222xf32>
    %cst_132 = arith.constant dense<0.000000e+00> : vector<16x222xf32>
    %199 = tpu.matmul %197, %198, %cst_132 {dimension_numbers = #tpu.dot_dimension_numbers<[1], [0], [0], [1], [0, 0, 1, 1], [], []>} : vector<16x32xf32>, vector<32x222xf32>, vector<16x222xf32> -> vector<16x222xf32>
    %200 = arith.addf %195, %199 : vector<16x222xf32>
    %c6_133 = arith.constant 6 : index
    %c0_134 = arith.constant 0 : index
    %c0_135 = arith.constant 0 : index
    %201 = vector.load %arg4[%c6_133, %c0_134, %c0_135] : memref<9x16x32xf32, #tpu.memory_space<vmem>>, vector<1x16x32xf32>
    %202 = vector.shape_cast %201 : vector<1x16x32xf32> to vector<16x32xf32>
    %c0_136 = arith.constant 0 : index
    %c32_137 = arith.constant 32 : index
    %203 = vector.load %arg14[%c0_136, %c32_137] : memref<32x256xf32, #tpu.memory_space<vmem>>, vector<32x222xf32>
    %cst_138 = arith.constant dense<0.000000e+00> : vector<16x222xf32>
    %204 = tpu.matmul %202, %203, %cst_138 {dimension_numbers = #tpu.dot_dimension_numbers<[1], [0], [0], [1], [0, 0, 1, 1], [], []>} : vector<16x32xf32>, vector<32x222xf32>, vector<16x222xf32> -> vector<16x222xf32>
    %205 = arith.addf %200, %204 : vector<16x222xf32>
    %c7_139 = arith.constant 7 : index
    %c0_140 = arith.constant 0 : index
    %c0_141 = arith.constant 0 : index
    %206 = vector.load %arg4[%c7_139, %c0_140, %c0_141] : memref<9x16x32xf32, #tpu.memory_space<vmem>>, vector<1x16x32xf32>
    %207 = vector.shape_cast %206 : vector<1x16x32xf32> to vector<16x32xf32>
    %c0_142 = arith.constant 0 : index
    %c33_143 = arith.constant 33 : index
    %208 = vector.load %arg14[%c0_142, %c33_143] : memref<32x256xf32, #tpu.memory_space<vmem>>, vector<32x222xf32>
    %cst_144 = arith.constant dense<0.000000e+00> : vector<16x222xf32>
    %209 = tpu.matmul %207, %208, %cst_144 {dimension_numbers = #tpu.dot_dimension_numbers<[1], [0], [0], [1], [0, 0, 1, 1], [], []>} : vector<16x32xf32>, vector<32x222xf32>, vector<16x222xf32> -> vector<16x222xf32>
    %210 = arith.addf %205, %209 : vector<16x222xf32>
    %c8_145 = arith.constant 8 : index
    %c0_146 = arith.constant 0 : index
    %c0_147 = arith.constant 0 : index
    %211 = vector.load %arg4[%c8_145, %c0_146, %c0_147] : memref<9x16x32xf32, #tpu.memory_space<vmem>>, vector<1x16x32xf32>
    %212 = vector.shape_cast %211 : vector<1x16x32xf32> to vector<16x32xf32>
    %c0_148 = arith.constant 0 : index
    %c34_149 = arith.constant 34 : index
    %213 = vector.load %arg14[%c0_148, %c34_149] : memref<32x256xf32, #tpu.memory_space<vmem>>, vector<32x222xf32>
    %cst_150 = arith.constant dense<0.000000e+00> : vector<16x222xf32>
    %214 = tpu.matmul %212, %213, %cst_150 {dimension_numbers = #tpu.dot_dimension_numbers<[1], [0], [0], [1], [0, 0, 1, 1], [], []>} : vector<16x32xf32>, vector<32x222xf32>, vector<16x222xf32> -> vector<16x222xf32>
    %215 = arith.addf %210, %214 : vector<16x222xf32>
    %216 = vector.broadcast %2 : vector<16x1xf32> to vector<16x222xf32>
    %217 = arith.addf %215, %216 : vector<16x222xf32>
    %cst_151 = arith.constant 0.000000e+00 : f32
    %218 = vector.broadcast %cst_151 : f32 to vector<16x222xf32>
    %219 = arith.maximumf %217, %218 : vector<16x222xf32>
    %c0_152 = arith.constant 0 : index
    %c0_153 = arith.constant 0 : index
    %220 = vector.load %arg6[%c0_152, %c0_153] : memref<222x1024xf32, #tpu.memory_space<vmem>>, vector<222x1024xf32>
    %cst_154 = arith.constant dense<0.000000e+00> : vector<16x1024xf32>
    %221 = tpu.matmul %219, %220, %cst_154 {dimension_numbers = #tpu.dot_dimension_numbers<[1], [0], [0], [1], [0, 0, 1, 1], [], []>} : vector<16x222xf32>, vector<222x1024xf32>, vector<16x1024xf32> -> vector<16x1024xf32>
    %c0_155 = arith.constant 0 : index
    %c0_156 = arith.constant 0 : index
    %222 = vector.load %arg15[%c0_155, %c0_156] : memref<16x1024xf32, #tpu.memory_space<vmem>>, vector<16x1024xf32>
    tpu.vector_store %arg15[%c0_155, %c0_156], %221 {strides = array<i32>} : memref<16x1024xf32, #tpu.memory_space<vmem>>, vector<16x1024xf32>,
    %c1_157 = arith.constant 1 : index
    %c0_158 = arith.constant 0 : index
    %223 = vector.load %arg1[%c1_157, %c0_158] : memref<2x8xf32, #tpu.memory_space<vmem>>, vector<1x8xf32>
    %cst_159 = arith.constant dense<0.000000e+00> : vector<1x64xf32>
    %224 = tpu.matmul %223, %3, %cst_159 {dimension_numbers = #tpu.dot_dimension_numbers<[1], [0], [0], [1], [0, 0, 1, 1], [], []>} : vector<1x8xf32>, vector<8x64xf32>, vector<1x64xf32> -> vector<1x64xf32>
    %225 = arith.addf %224, %4 : vector<1x64xf32>
    %c0_160 = arith.constant 0 : index
    %c0_161 = arith.constant 0 : index
    %226 = vector.load %arg15[%c0_160, %c0_161] : memref<16x1024xf32, #tpu.memory_space<vmem>>, vector<1x64xf32>
    %227 = arith.addf %225, %226 : vector<1x64xf32>
    %c1_162 = arith.constant 1 : index
    %c64_163 = arith.constant 64 : index
    %228 = vector.load %arg15[%c1_162, %c64_163] : memref<16x1024xf32, #tpu.memory_space<vmem>>, vector<1x64xf32>
    %229 = arith.addf %227, %228 : vector<1x64xf32>
    %c2_164 = arith.constant 2 : index
    %c128_165 = arith.constant 128 : index
    %230 = vector.load %arg15[%c2_164, %c128_165] : memref<16x1024xf32, #tpu.memory_space<vmem>>, vector<1x64xf32>
    %231 = arith.addf %229, %230 : vector<1x64xf32>
    %c3_166 = arith.constant 3 : index
    %c192_167 = arith.constant 192 : index
    %232 = vector.load %arg15[%c3_166, %c192_167] : memref<16x1024xf32, #tpu.memory_space<vmem>>, vector<1x64xf32>
    %233 = arith.addf %231, %232 : vector<1x64xf32>
    %c4_168 = arith.constant 4 : index
    %c256_169 = arith.constant 256 : index
    %234 = vector.load %arg15[%c4_168, %c256_169] : memref<16x1024xf32, #tpu.memory_space<vmem>>, vector<1x64xf32>
    %235 = arith.addf %233, %234 : vector<1x64xf32>
    %c5_170 = arith.constant 5 : index
    %c320_171 = arith.constant 320 : index
    %236 = vector.load %arg15[%c5_170, %c320_171] : memref<16x1024xf32, #tpu.memory_space<vmem>>, vector<1x64xf32>
    %237 = arith.addf %235, %236 : vector<1x64xf32>
    %c6_172 = arith.constant 6 : index
    %c384_173 = arith.constant 384 : index
    %238 = vector.load %arg15[%c6_172, %c384_173] : memref<16x1024xf32, #tpu.memory_space<vmem>>, vector<1x64xf32>
    %239 = arith.addf %237, %238 : vector<1x64xf32>
    %c7_174 = arith.constant 7 : index
    %c448_175 = arith.constant 448 : index
    %240 = vector.load %arg15[%c7_174, %c448_175] : memref<16x1024xf32, #tpu.memory_space<vmem>>, vector<1x64xf32>
    %241 = arith.addf %239, %240 : vector<1x64xf32>
    %c8_176 = arith.constant 8 : index
    %c512_177 = arith.constant 512 : index
    %242 = vector.load %arg15[%c8_176, %c512_177] : memref<16x1024xf32, #tpu.memory_space<vmem>>, vector<1x64xf32>
    %243 = arith.addf %241, %242 : vector<1x64xf32>
    %c9_178 = arith.constant 9 : index
    %c576_179 = arith.constant 576 : index
    %244 = vector.load %arg15[%c9_178, %c576_179] : memref<16x1024xf32, #tpu.memory_space<vmem>>, vector<1x64xf32>
    %245 = arith.addf %243, %244 : vector<1x64xf32>
    %c10_180 = arith.constant 10 : index
    %c640_181 = arith.constant 640 : index
    %246 = vector.load %arg15[%c10_180, %c640_181] : memref<16x1024xf32, #tpu.memory_space<vmem>>, vector<1x64xf32>
    %247 = arith.addf %245, %246 : vector<1x64xf32>
    %c11_182 = arith.constant 11 : index
    %c704_183 = arith.constant 704 : index
    %248 = vector.load %arg15[%c11_182, %c704_183] : memref<16x1024xf32, #tpu.memory_space<vmem>>, vector<1x64xf32>
    %249 = arith.addf %247, %248 : vector<1x64xf32>
    %c12_184 = arith.constant 12 : index
    %c768_185 = arith.constant 768 : index
    %250 = vector.load %arg15[%c12_184, %c768_185] : memref<16x1024xf32, #tpu.memory_space<vmem>>, vector<1x64xf32>
    %251 = arith.addf %249, %250 : vector<1x64xf32>
    %c13_186 = arith.constant 13 : index
    %c832_187 = arith.constant 832 : index
    %252 = vector.load %arg15[%c13_186, %c832_187] : memref<16x1024xf32, #tpu.memory_space<vmem>>, vector<1x64xf32>
    %253 = arith.addf %251, %252 : vector<1x64xf32>
    %c14_188 = arith.constant 14 : index
    %c896_189 = arith.constant 896 : index
    %254 = vector.load %arg15[%c14_188, %c896_189] : memref<16x1024xf32, #tpu.memory_space<vmem>>, vector<1x64xf32>
    %255 = arith.addf %253, %254 : vector<1x64xf32>
    %c15_190 = arith.constant 15 : index
    %c960_191 = arith.constant 960 : index
    %256 = vector.load %arg15[%c15_190, %c960_191] : memref<16x1024xf32, #tpu.memory_space<vmem>>, vector<1x64xf32>
    %257 = arith.addf %255, %256 : vector<1x64xf32>
    %cst_192 = arith.constant 0.000000e+00 : f32
    %258 = vector.broadcast %cst_192 : f32 to vector<1x64xf32>
    %259 = arith.maximumf %257, %258 : vector<1x64xf32>
    %cst_193 = arith.constant dense<0.000000e+00> : vector<1x32xf32>
    %260 = tpu.matmul %259, %5, %cst_193 {dimension_numbers = #tpu.dot_dimension_numbers<[1], [0], [0], [1], [0, 0, 1, 1], [], []>} : vector<1x64xf32>, vector<64x32xf32>, vector<1x32xf32> -> vector<1x32xf32>
    %261 = arith.addf %260, %6 : vector<1x32xf32>
    %cst_194 = arith.constant 0.000000e+00 : f32
    %262 = vector.broadcast %cst_194 : f32 to vector<1x32xf32>
    %263 = arith.maximumf %261, %262 : vector<1x32xf32>
    %cst_195 = arith.constant dense<0.000000e+00> : vector<1x4xf32>
    %264 = tpu.matmul %263, %7, %cst_195 {dimension_numbers = #tpu.dot_dimension_numbers<[1], [0], [0], [1], [0, 0, 1, 1], [], []>} : vector<1x32xf32>, vector<32x4xf32>, vector<1x4xf32> -> vector<1x4xf32>
    %265 = arith.addf %264, %8 : vector<1x4xf32>
    %c1_196 = arith.constant 1 : index
    %c0_197 = arith.constant 0 : index
    %266 = vector.load %arg13[%c1_196, %c0_197] : memref<2x4xf32, #tpu.memory_space<vmem>>, vector<1x4xf32>
    tpu.vector_store %arg13[%c1_196, %c0_197], %265 {strides = array<i32>} : memref<2x4xf32, #tpu.memory_space<vmem>>, vector<1x4xf32>,
    return
  }
}

</mosaic_0001>

<bundles_post_ra>
// kernel: qnetwork_forward.1
= control target key start
LH: loop header
LB: loop body
LE: loop exit
PB: predicated region body
PF: predicated region fallthrough
CT: control target
= control target key end

     0   :  { %18 = vsyncpa [#allocation5], 0  ;;  %s6752_s0 = inlined_call_operand.vmem [shape: f32[2,4,256], index: 0, kind: input, shape index: {}]   ;;  %s6753_s1 = inlined_call_operand.vmem [shape: f32[2,8], index: 1, kind: input, shape index: {}]   ;;  %s6754_s2 = inlined_call_operand.vmem [shape: f32[32,4], index: 2, kind: input, shape index: {}]   ;;  %s6755_s3 = inlined_call_operand.vmem [shape: f32[32,1], index: 3, kind: input, shape index: {}]   ;;  %s6756_s4 = inlined_call_operand.vmem [shape: f32[9,16,32], index: 4, kind: input, shape index: {}]   ;;  %s6757_s5 = inlined_call_operand.vmem [shape: f32[16,1], index: 5, kind: input, shape index: {}]   ;;  %s6758_s6 = inlined_call_operand.hbm [shape: f32[222,1024], index: 6, kind: input, shape index: {}]   ;;  %s6759_s7 = inlined_call_operand.vmem [shape: f32[8,64], index: 7, kind: input, shape index: {}]   ;;  %s6760_s8 = inlined_call_operand.vmem [shape: f32[1,64], index: 8, kind: input, shape index: {}]   ;;  %s6761_s9 = inlined_call_operand.vmem [shape: f32[64,32], index: 9, kind: input, shape index: {}]   ;;  %s6762_s10 = inlined_call_operand.vmem [shape: f32[1,32], index: 10, kind: input, shape index: {}]   ;;  %s6763_s11 = inlined_call_operand.vmem [shape: f32[32,4], index: 11, kind: input, shape index: {}]   ;;  %s6764_s12 = inlined_call_operand.vmem [shape: f32[1,4], index: 12, kind: input, shape index: {}]   ;;  %s6765_s13 = inlined_call_operand.hbm [shape: f32[2,4], index: 13, kind: output, shape index: {}]  }
   0x1   :  { %19 = vsyncpa [#allocation6], 0  ;;  %s5675_s25 = smov [#allocation4]   ;;  %s5627_s29 = scalar_lea.hbm %s6758_s6, 28672 }
   0x2   :  { %s37_s26 = sshll.u32 %s5675_s25, 4  ;;  %p5628_p0 = scmp.ne.s32.totalorder %s6758_s6, %s5627_s29  ;;  %s38_s26 = int_to_ptr.vmem [resolvable:$true] %s37_s26 }
   0x3   :  { %p5631_p1 = scmp.lt.u32.totalorder %s5627_s29, %s6758_s6 }
   0x5   :  { %p5633_p2 = pnand %p5631_p1, %p5628_p0 }
   0x7   :  { %5636 = shalt.err (!%p5633_p2)
}
   0x8   :  { %s5637_s17 = scalar_lea.vmem %s38_s26, 28672  ;;  %p5642_p4 = scmp.lt.s32.totalorder %s38_s26, %s38_s26 }
   0x9   :  { %p5638_p3 = scmp.ne.s32.totalorder %s38_s26, %s5637_s17  ;;  %p5643_p5 = scmp.lt.s32.totalorder %s5637_s17, %s5637_s17 }
   0xb   :  { %p5644_p6 = por %p5643_p5, %p5642_p4 }
   0xd   :  { %p5645_p7 = pnand %p5644_p6, %p5638_p3 }
   0xf   :  { %5648 = shalt.err (!%p5645_p7)
}
  0x10   :  { %s5676_s18 = smov 1024   ;;  %s5677_s19 = smov 64  }
  0x11   :  { %43 = dma.hbm_to_vmem [thread:$0]  %s6758_s6, 28672, %s38_s26, [#allocation5], %s5676_s18, %s5676_s18, %s5677_s19  }
  0x12   :  { %5671 = dma.done.wait [#allocation5], 28672  }
  0x13   :  { %5672 = vsyncadd [#allocation5], 4294938624  ;;  %v5678_v0 = vmov 3   ;;  %v5679_v1 = vmov 1   ;;  %v107_v2 = vlaneseq  ;;  %v59_v4 = vld [vmem:[%s6754_s2] sm:$0xff]  ;;  %v60_v7 = vld [vmem:[%s6754_s2 + $0x8] sm:$0xff] }
  0x14   :  { %5297 = vset.pattern.permute.xlu0 %v5678_v0  ;;  %5293 = vset.pattern.permute.xlu1 %v5679_v1  ;;  %v5791_v8 = vld [vmem:[%s6752_s0 + $0x8] sm:$0xff]  ;;  %v5680_v12 = vmov 2   ;;  %v62_v15 = vld [vmem:[%s6754_s2 + $0x18] sm:$0xff]  ;;  %v61_v22 = vld [vmem:[%s6754_s2 + $0x10] sm:$0xff]  ;;  %v5681_v25 = vmov 0   ;;  %s5684_s23 = smov 126  }
  0x15   :  { %v5778_v3 = vshrl.u32 %v107_v2, 7  ;;  %242 = vperm.xlu0 %5297, %v59_v4   ;;  %142 = vperm.xlu1 %5293, %v59_v4   ;;  %v63_v27 = vld [vmem:[%s6755_s3] sm:$0xff]  ;;  %v66_v28 = vld [vmem:[%s6755_s3 + $0x18] sm:$0xff]  ;;  %v64_v29 = vld [vmem:[%s6755_s3 + $0x8] sm:$0xff]  ;;  %s5685_s6 = smov 112   ;;  %s5686_s24 = smov 111  }
  0x16   :  { %v65_v30 = vld [vmem:[%s6755_s3 + $0x10] sm:$0xff]  ;;  %v85_v43 = vld [vmem:[%s6752_s0] sm:$0xff]  ;;  %s5682_s0 = smov 127   ;;  %s5687_s25 = smov 110   ;;  %vm372_vm0 = vcmask 1039360   ;;  %vm385_vm1 = vcmask 261120  }
  0x17   :  { %v163_v5 = vsub.s32 5, %v5778_v3  ;;  %v263_v6 = vsub.s32 7, %v5778_v3  ;;  %v5794_v9 = vsub.s32 1, %v5778_v3  ;;  %v5803_v13 = vsub.s32 3, %v5778_v3  ;;  %s5688_s26 = smov 96   ;;  %s5689_s27 = smov 95  }
  0x18   :  { %v213_v17 = vsub.s32 6, %v5778_v3  ;;  %v5816_v18 = vsub.s32 2, %v5778_v3  ;;  %v113_v20 = vsub.s32 4, %v5778_v3  ;;  %v109_v24 = vsub.s32 0, %v5778_v3  ;;  %s5690_s28 = smov 94  }
  0x19   :  { %v2316_v10 = vrot.slane %v5791_v8, %v163_v5  ;;  %v2384_v11 = vrot.slane %v5791_v8, %v263_v6  ;;  %5298 = vset.pattern.permute.xlu0 %v5680_v12  ;;  %146 = vperm.xlu1 %5293, %v60_v7   ;;  %v2380_v31 = vrot.slane %v5791_v8, %v5803_v13  ;;  %vm571_vm2 = vcmask 1031168  }
  0x1a   :  { %192 = vperm.xlu0 %5298, %v59_v4   ;;  %v2350_v19 = vrot.slane %v5791_v8, %v213_v17  ;;  %v2282_v23 = vrot.slane %v5791_v8, %v113_v20  ;;  %v2346_v35 = vrot.slane %v5791_v8, %v5816_v18  ;;  %v2312_v44 = vrot.slane %v5791_v8, %v5794_v9 }
  0x1b   :  { %v5806_v14 = vrot.slane %v2316_v10, %v5794_v9  ;;  %v5812_v16 = vrot.slane %v2384_v11, %v5803_v13  ;;  %v5847_v32 = vrot.slane %v2380_v31, %v5803_v13  ;;  %v2278_v45 = vrot.slane %v5791_v8, %v109_v24 }
  0x1c   :  { %v5823_v21 = vrot.slane %v2350_v19, %v5816_v18  ;;  %v5830_v26 = vrot.slane %v2282_v23, %v109_v24  ;;  %v5864_v39 = vrot.slane %v2346_v35, %v5816_v18  ;;  %v110_v48 = vrot.slane %v85_v43, %v109_v24 }
  0x1d   :  { %5294 = vset.pattern.permute.xlu1 %v5680_v12  ;;  %v114_v49 = vrot.slane %v85_v43, %v113_v20  ;;  %v160_v50 = vrot.slane %v85_v43, %v5794_v9  ;;  %v164_v51 = vrot.slane %v85_v43, %v163_v5  ;;  %v2322_v52 = vrot.slane %v2312_v44, %v5794_v9 }
  0x1e   :  { %204 = vperm.xlu0 %5298, %v62_v15   ;;  %196 = vperm.xlu1 %5294, %v60_v7   ;;  %v2288_v55 = vrot.slane %v2278_v45, %v109_v24  ;;  %v260_v56 = vrot.slane %v85_v43, %v5803_v13  ;;  %v264_v57 = vrot.slane %v85_v43, %v263_v6  ;;  %vm690_vm3 = vcmask 916480  }
  0x1f   :  { %v210_v58 = vrot.slane %v85_v43, %v5816_v18  ;;  %v214_v59 = vrot.slane %v85_v43, %v213_v17  ;;  %v5900_v60 = vrot.slane %v110_v48, %v109_v24  ;;  %v5902_v61 = vrot.slane %v114_v49, %v109_v24 }
  0x20   :  { %v5905_v62 = vrot.slane %v160_v50, %v5794_v9  ;;  %v5908_v63 = vrot.slane %v164_v51, %v5794_v9  ;;  %v5915_v6 = vrot.slane %v260_v56, %v5803_v13  ;;  %vm809_vm4 = vcmask 908288  }
  0x21   :  { %v5921_v8 = vrot.slane %v210_v58, %v5816_v18  ;;  %v5924_v9 = vrot.slane %v214_v59, %v5816_v18  ;;  %vm928_vm5 = vcmask 900096   ;;  %vm1047_vm6 = vcmask 785408  }
  0x22   :  { %5301 = vset.pattern.permute.xlu0 %v5681_v25  ;;  %5295 = vset.pattern.permute.xlu1 %v5681_v25  ;;  %vm1166_vm7 = vcmask 777216   ;;  %vm1285_vm8 = vcmask 769024   ;;  %vm1633_vm9 = vcmask 1045504   ;;  %vm5691_vm10 = vmmov 1  }
  0x23   :  { %88 = vperm.xlu0 %5301, %v59_v4   ;;  %98 = vperm.xlu1 %5295, %v61_v22   ;;  %vm6246_vm11 = vmpackc.low %vm1633_vm9, %vm5691_vm10  ;;  %vm1983_vm12 = vcmask 64512   ;;  %vm5692_vm13 = vmmov 0   ;;  %vm2122_vm14 = vcmask 523264   ;;  %vm2270_vm15 = vcmask 24576  }
  0x27   :  { %93 = vperm.xlu0 %5301, %v60_v7   ;;  %5296 = vset.pattern.permute.xlu1 %v5679_v1 }
  0x28   :  { %150 = vperm.xlu1 %5296, %v61_v22  }
  0x2b   :  { %103 = vperm.xlu0 %5301, %v62_v15  }
  0x2c   :  { %154 = vperm.xlu1 %5296, %v62_v15  }
  0x2f   :  { %293 = vperm.xlu0 %5301, %v63_v27  }
  0x30   :  { %5299 = vset.pattern.permute.xlu1 %v5678_v0 }
  0x31   :  { %246 = vperm.xlu1 %5299, %v60_v7   ;;  %v5918_v7 = vrot.slane %v264_v57, %v5803_v13 }
  0x33   :  { %308 = vperm.xlu0 %5301, %v66_v28  }
  0x35   :  { %5300 = vset.pattern.permute.xlu1 %v5680_v12 }
  0x36   :  { %200 = vperm.xlu1 %5300, %v61_v22  }
  0x3a   :  { %5302 = vset.pattern.permute.xlu1 %v5678_v0 }
  0x3b   :  { %250 = vperm.xlu1 %5302, %v61_v22  }
  0x3f   :  { %254 = vperm.xlu1 %5302, %v62_v15  }
  0x43   :  { %5303 = vset.pattern.permute.xlu1 %v5681_v25 }
  0x44   :  { %298 = vperm.xlu1 %5303, %v64_v29  }
  0x48   :  { %303 = vperm.xlu1 %5303, %v65_v30  }
  0x94   :  { %v143_v33 = vpop.permute.xlu1 %142  ;;  %v5849_v34 = vpop.permute.xlu0 %242 }
  0x95   :  { %v5855_v36 = vmul.f32 %v5847_v32, %v5849_v34  ;;  %v5859_v37 = vmul.f32 %v5812_v16, %v5849_v34  ;;  %v2327_v2 = vmul.f32 %v2322_v52, %v143_v33  ;;  %v2328_v4 = vmul.f32 %v5806_v14, %v143_v33 }
  0x96   :  { %v175_v17 = vmul.f32 %v5905_v62, %v143_v33  ;;  %v176_v19 = vmul.f32 %v5908_v63, %v143_v33  ;;  %v275_v49 = vmul.f32 %v5915_v6, %v5849_v34  ;;  %v276_v50 = vmul.f32 %v5918_v7, %v5849_v34 }
  0x98   :  { %v5861_v38 = vpop.permute.xlu1 %146 }
  0x99   :  { %v193_v40 = vpop.permute.xlu0 %192  ;;  %v2329_v20 = vmul.f32 %v2322_v52, %v5861_v38  ;;  %v2330_v13 = vmul.f32 %v5806_v14, %v5861_v38  ;;  %v177_v58 = vmul.f32 %v5905_v62, %v5861_v38 }
  0x9a   :  { %v5867_v41 = vmul.f32 %v5864_v39, %v193_v40  ;;  %v5870_v42 = vmul.f32 %v5823_v21, %v193_v40  ;;  %v225_v18 = vmul.f32 %v5921_v8, %v193_v40  ;;  %v226_v23 = vmul.f32 %v5924_v9, %v193_v40 }
  0x9d   :  { %v5878_v46 = vpop.permute.xlu1 %196  ;;  %v5880_v47 = vpop.permute.xlu0 %204 }
  0x9e   :  { %v5888_v53 = vmul.f32 %v5864_v39, %v5880_v47  ;;  %v5892_v54 = vmul.f32 %v5823_v21, %v5880_v47  ;;  %v5962_v34 = vmul.f32 %v5921_v8, %v5878_v46 }
  0xa2   :  { %v89_v0 = vpop.permute.xlu0 %88  ;;  %v5910_v1 = vpop.permute.xlu1 %98 }
  0xa3   :  { %v2293_v5 = vmul.f32 %v2288_v55, %v89_v0  ;;  %v2294_v3 = vmul.f32 %v5830_v26, %v89_v0  ;;  %v125_v10 = vmul.f32 %v5900_v60, %v89_v0  ;;  %v126_v11 = vmul.f32 %v5902_v61, %v89_v0 }
  0xa4   :  { %v2297_v28 = vmul.f32 %v2288_v55, %v5910_v1  ;;  %v2298_v29 = vmul.f32 %v5830_v26, %v5910_v1 }
  0xa5   :  { %v2335_v12 = vadd.f32 %v2327_v2, %v2293_v5  ;;  %v2336_v15 = vadd.f32 %v2328_v4, %v2294_v3  ;;  %v183_v33 = vadd.f32 %v175_v17, %v125_v10  ;;  %v184_v35 = vadd.f32 %v176_v19, %v126_v11 }
  0xa6   :  { %v5933_v22 = vpop.permute.xlu0 %93  ;;  %v178_v10 = vmul.f32 %v5908_v63, %v5861_v38  ;;  %v2363_v38 = vmul.f32 %v5864_v39, %v5878_v46 }
  0xa7   :  { %v2295_v24 = vmul.f32 %v2288_v55, %v5933_v22  ;;  %v2296_v25 = vmul.f32 %v5830_v26, %v5933_v22  ;;  %v5940_v27 = vpop.permute.xlu1 %150  ;;  %v233_v2 = vadd.f32 %v225_v18, %v183_v33  ;;  %v234_v4 = vadd.f32 %v226_v23, %v184_v35 }
  0xa8   :  { %v2331_v30 = vmul.f32 %v2322_v52, %v5940_v27  ;;  %v2332_v31 = vmul.f32 %v5806_v14, %v5940_v27  ;;  %v2369_v5 = vadd.f32 %v5867_v41, %v2335_v12  ;;  %v2370_v3 = vadd.f32 %v5870_v42, %v2336_v15 }
  0xa9   :  { %v2337_v40 = vadd.f32 %v2329_v20, %v2295_v24  ;;  %v2338_v43 = vadd.f32 %v2330_v13, %v2296_v25  ;;  %v283_v17 = vadd.f32 %v275_v49, %v233_v2  ;;  %v5968_v41 = vmul.f32 %v5924_v9, %v5878_v46 }
  0xaa   :  { %v2339_v44 = vadd.f32 %v2331_v30, %v2297_v28  ;;  %v2340_v45 = vadd.f32 %v2332_v31, %v2298_v29  ;;  %v104_v48 = vpop.permute.xlu0 %103  ;;  %v2404_v19 = vadd.f32 %v5859_v37, %v2370_v3  ;;  %v2364_v18 = vmul.f32 %v5823_v21, %v5878_v46 }
  0xab   :  { %v2299_v51 = vmul.f32 %v2288_v55, %v104_v48  ;;  %v2300_v56 = vmul.f32 %v5830_v26, %v104_v48  ;;  %v155_v57 = vpop.permute.xlu1 %154  ;;  %v231_v23 = vmul.f32 %v5921_v8, %v5880_v47  ;;  %v232_v30 = vmul.f32 %v5924_v9, %v5880_v47 }
  0xac   :  { %v2333_v59 = vmul.f32 %v2322_v52, %v155_v57  ;;  %v2334_v0 = vmul.f32 %v5806_v14, %v155_v57  ;;  %v284_v52 = vadd.f32 %v276_v50, %v234_v4  ;;  %v2403_v14 = vadd.f32 %v5855_v36, %v2369_v5 }
  0xad   :  { %v181_v25 = vmul.f32 %v5905_v62, %v155_v57  ;;  %v129_v46 = vmul.f32 %v5900_v60, %v5910_v1  ;;  %v2371_v31 = vadd.f32 %v2363_v38, %v2337_v40  ;;  %v2372_v33 = vadd.f32 %v2364_v18, %v2338_v43 }
  0xae   :  { %v2341_v26 = vadd.f32 %v2333_v59, %v2299_v51  ;;  %v2342_v55 = vadd.f32 %v2334_v0, %v2300_v56  ;;  %v294_v11 = vpop.permute.xlu0 %293  ;;  %v127_v35 = vmul.f32 %v5900_v60, %v5933_v22  ;;  %v132_v49 = vmul.f32 %v5902_v61, %v104_v48 }
  0xaf   :  { %v5978_v20 = vadd.f32 %v294_v11, %v283_v17  ;;  %v5980_v13 = vadd.f32 %v294_v11, %v284_v52  ;;  %v5982_v36 = vadd.f32 %v2403_v14, %v294_v11  ;;  %v5984_v37 = vadd.f32 %v2404_v19, %v294_v11 }
  0xb0   :  { %v247_v42 = vpop.permute.xlu1 %246  ;;  %v5973_v12 = vadd.f32 %v5888_v53, %v2341_v26  ;;  %v5976_v15 = vadd.f32 %v5892_v54, %v2342_v55  ;;  %v131_v54 = vmul.f32 %v5900_v60, %v104_v48  ;;  %v182_v50 = vmul.f32 %v5908_v63, %v155_v57 }
  0xb1   :  { %v2397_v53 = vmul.f32 %v5847_v32, %v247_v42  ;;  %v2398_v24 = vmul.f32 %v5812_v16, %v247_v42  ;;  %v319_v28 = vmax.f32 %v5978_v20, 0.0  ;;  %v320_v29 = vmax.f32 %v5980_v13, 0.0 }
  0xb2   :  { %v2419_v47 = vmax.f32 %v5982_v36, 0.0  ;;  %v2420_v59 = vmax.f32 %v5984_v37, 0.0  ;;  %v128_v60 = vmul.f32 %v5902_v61, %v5933_v22  ;;  %v189_v48 = vadd.f32 %v181_v25, %v131_v54  ;;  %v67_v36 = vld [vmem:[%s6757_s5] sm:$0xff]  ;;  %v68_v37 = vld [vmem:[%s6757_s5 + $0x8] sm:$0xff] }
  0xb3   :  { %v6008_v51 = vpack.i.bf16 %v320_v29, %v319_v28  ;;  %v2405_v57 = vadd.f32 %v2397_v53, %v2371_v31  ;;  %v2406_v0 = vadd.f32 %v2398_v24, %v2372_v33  ;;  %v130_v2 = vmul.f32 %v5902_v61, %v5910_v1 }
  0xb4   :  { %v179_v4 = vmul.f32 %v5905_v62, %v5940_v27  ;;  %v190_v3 = vadd.f32 %v182_v50, %v132_v49  ;;  %v185_v22 = vadd.f32 %v177_v58, %v127_v35  ;;  %v6028_v55 = vpack.i.bf16 %v2420_v59, %v2419_v47 }
  0xb5   :  { %v201_v56 = vpop.permute.xlu1 %200  ;;  %5305 = vrot.lane.b32.xlu1 %v6008_v51, %s5682_s0  ;;  %v186_v11 = vadd.f32 %v178_v10, %v128_v60  ;;  %v239_v62 = vadd.f32 %v231_v23, %v189_v48 }
  0xb6   :  { %v2365_v40 = vmul.f32 %v5864_v39, %v201_v56  ;;  %v2366_v43 = vmul.f32 %v5823_v21, %v201_v56  ;;  %v180_v21 = vmul.f32 %v5908_v63, %v5940_v27  ;;  %v278_v27 = vmul.f32 %v5918_v7, %v247_v42 }
  0xb7   :  { %v229_v58 = vmul.f32 %v5921_v8, %v201_v56  ;;  %v230_v52 = vmul.f32 %v5924_v9, %v201_v56  ;;  %v187_v23 = vadd.f32 %v179_v4, %v129_v46  ;;  %v235_v24 = vadd.f32 %v5962_v34, %v185_v22 }
  0xb8   :  { %v2373_v5 = vadd.f32 %v2365_v40, %v2339_v44  ;;  %v2374_v39 = vadd.f32 %v2366_v43, %v2340_v45  ;;  %v277_v44 = vmul.f32 %v5915_v6, %v247_v42  ;;  %v240_v45 = vadd.f32 %v232_v30, %v190_v3  ;;  %v309_v30 = vpop.permute.xlu0 %308 }
  0xb9   :  { %v188_v53 = vadd.f32 %v180_v21, %v130_v2  ;;  %v236_v54 = vadd.f32 %v5968_v41, %v186_v11 }
  0xba   :  { %v251_v26 = vpop.permute.xlu1 %250 }
  0xbb   :  { %v2399_v61 = vmul.f32 %v5847_v32, %v251_v26  ;;  %v2400_v1 = vmul.f32 %v5812_v16, %v251_v26  ;;  %v279_v31 = vmul.f32 %v5915_v6, %v251_v26  ;;  %v280_v33 = vmul.f32 %v5918_v7, %v251_v26 }
  0xbc   :  { %v286_v35 = vadd.f32 %v278_v27, %v236_v54  ;;  %v238_v46 = vadd.f32 %v230_v52, %v188_v53  ;;  %v1411_v53 = vld [vmem:[#allocation4 + $0x40] sm:$0xff]  ;;  %v1420_v54 = vld [vmem:[#allocation4 + $0x88] sm:$0xff] }
  0xbd   :  { %v2407_v17 = vadd.f32 %v2399_v61, %v2373_v5  ;;  %v2408_v63 = vadd.f32 %v2400_v1, %v2374_v39 }
  0xbe   :  { %v255_v14 = vpop.permute.xlu1 %254 }
  0xbf   :  { %v281_v19 = vmul.f32 %v5915_v6, %v255_v14  ;;  %v282_v10 = vmul.f32 %v5918_v7, %v255_v14  ;;  %v2401_v38 = vmul.f32 %v5847_v32, %v255_v14  ;;  %v2402_v18 = vmul.f32 %v5812_v16, %v255_v14 }
  0xc0   :  { %v285_v32 = vadd.f32 %v277_v44, %v235_v24  ;;  %v237_v16 = vadd.f32 %v229_v58, %v187_v23  ;;  %v1403_v23 = vld [vmem:[#allocation4] sm:$0xff] }
  0xc1   :  { %v289_v42 = vadd.f32 %v281_v19, %v239_v62  ;;  %v290_v25 = vadd.f32 %v282_v10, %v240_v45  ;;  %v2409_v8 = vadd.f32 %v2401_v38, %v5973_v12  ;;  %v2410_v9 = vadd.f32 %v2402_v18, %v5976_v15 }
  0xc2   :  { %v287_v48 = vadd.f32 %v279_v31, %v237_v16  ;;  %v288_v15 = vadd.f32 %v280_v33, %v238_v46  ;;  %v4639_v24 = vpack.c.bf16 %v1411_v53, %v1403_v23  ;;  %v1436_v31 = vld [vmem:[#allocation4 + $0x108] sm:$0xff]  ;;  %v1443_v16 = vld [vmem:[#allocation4 + $0x140] sm:$0xff] }
  0xc3   :  { %v317_v49 = vadd.f32 %v309_v30, %v289_v42  ;;  %v299_v50 = vpop.permute.xlu1 %298  ;;  %v318_v43 = vadd.f32 %v309_v30, %v290_v25  ;;  %v2417_v2 = vadd.f32 %v2409_v8, %v309_v30  ;;  %v2418_v5 = vadd.f32 %v2410_v9, %v309_v30  ;;  %v1428_v42 = vld [vmem:[#allocation4 + $0xc8] sm:$0xff]  ;;  %v1419_v25 = vld [vmem:[#allocation4 + $0x80] sm:$0xff] }
  0xc4   :  { %v313_v34 = vadd.f32 %v299_v50, %v285_v32  ;;  %v314_v56 = vadd.f32 %v299_v50, %v286_v35  ;;  %v2413_v41 = vadd.f32 %v2405_v57, %v299_v50  ;;  %v2414_v40 = vadd.f32 %v2406_v0, %v299_v50  ;;  %v1427_v8 = vld [vmem:[#allocation4 + $0xc0] sm:$0xff]  ;;  %v1444_v33 = vld [vmem:[#allocation4 + $0x148] sm:$0xff] }
  0xc5   :  { %v325_v6 = vmax.f32 %v317_v49, 0.0  ;;  %v326_v21 = vmax.f32 %v318_v43, 0.0  ;;  %v2425_v57 = vmax.f32 %v2417_v2, 0.0  ;;  %v2426_v0 = vmax.f32 %v2418_v5, 0.0  ;;  %v1435_v35 = vld [vmem:[#allocation4 + $0x100] sm:$0xff]  ;;  %v1452_v49 = vld [vmem:[#allocation4 + $0x188] sm:$0xff] }
  0xc6   :  { %v321_v60 = vmax.f32 %v313_v34, 0.0  ;;  %v322_v12 = vmax.f32 %v314_v56, 0.0  ;;  %v2421_v1 = vmax.f32 %v2413_v41, 0.0  ;;  %v2422_v44 = vmax.f32 %v2414_v40, 0.0  ;;  %v1460_v50 = vld [vmem:[#allocation4 + $0x1c8] sm:$0xff]  ;;  %v1451_v56 = vld [vmem:[#allocation4 + $0x180] sm:$0xff] }
  0xc7   :  { %v304_v4 = vpop.permute.xlu1 %303  ;;  %v5319_v58 = vpack.i.bf16 %v326_v21, %v325_v6  ;;  %v6066_v18 = vpack.i.bf16 %v2426_v0, %v2425_v57  ;;  %v4641_v9 = vpack.c.bf16 %v1428_v42, %v1420_v54  ;;  %v4643_v30 = vpack.c.bf16 %v1427_v8, %v1419_v25  ;;  %v1459_v41 = vld [vmem:[#allocation4 + $0x1c0] sm:$0xff]  ;;  %v1468_v40 = vld [vmem:[#allocation4 + $0x208] sm:$0xff] }
  0xc8   :  { %v315_v7 = vadd.f32 %v304_v4, %v287_v48  ;;  %v316_v39 = vadd.f32 %v304_v4, %v288_v15  ;;  %v2415_v3 = vadd.f32 %v2407_v17, %v304_v4  ;;  %v2416_v22 = vadd.f32 %v2408_v63, %v304_v4  ;;  %v1476_v43 = vld [vmem:[#allocation4 + $0x248] sm:$0xff]  ;;  %v1467_v48 = vld [vmem:[#allocation4 + $0x200] sm:$0xff] }
  0xc9   :  { %v5309_v26 = vpack.i.bf16 %v322_v12, %v321_v60  ;;  %v6051_v17 = vpack.c.bf16 %v322_v12, %v320_v29  ;;  %v5683_v63 = vmov 0.0   ;;  %v6056_v52 = vpack.c.bf16 %v321_v60, %v319_v28  ;;  %v1475_v15 = vld [vmem:[#allocation4 + $0x240] sm:$0xff]  ;;  %v1484_v2 = vld [vmem:[#allocation4 + $0x288] sm:$0xff] }
  0xca   :  { %v323_v11 = vmax.f32 %v315_v7, 0.0  ;;  %v324_v61 = vmax.f32 %v316_v39, 0.0  ;;  %v2423_v45 = vmax.f32 %v2415_v3, 0.0  ;;  %v2424_v27 = vmax.f32 %v2416_v22, 0.0  ;;  %456 = vmatprep.mubr.f32.mxu0 %v5683_v63  ;;  %v1492_v4 = vld [vmem:[#allocation4 + $0x2c8] sm:$0xff]  ;;  %v1483_v7 = vld [vmem:[#allocation4 + $0x280] sm:$0xff] }
  0xcb   :  { %5310 = vrot.lane.b32.xlu0 %v5309_v26, %s5682_s0  ;;  %v6062_v10 = vpack.i.bf16 %v2422_v44, %v2421_v1  ;;  %v6075_v20 = vpack.c.bf16 %v2422_v44, %v2420_v59  ;;  %v6079_v13 = vpack.c.bf16 %v2421_v1, %v2419_v47  ;;  %v1404_v47 = vld [vmem:[#allocation4 + $0x8] sm:$0xff]  ;;  %v4645_v32 = vpack.c.bf16 %v1444_v33, %v1436_v31  ;;  %v1491_v39 = vld [vmem:[#allocation4 + $0x2c0] sm:$0xff] }
  0xcc   :  { %v5314_v62 = vpack.i.bf16 %v324_v61, %v323_v11  ;;  %v6058_v14 = vpack.c.bf16 %v326_v21, %v324_v61  ;;  %v6060_v19 = vpack.c.bf16 %v325_v6, %v323_v11  ;;  %v6064_v38 = vpack.i.bf16 %v2424_v27, %v2423_v45  ;;  %v1412_v59 = vld [vmem:[#allocation4 + $0x48] sm:$0xff]  ;;  %v1499_v11 = vld [vmem:[#allocation4 + $0x300] sm:$0xff] }
  0xcd   :  { %v6081_v28 = vpack.c.bf16 %v2426_v0, %v2424_v27  ;;  %v6083_v29 = vpack.c.bf16 %v2425_v57, %v2423_v45  ;;  %v4647_v46 = vpack.c.bf16 %v1443_v16, %v1435_v35  ;;  %v4649_v34 = vpack.c.bf16 %v1460_v50, %v1452_v49  ;;  %v1500_v21 = vld [vmem:[#allocation4 + $0x308] sm:$0xff]  ;;  %v1507_v61 = vld [vmem:[#allocation4 + $0x340] sm:$0xff] }
  0xce   :  { %5315 = vrot.lane.b32.xlu1 %v5314_v62, %s5682_s0  ;;  %v4651_v60 = vpack.c.bf16 %v1459_v41, %v1451_v56  ;;  %v4653_v12 = vpack.c.bf16 %v1476_v43, %v1468_v40  ;;  %v4655_v6 = vpack.c.bf16 %v1475_v15, %v1467_v48  ;;  %v4657_v5 = vpack.c.bf16 %v1492_v4, %v1484_v2  ;;  %v1508_v3 = vld [vmem:[#allocation4 + $0x348] sm:$0xff]  ;;  %v1515_v44 = vld [vmem:[#allocation4 + $0x380] sm:$0xff] }
  0xcf   :  { %5320 = vrot.lane.b32.xlu0 %v5319_v58, %s5682_s0  ;;  %v4659_v22 = vpack.c.bf16 %v1491_v39, %v1483_v7  ;;  %v1516_v57 = vld [vmem:[#allocation4 + $0x388] sm:$0xff]  ;;  %v4663_v1 = vpack.c.bf16 %v1507_v61, %v1499_v11  ;;  %v1523_v45 = vld [vmem:[#allocation4 + $0x3c0] sm:$0xff] }
  0xd0   :  { %v1524_v0 = vld [vmem:[#allocation4 + $0x3c8] sm:$0xff]  ;;  %v1547_v54 = vld [vmem:[#allocation4 + $0x480] sm:$0xff] }
  0xd1   :  { %v1532_v27 = vld [vmem:[#allocation4 + $0x408] sm:$0xff]  ;;  %v1555_v42 = vld [vmem:[#allocation4 + $0x4c0] sm:$0xff] }
  0xd2   :  { %5325 = vrot.lane.b32.xlu1 %v6008_v51, %s5684_s23  ;;  %v1548_v23 = vld [vmem:[#allocation4 + $0x488] sm:$0xff]  ;;  %v1563_v31 = vld [vmem:[#allocation4 + $0x500] sm:$0xff] }
  0xd3   :  { %5330 = vrot.lane.b32.xlu0 %v5309_v26, %s5684_s23  ;;  %v1564_v25 = vld [vmem:[#allocation4 + $0x508] sm:$0xff]  ;;  %v1571_v33 = vld [vmem:[#allocation4 + $0x540] sm:$0xff] }
  0xd4   :  { %v1572_v8 = vld [vmem:[#allocation4 + $0x548] sm:$0xff]  ;;  %v4679_v16 = vpack.c.bf16 %v1571_v33, %v1563_v31  ;;  %v1579_v49 = vld [vmem:[#allocation4 + $0x580] sm:$0xff] }
  0xd5   :  { %v1588_v35 = vld [vmem:[#allocation4 + $0x5c8] sm:$0xff]  ;;  %v1587_v50 = vld [vmem:[#allocation4 + $0x5c0] sm:$0xff] }
  0xd6   :  { %5335 = vrot.lane.b32.xlu1 %v5314_v62, %s5684_s23  ;;  %v1604_v56 = vld [vmem:[#allocation4 + $0x648] sm:$0xff]  ;;  %v4683_v40 = vpack.c.bf16 %v1587_v50, %v1579_v49 }
  0xd7   :  { %5340 = vrot.lane.b32.xlu0 %v5319_v58, %s5684_s23 }
  0xda   :  { %5345 = vrot.lane.b32.xlu1 %v6008_v51, %s5685_s6 }
  0xdb   :  { %5350 = vrot.lane.b32.xlu0 %v5309_v26, %s5685_s6 }
  0xde   :  { %5355 = vrot.lane.b32.xlu1 %v5314_v62, %s5685_s6 }
  0xdf   :  { %5360 = vrot.lane.b32.xlu0 %v5319_v58, %s5685_s6 }
  0xe2   :  { %5365 = vrot.lane.b32.xlu1 %v6008_v51, %s5686_s24 }
  0xe3   :  { %5370 = vrot.lane.b32.xlu0 %v5309_v26, %s5686_s24 }
  0xe6   :  { %5375 = vrot.lane.b32.xlu1 %v5314_v62, %s5686_s24 }
  0xe7   :  { %5380 = vrot.lane.b32.xlu0 %v5319_v58, %s5686_s24 }
  0xea   :  { %5385 = vrot.lane.b32.xlu1 %v6008_v51, %s5687_s25 }
  0xeb   :  { %5390 = vrot.lane.b32.xlu0 %v5309_v26, %s5687_s25 }
  0xee   :  { %5395 = vrot.lane.b32.xlu1 %v5314_v62, %s5687_s25 }
  0xef   :  { %5400 = vrot.lane.b32.xlu0 %v5319_v58, %s5687_s25 }
  0xf2   :  { %5405 = vrot.lane.b32.xlu1 %v6008_v51, %s5688_s26 }
  0xf3   :  { %5410 = vrot.lane.b32.xlu0 %v5309_v26, %s5688_s26 }
  0xf6   :  { %5415 = vrot.lane.b32.xlu1 %v5314_v62, %s5688_s26 }
  0xf7   :  { %5420 = vrot.lane.b32.xlu0 %v5319_v58, %s5688_s26 }
  0xfa   :  { %5425 = vrot.lane.b32.xlu1 %v6008_v51, %s5689_s27 }
  0xfb   :  { %5430 = vrot.lane.b32.xlu0 %v5309_v26, %s5689_s27 }
  0xfe   :  { %5435 = vrot.lane.b32.xlu1 %v5314_v62, %s5689_s27 }
  0xff   :  { %5440 = vrot.lane.b32.xlu0 %v5319_v58, %s5689_s27 }
 0x102   :  { %5445 = vrot.lane.b32.xlu1 %v6008_v51, %s5690_s28  ;;  %v4637_v51 = vpack.c.bf16 %v1412_v59, %v1404_v47  ;;  %v1531_v47 = vld [vmem:[#allocation4 + $0x400] sm:$0xff] }
 0x103   :  { %5450 = vrot.lane.b32.xlu0 %v5309_v26, %s5690_s28  ;;  %v4661_v26 = vpack.c.bf16 %v1508_v3, %v1500_v21  ;;  %v1539_v59 = vld [vmem:[#allocation4 + $0x440] sm:$0xff] }
 0x104   :  { %4638 = vmatprep.subr.bf16.mxu1 %v4637_v51  ;;  %v1556_v51 = vld [vmem:[#allocation4 + $0x4c8] sm:$0xff]  ;;  %v4671_v53 = vpack.c.bf16 %v1539_v59, %v1531_v47 }
 0x105   :  { %4640 = vmatpush1.bf16.msra.mxu1 %v4639_v24  ;;  %v4673_v24 = vpack.c.bf16 %v1556_v51, %v1548_v23 }
 0x106   :  { %5455 = vrot.lane.b32.xlu1 %v5314_v62, %s5690_s28  ;;  %4642 = vmatprep.subr.bf16.mxu1 %v4641_v9  ;;  %v4665_v62 = vpack.c.bf16 %v1524_v0, %v1516_v57  ;;  %v4675_v9 = vpack.c.bf16 %v1555_v42, %v1547_v54 }
 0x107   :  { %5460 = vrot.lane.b32.xlu0 %v5319_v58, %s5690_s28  ;;  %v1540_v58 = vld [vmem:[#allocation4 + $0x448] sm:$0xff] }
 0x109   :  { %4644 = vmatpush1.bf16.msra.mxu1 %v4643_v30  ;;  %v4677_v30 = vpack.c.bf16 %v1572_v8, %v1564_v25 }
 0x10a   :  { %1387 = vperm.xlu1 %5303, %v67_v36   ;;  %4646 = vmatprep.subr.bf16.mxu1 %v4645_v32  ;;  %v4667_v36 = vpack.c.bf16 %v1523_v45, %v1515_v44  ;;  %v1580_v32 = vld [vmem:[#allocation4 + $0x588] sm:$0xff] }
 0x10b   :  { %1392 = vperm.xlu0 %5301, %v68_v37   ;;  %v4669_v37 = vpack.c.bf16 %v1540_v58, %v1532_v27 }
 0x10d   :  { %4648 = vmatpush1.bf16.msra.mxu1 %v4647_v46  ;;  %v4681_v46 = vpack.c.bf16 %v1588_v35, %v1580_v32 }
 0x10e   :  { %4650 = vmatprep.subr.bf16.mxu1 %v4649_v34  ;;  %v1596_v34 = vld [vmem:[#allocation4 + $0x608] sm:$0xff] }
 0x10f   :  { %v4685_v43 = vpack.c.bf16 %v1604_v56, %v1596_v34 }
 0x111   :  { %4652 = vmatpush1.bf16.msra.mxu1 %v4651_v60  ;;  %v1595_v60 = vld [vmem:[#allocation4 + $0x600] sm:$0xff] }
 0x112   :  { %4654 = vmatprep.subr.bf16.mxu1 %v4653_v12  ;;  %v1603_v12 = vld [vmem:[#allocation4 + $0x640] sm:$0xff] }
 0x115   :  { %4656 = vmatpush1.bf16.msra.mxu1 %v4655_v6 }
 0x116   :  { %4658 = vmatprep.subr.bf16.mxu1 %v4657_v5  ;;  %v4687_v5 = vpack.c.bf16 %v1603_v12, %v1595_v60 }
 0x119   :  { %4660 = vmatpush1.bf16.msra.mxu1 %v4659_v22 }
 0x11a   :  { %4662 = vmatprep.subr.bf16.mxu1 %v4661_v26 }
 0x11d   :  { %4664 = vmatpush1.bf16.msra.mxu1 %v4663_v1 }
 0x11e   :  { %4666 = vmatprep.subr.bf16.mxu1 %v4665_v62 }
 0x121   :  { %4668 = vmatpush1.bf16.msra.mxu1 %v4667_v36  ;;  %v4356_v36 = vld [vmem:[%s6756_s4 + $0x10] sm:$0xff] }
 0x122   :  { %4670 = vmatprep.subr.bf16.mxu1 %v4669_v37 }
 0x125   :  { %4672 = vmatpush1.bf16.msra.mxu1 %v4671_v53 }
 0x126   :  { %4674 = vmatprep.subr.bf16.mxu1 %v4673_v24  ;;  %v4357_v24 = vld [vmem:[%s6756_s4 + $0x18] sm:$0xff] }
 0x127   :  { %v5306_v41 = vpop.permute.xlu1 %5305 }
 0x128   :  { %v5308_v48 = vunpack.i.h.bf16 %v5306_v41  ;;  %v5307_v15 = vunpack.i.l.bf16 %v5306_v41 }
 0x129   :  { %4676 = vmatpush1.bf16.msra.mxu1 %v4675_v9 }
 0x12a   :  { %4678 = vmatprep.subr.bf16.mxu1 %v4677_v30  ;;  %v373_v21 = vsel %vm372_vm0, %v5307_v15, %v5308_v48 }
 0x12d   :  { %4680 = vmatpush1.bf16.msra.mxu1 %v4679_v16 }
 0x12e   :  { %4682 = vmatprep.subr.bf16.mxu1 %v4681_v46 }
 0x131   :  { %4684 = vmatpush1.bf16.msra.mxu1 %v4683_v40 }
 0x132   :  { %4686 = vmatprep.subr.bf16.mxu1 %v4685_v43 }
 0x135   :  { %4688 = vmatpush1.bf16.msra.mxu1 %v4687_v5 }
 0x13d   :  { %v5311_v2 = vpop.permute.xlu0 %5310 }
 0x13e   :  { %v5313_v4 = vunpack.i.h.bf16 %v5311_v2  ;;  %v5312_v6 = vunpack.i.l.bf16 %v5311_v2 }
 0x140   :  { %v5316_v7 = vpop.permute.xlu1 %5315  ;;  %v4565_v39 = vpack.c.bf16 %v5313_v4, %v5308_v48  ;;  %v374_v3 = vsel %vm372_vm0, %v5312_v6, %v5313_v4 }
 0x141   :  { %v5321_v22 = vpop.permute.xlu0 %5320  ;;  %v5318_v26 = vunpack.i.h.bf16 %v5316_v7  ;;  %v5317_v11 = vunpack.i.l.bf16 %v5316_v7  ;;  %v4567_v61 = vpack.c.bf16 %v374_v3, %v373_v21  ;;  %v4362_v7 = vld [vmem:[%s6756_s4 + $0x20] sm:$0xff] }
 0x142   :  { %v5323_v57 = vunpack.i.h.bf16 %v5321_v22  ;;  %v5322_v0 = vunpack.i.l.bf16 %v5321_v22  ;;  %4566 = vmatprep.subr.bf16.mxu0 %v4565_v39 }
 0x143   :  { %4568 = vmatpush1.bf16.msra.mxu0 %v4567_v61  ;;  %v375_v1 = vsel %vm372_vm0, %v5317_v11, %v5318_v26 }
 0x144   :  { %v4569_v62 = vpack.c.bf16 %v5323_v57, %v5318_v26  ;;  %v5326_v44 = vpop.permute.xlu1 %5325  ;;  %v376_v45 = vsel %vm372_vm0, %v5322_v0, %v5323_v57 }
 0x145   :  { %v5331_v27 = vpop.permute.xlu0 %5330  ;;  %v4571_v58 = vpack.c.bf16 %v376_v45, %v375_v1  ;;  %v5328_v23 = vunpack.i.h.bf16 %v5326_v44  ;;  %v5327_v51 = vunpack.i.l.bf16 %v5326_v44 }
 0x146   :  { %4570 = vmatprep.subr.bf16.mxu0 %v4569_v62  ;;  %v5333_v47 = vunpack.i.h.bf16 %v5331_v27  ;;  %v5332_v59 = vunpack.i.l.bf16 %v5331_v27  ;;  %v4363_v62 = vld [vmem:[%s6756_s4 + $0x28] sm:$0xff] }
 0x147   :  { %4572 = vmatpush1.bf16.msra.mxu0 %v4571_v58  ;;  %v572_v25 = vsel %vm571_vm2, %v5327_v51, %v5328_v23 }
 0x148   :  { %4574 = vmatprep.subr.bf16.mxu0 %v6051_v17  ;;  %v5336_v37 = vpop.permute.xlu1 %5335  ;;  %v573_v54 = vsel %vm571_vm2, %v5332_v59, %v5333_v47  ;;  %v4581_v42 = vpack.c.bf16 %v5333_v47, %v5328_v23 }
 0x149   :  { %v5341_v53 = vpop.permute.xlu0 %5340  ;;  %v5338_v31 = vunpack.i.h.bf16 %v5336_v37  ;;  %v5337_v33 = vunpack.i.l.bf16 %v5336_v37 }
 0x14a   :  { %4358 = vmatmul.mubr.msk.f32.vlgmr.msra.gmra.mrb[0].mxu0 %vm385_vm1, %v4356_v36  ;;  %v5343_v9 = vunpack.i.h.bf16 %v5341_v53  ;;  %v5342_v30 = vunpack.i.l.bf16 %v5341_v53  ;;  %v4366_v53 = vld [vmem:[%s6756_s4 + $0x30] sm:$0xff] }
 0x14b   :  { %4576 = vmatpush1.bf16.msra.mxu0 %v6056_v52  ;;  %462 = vmatprep.mubr.f32.mxu0 %v5683_v63  ;;  %v335_v52 = vld [vmem:[%s6756_s4] sm:$0xff]  ;;  %v574_v41 = vsel %vm571_vm2, %v5337_v33, %v5338_v31 }
 0x14c   :  { %4578 = vmatprep.subr.bf16.mxu0 %v6058_v14  ;;  %v5346_v17 = vpop.permute.xlu1 %5345  ;;  %v4583_v14 = vpack.c.bf16 %v573_v54, %v572_v25  ;;  %v575_v34 = vsel %vm571_vm2, %v5342_v30, %v5343_v9  ;;  %v4585_v56 = vpack.c.bf16 %v5343_v9, %v5338_v31 }
 0x14d   :  { %v5351_v8 = vpop.permute.xlu0 %5350  ;;  %v5348_v46 = vunpack.i.h.bf16 %v5346_v17  ;;  %v5347_v49 = vunpack.i.l.bf16 %v5346_v17  ;;  %v4587_v43 = vpack.c.bf16 %v575_v34, %v574_v41 }
 0x14e   :  { %4359 = vmatmul.mubr.msk.f32.gmra.mrb[2].mxu0 %vm385_vm1, %v4357_v24  ;;  %v5353_v35 = vunpack.i.h.bf16 %v5351_v8  ;;  %v5352_v16 = vunpack.i.l.bf16 %v5351_v8 }
 0x14f   :  { %4580 = vmatpush1.bf16.msra.mxu0 %v6060_v19  ;;  %539 = vmatprep.mubr.f32.mxu0 %v5683_v63  ;;  %v336_v19 = vld [vmem:[%s6756_s4 + $0x8] sm:$0xff]  ;;  %v691_v48 = vsel %vm690_vm3, %v5347_v49, %v5348_v46 }
 0x150   :  { %4582 = vmatprep.subr.bf16.mxu0 %v4581_v42  ;;  %v5356_v32 = vpop.permute.xlu1 %5355  ;;  %v692_v60 = vsel %vm690_vm3, %v5352_v16, %v5353_v35  ;;  %v4589_v12 = vpack.c.bf16 %v5353_v35, %v5348_v46 }
 0x151   :  { %v5361_v50 = vpop.permute.xlu0 %5360  ;;  %v5358_v6 = vunpack.i.h.bf16 %v5356_v32  ;;  %v5357_v5 = vunpack.i.l.bf16 %v5356_v32  ;;  %v4591_v39 = vpack.c.bf16 %v692_v60, %v691_v48 }
 0x152   :  { %4360 = vmatmul.mubr.msk.f32.vlgmr.msra.gmra.mrb[0].mxu0 %vm385_vm1, %v335_v52  ;;  %v5363_v2 = vunpack.i.h.bf16 %v5361_v50  ;;  %v5362_v4 = vunpack.i.l.bf16 %v5361_v50  ;;  %v4367_v52 = vld [vmem:[%s6756_s4 + $0x38] sm:$0xff] }
 0x153   :  { %4584 = vmatpush1.bf16.msra.mxu0 %v4583_v14  ;;  %545 = vmatprep.mubr.f32.mxu0 %v5683_v63  ;;  %v693_v1 = vsel %vm690_vm3, %v5357_v5, %v5358_v6 }
 0x154   :  { %4586 = vmatprep.subr.bf16.mxu0 %v4585_v56  ;;  %v5366_v40 = vpop.permute.xlu1 %5365  ;;  %v694_v57 = vsel %vm690_vm3, %v5362_v4, %v5363_v2  ;;  %v4593_v0 = vpack.c.bf16 %v5363_v2, %v5358_v6 }
 0x155   :  { %v5371_v15 = vpop.permute.xlu0 %5370  ;;  %v5368_v26 = vunpack.i.h.bf16 %v5366_v40  ;;  %v5367_v11 = vunpack.i.l.bf16 %v5366_v40  ;;  %v4595_v45 = vpack.c.bf16 %v694_v57, %v693_v1 }
 0x156   :  { %4361 = vmatmul.mubr.msk.f32.gmra.mrb[2].mxu0 %vm385_vm1, %v336_v19  ;;  %v5373_v3 = vunpack.i.h.bf16 %v5371_v15  ;;  %v5372_v22 = vunpack.i.l.bf16 %v5371_v15  ;;  %v4370_v19 = vld [vmem:[%s6756_s4 + $0x40] sm:$0xff] }
 0x157   :  { %4588 = vmatpush1.bf16.msra.mxu0 %v4587_v43  ;;  %654 = vmatprep.mubr.f32.mxu0 %v5683_v63  ;;  %v810_v36 = vsel %vm809_vm4, %v5367_v11, %v5368_v26 }
 0x158   :  { %4590 = vmatprep.subr.bf16.mxu0 %v4589_v12  ;;  %v5376_v21 = vpop.permute.xlu1 %5375  ;;  %v811_v27 = vsel %vm809_vm4, %v5372_v22, %v5373_v3  ;;  %v4597_v58 = vpack.c.bf16 %v5373_v3, %v5368_v26 }
 0x159   :  { %v5381_v61 = vpop.permute.xlu0 %5380  ;;  %v5378_v23 = vunpack.i.h.bf16 %v5376_v21  ;;  %v5377_v51 = vunpack.i.l.bf16 %v5376_v21  ;;  %v4599_v24 = vpack.c.bf16 %v811_v27, %v810_v36 }
 0x15a   :  { %4364 = vmatmul.mubr.msk.f32.vlgmr.msra.gmra.mrb[0].mxu0 %vm385_vm1, %v4362_v7  ;;  %v5383_v47 = vunpack.i.h.bf16 %v5381_v61  ;;  %v5382_v59 = vunpack.i.l.bf16 %v5381_v61  ;;  %v4371_v7 = vld [vmem:[%s6756_s4 + $0x48] sm:$0xff] }
 0x15b   :  { %4592 = vmatpush1.bf16.msra.mxu0 %v4591_v39  ;;  %660 = vmatprep.mubr.f32.mxu0 %v5683_v63  ;;  %v812_v33 = vsel %vm809_vm4, %v5377_v51, %v5378_v23 }
 0x15c   :  { %4594 = vmatprep.subr.bf16.mxu0 %v4593_v0  ;;  %v5386_v44 = vpop.permute.xlu1 %5385  ;;  %v813_v30 = vsel %vm809_vm4, %v5382_v59, %v5383_v47  ;;  %v4601_v31 = vpack.c.bf16 %v5383_v47, %v5378_v23 }
 0x15d   :  { %v5391_v37 = vpop.permute.xlu0 %5390  ;;  %v5388_v25 = vunpack.i.h.bf16 %v5386_v44  ;;  %v5387_v8 = vunpack.i.l.bf16 %v5386_v44  ;;  %v4603_v32 = vpack.c.bf16 %v813_v30, %v812_v33 }
 0x15e   :  { %4365 = vmatmul.mubr.msk.f32.gmra.mrb[2].mxu0 %vm385_vm1, %v4363_v62  ;;  %v5393_v54 = vunpack.i.h.bf16 %v5391_v37  ;;  %v5392_v42 = vunpack.i.l.bf16 %v5391_v37  ;;  %v4374_v62 = vld [vmem:[%s6756_s4 + $0x50] sm:$0xff] }
 0x15f   :  { %4596 = vmatpush1.bf16.msra.mxu0 %v4595_v45  ;;  %773 = vmatprep.mubr.f32.mxu0 %v5683_v63  ;;  %v929_v46 = vsel %vm928_vm5, %v5387_v8, %v5388_v25 }
 0x160   :  { %4598 = vmatprep.subr.bf16.mxu0 %v4597_v58  ;;  %v5396_v17 = vpop.permute.xlu1 %5395  ;;  %v930_v35 = vsel %vm928_vm5, %v5392_v42, %v5393_v54  ;;  %v4605_v16 = vpack.c.bf16 %v5393_v54, %v5388_v25 }
 0x161   :  { %v5401_v9 = vpop.permute.xlu0 %5400  ;;  %v5398_v56 = vunpack.i.h.bf16 %v5396_v17  ;;  %v5397_v41 = vunpack.i.l.bf16 %v5396_v17  ;;  %v4607_v40 = vpack.c.bf16 %v930_v35, %v929_v46 }
 0x162   :  { %4368 = vmatmul.mubr.msk.f32.vlgmr.msra.gmra.mrb[0].mxu0 %vm385_vm1, %v4366_v53  ;;  %v5403_v50 = vunpack.i.h.bf16 %v5401_v9  ;;  %v5402_v34 = vunpack.i.l.bf16 %v5401_v9  ;;  %v4375_v53 = vld [vmem:[%s6756_s4 + $0x58] sm:$0xff] }
 0x163   :  { %4600 = vmatpush1.bf16.msra.mxu0 %v4599_v24  ;;  %779 = vmatprep.mubr.f32.mxu0 %v5683_v63  ;;  %v931_v5 = vsel %vm928_vm5, %v5397_v41, %v5398_v56 }
 0x164   :  { %4602 = vmatprep.subr.bf16.mxu0 %v4601_v31  ;;  %v5406_v14 = vpop.permute.xlu1 %5405  ;;  %v932_v4 = vsel %vm928_vm5, %v5402_v34, %v5403_v50  ;;  %v4609_v6 = vpack.c.bf16 %v5403_v50, %v5398_v56 }
 0x165   :  { %v5411_v49 = vpop.permute.xlu0 %5410  ;;  %v5408_v48 = vunpack.i.h.bf16 %v5406_v14  ;;  %v5407_v15 = vunpack.i.l.bf16 %v5406_v14  ;;  %v4611_v21 = vpack.c.bf16 %v932_v4, %v931_v5 }
 0x166   :  { %4369 = vmatmul.mubr.msk.f32.gmra.mrb[2].mxu0 %vm385_vm1, %v4367_v52  ;;  %v5413_v60 = vunpack.i.h.bf16 %v5411_v49  ;;  %v5412_v12 = vunpack.i.l.bf16 %v5411_v49  ;;  %v4378_v52 = vld [vmem:[%s6756_s4 + $0x60] sm:$0xff] }
 0x167   :  { %4604 = vmatpush1.bf16.msra.mxu0 %v4603_v32  ;;  %892 = vmatprep.mubr.f32.mxu0 %v5683_v63  ;;  %v1048_v26 = vsel %vm1047_vm6, %v5407_v15, %v5408_v48 }
 0x168   :  { %4606 = vmatprep.subr.bf16.mxu0 %v4605_v16  ;;  %v5416_v43 = vpop.permute.xlu1 %5415  ;;  %v1049_v3 = vsel %vm1047_vm6, %v5412_v12, %v5413_v60  ;;  %v4613_v22 = vpack.c.bf16 %v5413_v60, %v5408_v48 }
 0x169   :  { %v5421_v2 = vpop.permute.xlu0 %5420  ;;  %v5418_v0 = vunpack.i.h.bf16 %v5416_v43  ;;  %v5417_v1 = vunpack.i.l.bf16 %v5416_v43  ;;  %v4615_v44 = vpack.c.bf16 %v1049_v3, %v1048_v26  ;;  %v4383_v26 = vld [vmem:[%s6756_s4 + $0x78] sm:$0xff] }
 0x16a   :  { %4372 = vmatmul.mubr.msk.f32.vlgmr.msra.gmra.mrb[0].mxu0 %vm385_vm1, %v4370_v19  ;;  %v5423_v61 = vunpack.i.h.bf16 %v5421_v2  ;;  %v5422_v57 = vunpack.i.l.bf16 %v5421_v2  ;;  %v4379_v19 = vld [vmem:[%s6756_s4 + $0x68] sm:$0xff] }
 0x16b   :  { %4608 = vmatpush1.bf16.msra.mxu0 %v4607_v40  ;;  %898 = vmatprep.mubr.f32.mxu0 %v5683_v63  ;;  %v1050_v51 = vsel %vm1047_vm6, %v5417_v1, %v5418_v0  ;;  %v1424_v1 = vld [vmem:[#allocation4 + $0xa8] sm:$0xff] }
 0x16c   :  { %4610 = vmatprep.subr.bf16.mxu0 %v4609_v6  ;;  %v5426_v39 = vpop.permute.xlu1 %5425  ;;  %v1051_v59 = vsel %vm1047_vm6, %v5422_v57, %v5423_v61  ;;  %v4617_v23 = vpack.c.bf16 %v5423_v61, %v5418_v0  ;;  %v4382_v6 = vld [vmem:[%s6756_s4 + $0x70] sm:$0xff]  ;;  %v1407_v61 = vld [vmem:[#allocation4 + $0x20] sm:$0xff] }
 0x16d   :  { %v5431_v11 = vpop.permute.xlu0 %5430  ;;  %v5428_v36 = vunpack.i.h.bf16 %v5426_v39  ;;  %v5427_v37 = vunpack.i.l.bf16 %v5426_v39  ;;  %v4619_v24 = vpack.c.bf16 %v1051_v59, %v1050_v51  ;;  %v1416_v39 = vld [vmem:[#allocation4 + $0x68] sm:$0xff]  ;;  %v1415_v57 = vld [vmem:[#allocation4 + $0x60] sm:$0xff] }
 0x16e   :  { %4373 = vmatmul.mubr.msk.f32.gmra.mrb[2].mxu0 %vm385_vm1, %v4371_v7  ;;  %v5433_v27 = vunpack.i.h.bf16 %v5431_v11  ;;  %v5432_v58 = vunpack.i.l.bf16 %v5431_v11  ;;  %v1408_v7 = vld [vmem:[#allocation4 + $0x28] sm:$0xff] }
 0x16f   :  { %4612 = vmatpush1.bf16.msra.mxu0 %v4611_v21  ;;  %1011 = vmatprep.mubr.f32.mxu0 %v5683_v63  ;;  %v1167_v42 = vsel %vm1166_vm7, %v5427_v37, %v5428_v36  ;;  %v4753_v11 = vpack.c.bf16 %v1416_v39, %v1408_v7  ;;  %v1440_v37 = vld [vmem:[#allocation4 + $0x128] sm:$0xff] }
 0x170   :  { %4614 = vmatprep.subr.bf16.mxu0 %v4613_v22  ;;  %v5436_v45 = vpop.permute.xlu1 %5435  ;;  %v1168_v17 = vsel %vm1166_vm7, %v5432_v58, %v5433_v27  ;;  %v4621_v54 = vpack.c.bf16 %v5433_v27, %v5428_v36  ;;  %v1423_v58 = vld [vmem:[#allocation4 + $0xa0] sm:$0xff]  ;;  %v4387_v59 = vld [vmem:[%s6756_s4 + $0x88] sm:$0xff] }
 0x171   :  { %v5441_v47 = vpop.permute.xlu0 %5440  ;;  %v5438_v31 = vunpack.i.h.bf16 %v5436_v45  ;;  %v5437_v33 = vunpack.i.l.bf16 %v5436_v45  ;;  %v4623_v14 = vpack.c.bf16 %v1168_v17, %v1167_v42  ;;  %v4755_v45 = vpack.c.bf16 %v1415_v57, %v1407_v61  ;;  %v1431_v36 = vld [vmem:[#allocation4 + $0xe0] sm:$0xff]  ;;  %v1456_v17 = vld [vmem:[#allocation4 + $0x1a8] sm:$0xff] }
 0x172   :  { %4376 = vmatmul.mubr.msk.f32.vlgmr.msra.gmra.mrb[0].mxu0 %vm385_vm1, %v4374_v62  ;;  %v5443_v9 = vunpack.i.h.bf16 %v5441_v47  ;;  %v5442_v30 = vunpack.i.l.bf16 %v5441_v47  ;;  %v1432_v62 = vld [vmem:[#allocation4 + $0xe8] sm:$0xff] }
 0x173   :  { %4616 = vmatpush1.bf16.msra.mxu0 %v4615_v44  ;;  %1017 = vmatprep.mubr.f32.mxu0 %v5683_v63  ;;  %v1169_v34 = vsel %vm1166_vm7, %v5437_v33, %v5438_v31  ;;  %v4386_v44 = vld [vmem:[%s6756_s4 + $0x80] sm:$0xff]  ;;  %v4757_v27 = vpack.c.bf16 %v1432_v62, %v1424_v1  ;;  %v1448_v47 = vld [vmem:[#allocation4 + $0x168] sm:$0xff] }
 0x174   :  { %4618 = vmatprep.subr.bf16.mxu0 %v4617_v23  ;;  %v5446_v8 = vpop.permute.xlu1 %5445  ;;  %v1170_v49 = vsel %vm1166_vm7, %v5442_v30, %v5443_v9  ;;  %v4625_v50 = vpack.c.bf16 %v5443_v9, %v5438_v31  ;;  %v4759_v23 = vpack.c.bf16 %v1431_v36, %v1423_v58  ;;  %v4761_v51 = vpack.c.bf16 %v1448_v47, %v1440_v37  ;;  %v1463_v9 = vld [vmem:[#allocation4 + $0x1e0] sm:$0xff]  ;;  %v1472_v30 = vld [vmem:[#allocation4 + $0x228] sm:$0xff] }
 0x175   :  { %v5451_v25 = vpop.permute.xlu0 %5450  ;;  %v5448_v16 = vunpack.i.h.bf16 %v5446_v8  ;;  %v5447_v46 = vunpack.i.l.bf16 %v5446_v8  ;;  %v4627_v40 = vpack.c.bf16 %v1170_v49, %v1169_v34  ;;  %v1455_v8 = vld [vmem:[#allocation4 + $0x1a0] sm:$0xff]  ;;  %v1480_v31 = vld [vmem:[#allocation4 + $0x268] sm:$0xff] }
 0x176   :  { %4377 = vmatmul.mubr.msk.f32.gmra.mrb[2].mxu0 %vm385_vm1, %v4375_v53  ;;  %v5453_v32 = vunpack.i.h.bf16 %v5451_v25  ;;  %v5452_v35 = vunpack.i.l.bf16 %v5451_v25  ;;  %v1439_v53 = vld [vmem:[#allocation4 + $0x120] sm:$0xff]  ;;  %v4767_v33 = vpack.c.bf16 %v1463_v9, %v1455_v8  ;;  %v1544_v7 = vld [vmem:[#allocation4 + $0x468] sm:$0xff] }
 0x177   :  { %4620 = vmatpush1.bf16.msra.mxu0 %v4619_v24  ;;  %1130 = vmatprep.mubr.f32.mxu0 %v5683_v63  ;;  %v1286_v12 = vsel %vm1285_vm8, %v5447_v46, %v5448_v16  ;;  %v1447_v24 = vld [vmem:[#allocation4 + $0x160] sm:$0xff]  ;;  %v1568_v62 = vld [vmem:[#allocation4 + $0x528] sm:$0xff] }
 0x178   :  { %4622 = vmatprep.subr.bf16.mxu0 %v4621_v54  ;;  %v5456_v41 = vpop.permute.xlu1 %5455  ;;  %v1287_v43 = vsel %vm1285_vm8, %v5452_v35, %v5453_v32  ;;  %v4629_v60 = vpack.c.bf16 %v5453_v32, %v5448_v16  ;;  %v1464_v54 = vld [vmem:[#allocation4 + $0x1e8] sm:$0xff]  ;;  %v4763_v42 = vpack.c.bf16 %v1447_v24, %v1439_v53  ;;  %v1479_v32 = vld [vmem:[#allocation4 + $0x260] sm:$0xff] }
 0x179   :  { %v5461_v56 = vpop.permute.xlu0 %5460  ;;  %v5458_v2 = vunpack.i.h.bf16 %v5456_v41  ;;  %v5457_v4 = vunpack.i.l.bf16 %v5456_v41  ;;  %v4631_v5 = vpack.c.bf16 %v1287_v43, %v1286_v12  ;;  %v4765_v25 = vpack.c.bf16 %v1464_v54, %v1456_v17  ;;  %v1488_v35 = vld [vmem:[#allocation4 + $0x2a8] sm:$0xff]  ;;  %v1495_v34 = vld [vmem:[#allocation4 + $0x2e0] sm:$0xff] }
 0x17a   :  { %4380 = vmatmul.mubr.msk.f32.vlgmr.msra.gmra.mrb[0].mxu0 %vm385_vm1, %v4378_v52  ;;  %v5463_v48 = vunpack.i.h.bf16 %v5461_v56  ;;  %v5462_v15 = vunpack.i.l.bf16 %v5461_v56  ;;  %v4769_v52 = vpack.c.bf16 %v1480_v31, %v1472_v30  ;;  %v1496_v16 = vld [vmem:[#allocation4 + $0x2e8] sm:$0xff]  ;;  %v1503_v43 = vld [vmem:[#allocation4 + $0x320] sm:$0xff] }
 0x17b   :  { %4624 = vmatpush1.bf16.msra.mxu0 %v4623_v14  ;;  %1136 = vmatprep.mubr.f32.mxu0 %v5683_v63  ;;  %v1288_v22 = vsel %vm1285_vm8, %v5457_v4, %v5458_v2  ;;  %v1471_v14 = vld [vmem:[#allocation4 + $0x220] sm:$0xff]  ;;  %v4773_v49 = vpack.c.bf16 %v1496_v16, %v1488_v35  ;;  %v1504_v56 = vld [vmem:[#allocation4 + $0x328] sm:$0xff] }
 0x17c   :  { %4626 = vmatprep.subr.bf16.mxu0 %v4625_v50  ;;  %v1289_v21 = vsel %vm1285_vm8, %v5462_v15, %v5463_v48  ;;  %v4633_v3 = vpack.c.bf16 %v5463_v48, %v5458_v2  ;;  %v4771_v46 = vpack.c.bf16 %v1479_v32, %v1471_v14  ;;  %v1487_v50 = vld [vmem:[#allocation4 + $0x2a0] sm:$0xff]  ;;  %v1512_v41 = vld [vmem:[#allocation4 + $0x368] sm:$0xff] }
 0x17d   :  { %v4635_v0 = vpack.c.bf16 %v1289_v21, %v1288_v22  ;;  %v1520_v12 = vld [vmem:[#allocation4 + $0x3a8] sm:$0xff]  ;;  %v1519_v4 = vld [vmem:[#allocation4 + $0x3a0] sm:$0xff] }
 0x17e   :  { %4381 = vmatmul.mubr.msk.f32.gmra.mrb[2].mxu0 %vm385_vm1, %v4379_v19  ;;  %v4775_v19 = vpack.c.bf16 %v1495_v34, %v1487_v50  ;;  %v1528_v48 = vld [vmem:[#allocation4 + $0x3e8] sm:$0xff]  ;;  %v1543_v22 = vld [vmem:[#allocation4 + $0x460] sm:$0xff] }
 0x17f   :  { %4628 = vmatpush1.bf16.msra.mxu0 %v4627_v40  ;;  %1249 = vmatprep.mubr.f32.mxu0 %v5683_v63  ;;  %v4777_v40 = vpack.c.bf16 %v1512_v41, %v1504_v56  ;;  %v4781_v2 = vpack.c.bf16 %v1528_v48, %v1520_v12  ;;  %v1559_v1 = vld [vmem:[#allocation4 + $0x4e0] sm:$0xff]  ;;  %v1584_v37 = vld [vmem:[#allocation4 + $0x5a8] sm:$0xff]  ;;  %v1406_v41 = vld [vmem:[#allocation4 + $0x18] sm:$0xff] }
 0x180   :  { %4630 = vmatprep.subr.bf16.mxu0 %v4629_v60  ;;  %v1511_v60 = vld [vmem:[#allocation4 + $0x360] sm:$0xff]  ;;  %v1592_v47 = vld [vmem:[#allocation4 + $0x5e8] sm:$0xff] }
 0x181   :  { %v4779_v15 = vpack.c.bf16 %v1511_v60, %v1503_v43  ;;  %v1567_v58 = vld [vmem:[#allocation4 + $0x520] sm:$0xff]  ;;  %v1600_v24 = vld [vmem:[#allocation4 + $0x628] sm:$0xff] }
 0x182   :  { %4384 = vmatmul.mubr.msk.f32.vlgmr.msra.gmra.mrb[0].mxu0 %vm385_vm1, %v4382_v6  ;;  %v1527_v6 = vld [vmem:[#allocation4 + $0x3e0] sm:$0xff]  ;;  %v1608_v17 = vld [vmem:[#allocation4 + $0x668] sm:$0xff] }
 0x183   :  { %4632 = vmatpush1.bf16.msra.mxu0 %v4631_v5  ;;  %1255 = vmatprep.mubr.f32.mxu0 %v5683_v63  ;;  %v1536_v5 = vld [vmem:[#allocation4 + $0x428] sm:$0xff]  ;;  %v4783_v39 = vpack.c.bf16 %v1527_v6, %v1519_v4  ;;  %v1575_v36 = vld [vmem:[#allocation4 + $0x560] sm:$0xff]  ;;  %v1422_v6 = vld [vmem:[#allocation4 + $0x98] sm:$0xff] }
 0x184   :  { %4634 = vmatprep.subr.bf16.mxu0 %v4633_v3  ;;  %v4785_v21 = vpack.c.bf16 %v1544_v7, %v1536_v5  ;;  %v1535_v3 = vld [vmem:[#allocation4 + $0x420] sm:$0xff]  ;;  %v1612_v30 = vld [vmem:[#allocation4 + $0x688] sm:$0xff]  ;;  %v1430_v5 = vld [vmem:[#allocation4 + $0xd8] sm:$0xff] }
 0x185   :  { %v4787_v61 = vpack.c.bf16 %v1543_v22, %v1535_v3  ;;  %v1591_v53 = vld [vmem:[#allocation4 + $0x5e0] sm:$0xff]  ;;  %v1620_v31 = vld [vmem:[#allocation4 + $0x6c8] sm:$0x3f] }
 0x186   :  { %4385 = vmatmul.mubr.msk.f32.gmra.mrb[2].mxu0 %vm385_vm1, %v4383_v26  ;;  %v1552_v26 = vld [vmem:[#allocation4 + $0x4a8] sm:$0xff]  ;;  %v1607_v8 = vld [vmem:[#allocation4 + $0x660] sm:$0xff] }
 0x187   :  { %4636 = vmatpush1.bf16.msra.mxu0 %v4635_v0  ;;  %1368 = vmatprep.mubr.f32.mxu0 %v5683_v63  ;;  %v1551_v0 = vld [vmem:[#allocation4 + $0x4a0] sm:$0xff]  ;;  %v1616_v35 = vld [vmem:[#allocation4 + $0x6a8] sm:$0xff] }
 0x188   :  { %4754 = vmatprep.subr.bf16.mxu0 %v4753_v11  ;;  %v1560_v11 = vld [vmem:[#allocation4 + $0x4e8] sm:$0xff]  ;;  %v1619_v32 = vld [vmem:[#allocation4 + $0x6c0] sm:$0x3f] }
 0x189   :  { %v4789_v57 = vpack.c.bf16 %v1560_v11, %v1552_v26  ;;  %v1615_v50 = vld [vmem:[#allocation4 + $0x6a0] sm:$0xff]  ;;  %v6259_v43 = vpop.permute.xlu1 %1387 }
 0x18a   :  { %4388 = vmatmul.mubr.msk.f32.vlgmr.msra.gmra.mrb[0].mxu0 %vm385_vm1, %v4386_v44  ;;  %v1576_v44 = vld [vmem:[#allocation4 + $0x568] sm:$0xff]  ;;  %v1623_v34 = vld [vmem:[#allocation4 + $0x6e0] sm:$0x3f]  ;;  %v6263_v7 = vpop.permute.xlu0 %1392 }
 0x18b   :  { %1374 = vmatprep.mubr.f32.mxu0 %v5683_v63  ;;  %4756 = vmatpush1.bf16.msra.mxu0 %v4755_v45  ;;  %v4791_v45 = vpack.c.bf16 %v1559_v1, %v1551_v0  ;;  %v4808_v56 = vpack.c.bf16 %v1623_v34, %v1615_v50  ;;  %v1429_v0 = vld [vmem:[#allocation4 + $0xd0] sm:$0xff]  ;;  %v69_v1 = vld [vmem:[%s6759_s7] sm:$0xff]  ;;  %v1502_v50 = vld [vmem:[#allocation4 + $0x318] sm:$0xff] }
 0x18c   :  { %4758 = vmatprep.subr.bf16.mxu0 %v4757_v27  ;;  %v4793_v27 = vpack.c.bf16 %v1576_v44, %v1568_v62  ;;  %v1438_v44 = vld [vmem:[#allocation4 + $0x118] sm:$0xff] }
 0x18d   :  { %v1510_v34 = vld [vmem:[#allocation4 + $0x358] sm:$0xff] }
 0x18e   :  { %4389 = vmatmul.mubr.msk.f32.gmra.mrb[2].mxu0 %vm385_vm1, %v4387_v59  ;;  %v4795_v59 = vpack.c.bf16 %v1575_v36, %v1567_v58 }
 0x18f   :  { %4760 = vmatpush1.bf16.msra.mxu0 %v4759_v23  ;;  %v4797_v23 = vpack.c.bf16 %v1592_v47, %v1584_v37  ;;  %v1437_v47 = vld [vmem:[#allocation4 + $0x110] sm:$0xff] }
 0x190   :  { %4762 = vmatprep.subr.bf16.mxu0 %v4761_v51  ;;  %v1583_v51 = vld [vmem:[#allocation4 + $0x5a0] sm:$0xff] }
 0x191   :  { %v4799_v54 = vpack.c.bf16 %v1591_v53, %v1583_v51  ;;  %v1462_v51 = vld [vmem:[#allocation4 + $0x1d8] sm:$0xff] }
 0x193   :  { %4764 = vmatpush1.bf16.msra.mxu0 %v4763_v42  ;;  %v4801_v42 = vpack.c.bf16 %v1608_v17, %v1600_v24  ;;  %v1982_v24 = vld [vmem:[%s6753_s1] sm:$0x1] }
 0x194   :  { %4766 = vmatprep.subr.bf16.mxu0 %v4765_v25  ;;  %v1599_v25 = vld [vmem:[#allocation4 + $0x620] sm:$0xff] }
 0x195   :  { %v4803_v9 = vpack.c.bf16 %v1607_v8, %v1599_v25  ;;  %v1470_v25 = vld [vmem:[#allocation4 + $0x218] sm:$0xff] }
 0x196   :  { %v1478_v8 = vld [vmem:[#allocation4 + $0x258] sm:$0xff] }
 0x197   :  { %4768 = vmatpush1.bf16.msra.mxu0 %v4767_v33  ;;  %v1611_v33 = vld [vmem:[#allocation4 + $0x680] sm:$0xff] }
 0x198   :  { %4770 = vmatprep.subr.bf16.mxu0 %v4769_v52  ;;  %v4689_v52 = vpack.c.bf16 %v1620_v31, %v1612_v30  ;;  %v4692_v16 = vpack.c.bf16 %v1619_v32, %v1611_v33  ;;  %v4711_v30 = vpack.c.bf16 %v1478_v8, %v1470_v25  ;;  %v1469_v31 = vld [vmem:[#allocation4 + $0x210] sm:$0xff]  ;;  %v1494_v32 = vld [vmem:[#allocation4 + $0x2d8] sm:$0xff] }
 0x199   :  { %v1477_v33 = vld [vmem:[#allocation4 + $0x250] sm:$0xff]  ;;  %v1598_v25 = vld [vmem:[#allocation4 + $0x618] sm:$0xff] }
 0x19a   :  { %4691 = vmatprep.subr.msk.bf16.mxu1 %vm6246_vm11, %v4689_v52  ;;  %v1486_v52 = vld [vmem:[#allocation4 + $0x298] sm:$0xff] }
 0x19b   :  { %4772 = vmatpush1.bf16.msra.mxu0 %v4771_v46  ;;  %v1624_v46 = vld [vmem:[#allocation4 + $0x6e8] sm:$0x3f]  ;;  %4694 = vmatpush1.bf16.msk.msra.mxu1 %vm6246_vm11, %v4692_v16  ;;  %v4715_v16 = vpack.c.bf16 %v1494_v32, %v1486_v52  ;;  %v1606_v8 = vld [vmem:[#allocation4 + $0x658] sm:$0xff] }
 0x19c   :  { %4774 = vmatprep.subr.bf16.mxu0 %v4773_v49  ;;  %v4805_v49 = vpack.c.bf16 %v1624_v46, %v1616_v35  ;;  %v4713_v35 = vpack.c.bf16 %v1477_v33, %v1469_v31  ;;  %v1485_v46 = vld [vmem:[#allocation4 + $0x290] sm:$0xff]  ;;  %v1614_v52 = vld [vmem:[#allocation4 + $0x698] sm:$0xff] }
 0x19d   :  { %v1597_v31 = vld [vmem:[#allocation4 + $0x610] sm:$0xff]  ;;  %v1622_v32 = vld [vmem:[#allocation4 + $0x6d8] sm:$0x3f] }
 0x19e   :  { %v1605_v33 = vld [vmem:[#allocation4 + $0x650] sm:$0xff] }
 0x19f   :  { %4776 = vmatpush1.bf16.msra.mxu0 %v4775_v19  ;;  %v1414_v19 = vld [vmem:[#allocation4 + $0x58] sm:$0xff] }
 0x1a0   :  { %4778 = vmatprep.subr.bf16.mxu0 %v4777_v40  ;;  %v4695_v40 = vpack.c.bf16 %v1414_v19, %v1406_v41  ;;  %v4719_v41 = vpack.c.bf16 %v1510_v34, %v1502_v50  ;;  %v1501_v19 = vld [vmem:[#allocation4 + $0x310] sm:$0xff]  ;;  %v1410_v50 = vld [vmem:[#allocation4 + $0x38] sm:$0xff] }
 0x1a1   :  { %v1418_v34 = vld [vmem:[#allocation4 + $0x78] sm:$0xff] }
 0x1a2   :  { %4696 = vmatprep.subr.bf16.mxu1 %v4695_v40  ;;  %v1509_v40 = vld [vmem:[#allocation4 + $0x350] sm:$0xff] }
 0x1a3   :  { %4780 = vmatpush1.bf16.msra.mxu0 %v4779_v15  ;;  %v1405_v15 = vld [vmem:[#allocation4 + $0x10] sm:$0xff] }
 0x1a4   :  { %4782 = vmatprep.subr.bf16.mxu0 %v4781_v2  ;;  %v1413_v2 = vld [vmem:[#allocation4 + $0x50] sm:$0xff] }
 0x1a5   :  { %v4697_v3 = vpack.c.bf16 %v1413_v2, %v1405_v15  ;;  %v1517_v2 = vld [vmem:[#allocation4 + $0x390] sm:$0xff] }
 0x1a7   :  { %4784 = vmatpush1.bf16.msra.mxu0 %v4783_v39 }
 0x1a8   :  { %4786 = vmatprep.subr.bf16.mxu0 %v4785_v21 }
 0x1ab   :  { %4788 = vmatpush1.bf16.msra.mxu0 %v4787_v61  ;;  %v4699_v61 = vpack.c.bf16 %v1430_v5, %v1422_v6  ;;  %v1534_v6 = vld [vmem:[#allocation4 + $0x418] sm:$0xff] }
 0x1ac   :  { %4790 = vmatprep.subr.bf16.mxu0 %v4789_v57  ;;  %v1421_v57 = vld [vmem:[#allocation4 + $0x90] sm:$0xff]  ;;  %v1542_v5 = vld [vmem:[#allocation4 + $0x458] sm:$0xff] }
 0x1ad   :  { %v4701_v58 = vpack.c.bf16 %v1429_v0, %v1421_v57  ;;  %v1558_v57 = vld [vmem:[#allocation4 + $0x4d8] sm:$0xff] }
 0x1af   :  { %4792 = vmatpush1.bf16.msra.mxu0 %v4791_v45  ;;  %v1446_v45 = vld [vmem:[#allocation4 + $0x158] sm:$0xff] }
 0x1b0   :  { %4794 = vmatprep.subr.bf16.mxu0 %v4793_v27  ;;  %v4703_v37 = vpack.c.bf16 %v1446_v45, %v1438_v44  ;;  %v1557_v44 = vld [vmem:[#allocation4 + $0x4d0] sm:$0xff]  ;;  %v1566_v45 = vld [vmem:[#allocation4 + $0x518] sm:$0xff] }
 0x1b3   :  { %4796 = vmatpush1.bf16.msra.mxu0 %v4795_v59  ;;  %v1445_v59 = vld [vmem:[#allocation4 + $0x150] sm:$0xff] }
 0x1b4   :  { %4798 = vmatprep.subr.bf16.mxu0 %v4797_v23  ;;  %v1454_v23 = vld [vmem:[#allocation4 + $0x198] sm:$0xff]  ;;  %v4705_v53 = vpack.c.bf16 %v1445_v59, %v1437_v47  ;;  %v1565_v59 = vld [vmem:[#allocation4 + $0x510] sm:$0xff] }
 0x1b5   :  { %v4707_v17 = vpack.c.bf16 %v1462_v51, %v1454_v23  ;;  %v1573_v23 = vld [vmem:[#allocation4 + $0x550] sm:$0xff]  ;;  %v1582_v51 = vld [vmem:[#allocation4 + $0x598] sm:$0xff] }
 0x1b7   :  { %4800 = vmatpush1.bf16.msra.mxu0 %v4799_v54  ;;  %v1453_v54 = vld [vmem:[#allocation4 + $0x190] sm:$0xff] }
 0x1b8   :  { %4802 = vmatprep.subr.bf16.mxu0 %v4801_v42  ;;  %v1461_v42 = vld [vmem:[#allocation4 + $0x1d0] sm:$0xff] }
 0x1bb   :  { %4804 = vmatpush1.bf16.msra.mxu0 %v4803_v9  ;;  %v4709_v9 = vpack.c.bf16 %v1461_v42, %v1453_v54  ;;  %v1581_v54 = vld [vmem:[#allocation4 + $0x590] sm:$0xff] }
 0x1bc   :  { %4807 = vmatprep.subr.msk.bf16.mxu0 %vm6246_vm11, %v4805_v49  ;;  %v1493_v49 = vld [vmem:[#allocation4 + $0x2d0] sm:$0xff] }
 0x1bd   :  { %v1589_v42 = vld [vmem:[#allocation4 + $0x5d0] sm:$0xff] }
 0x1bf   :  { %4810 = vmatpush1.bf16.msk.msra.mxu0 %vm6246_vm11, %v4808_v56  ;;  %v4717_v56 = vpack.c.bf16 %v1493_v49, %v1485_v46  ;;  %v1613_v46 = vld [vmem:[#allocation4 + $0x690] sm:$0xff] }
 0x1c0   :  { %4495 = vmatprep.subr.mxu0 %v5683_v63  ;;  %v1621_v49 = vld [vmem:[#allocation4 + $0x6d0] sm:$0x3f] }
 0x25d   :  { %v1370_v60 = vpop.f32.mrb[0].mxu0 }
 0x25e   :  { %v1395_v12 = vadd.f32 %v6259_v43, %v1370_v60  ;;  %v1372_v48 = vpop.f32.mrb[1].mxu0  ;;  %v1518_v60 = vld [vmem:[#allocation4 + $0x398] sm:$0xff] }
 0x25f   :  { %v1396_v4 = vadd.f32 %v6259_v43, %v1372_v48  ;;  %v4721_v48 = vpack.c.bf16 %v1509_v40, %v1501_v19  ;;  %v1409_v19 = vld [vmem:[#allocation4 + $0x30] sm:$0xff] }
 0x260   :  { %v6267_v22 = vmax.f32 %v1395_v12, 0.0  ;;  %v1526_v12 = vld [vmem:[#allocation4 + $0x3d8] sm:$0xff]  ;;  %v1417_v40 = vld [vmem:[#allocation4 + $0x70] sm:$0xff] }
 0x261   :  { %v6265_v39 = vmax.f32 %v1396_v4, 0.0  ;;  %v1376_v21 = vpop.f32.mrb[2].mxu0  ;;  %v4723_v15 = vpack.c.bf16 %v1526_v12, %v1518_v60  ;;  %v1525_v4 = vld [vmem:[#allocation4 + $0x3d0] sm:$0xff]  ;;  %v1426_v60 = vld [vmem:[#allocation4 + $0xb8] sm:$0xff] }
 0x262   :  { %v1397_v26 = vadd.f32 %v6263_v7, %v1376_v21  ;;  %v1378_v11 = vpop.f32.mrb[3].mxu0  ;;  %v4725_v21 = vpack.c.bf16 %v1525_v4, %v1517_v2  ;;  %v1434_v12 = vld [vmem:[#allocation4 + $0xf8] sm:$0xff]  ;;  %v1425_v2 = vld [vmem:[#allocation4 + $0xb0] sm:$0xff] }
 0x263   :  { %v1398_v62 = vadd.f32 %v6263_v7, %v1378_v11  ;;  %4392 = vmatprep.mubr.msk.f32.mxu1 %vm1285_vm8, %v6265_v39  ;;  %4400 = vmatprep.mubr.msk.f32.mxu0 %vm1285_vm8, %v6265_v39  ;;  %v1541_v11 = vld [vmem:[#allocation4 + $0x450] sm:$0xff] }
 0x264   :  { %1723 = vmatmul.mubr.f32.vlgmr.msra.gmra.mrb[0].mxu1 %v6267_v22  ;;  %1877 = vmatmul.mubr.f32.vlgmr.msra.gmra.mrb[4].mxu0 %v6267_v22  ;;  %v6282_v36 = vmax.f32 %v1397_v26, 0.0  ;;  %v1533_v26 = vld [vmem:[#allocation4 + $0x410] sm:$0xff] }
 0x265   :  { %v6280_v27 = vmax.f32 %v1398_v62, 0.0  ;;  %4698 = vmatpush1.bf16.msra.mxu1 %v4697_v3  ;;  %4496 = vmatpush3.msra.mxu0 %v69_v1  ;;  %v4727_v3 = vpack.c.bf16 %v1542_v5, %v1534_v6  ;;  %v4729_v0 = vpack.c.bf16 %v1541_v11, %v1533_v26  ;;  %v1549_v62 = vld [vmem:[#allocation4 + $0x490] sm:$0xff]  ;;  %v1442_v6 = vld [vmem:[#allocation4 + $0x138] sm:$0xff] }
 0x266   :  { %4700 = vmatprep.subr.bf16.mxu1 %v4699_v61  ;;  %v1550_v61 = vld [vmem:[#allocation4 + $0x498] sm:$0xff]  ;;  %v1433_v4 = vld [vmem:[#allocation4 + $0xf0] sm:$0xff] }
 0x267   :  { %4393 = vmatprep.mubr.msk.f32.mxu1 %vm1285_vm8, %v6280_v27  ;;  %4401 = vmatprep.mubr.msk.f32.mxu0 %vm1285_vm8, %v6280_v27  ;;  %v4731_v1 = vpack.c.bf16 %v1558_v57, %v1550_v61  ;;  %v1450_v5 = vld [vmem:[#allocation4 + $0x178] sm:$0xff]  ;;  %v1441_v26 = vld [vmem:[#allocation4 + $0x130] sm:$0xff] }
 0x268   :  { %1729 = vmatmul.mubr.f32.gmra.mrb[2].mxu1 %v6282_v36  ;;  %1883 = vmatmul.mubr.f32.gmra.mrb[6].mxu0 %v6282_v36  ;;  %v1449_v11 = vld [vmem:[#allocation4 + $0x170] sm:$0xff]  ;;  %v1458_v61 = vld [vmem:[#allocation4 + $0x1b8] sm:$0xff] }
 0x269   :  { %4702 = vmatpush1.bf16.msra.mxu1 %v4701_v58  ;;  %4396 = vmatprep.mubr.msk.f32.mxu1 %vm1285_vm8, %v6265_v39  ;;  %v1574_v58 = vld [vmem:[#allocation4 + $0x558] sm:$0xff] }
 0x26a   :  { %4704 = vmatprep.subr.bf16.mxu1 %v4703_v37  ;;  %4497 = vmatprep.mubr.msk.f32.mxu0 %vm5692_vm13, %v5683_v63  ;;  %v4733_v37 = vpack.c.bf16 %v1557_v44, %v1549_v62  ;;  %v4735_v47 = vpack.c.bf16 %v1574_v58, %v1566_v45  ;;  %v1466_v57 = vld [vmem:[#allocation4 + $0x1f8] sm:$0xff]  ;;  %v1457_v62 = vld [vmem:[#allocation4 + $0x1b0] sm:$0xff] }
 0x26b   :  { %v1465_v44 = vld [vmem:[#allocation4 + $0x1f0] sm:$0xff]  ;;  %v1474_v45 = vld [vmem:[#allocation4 + $0x238] sm:$0xff] }
 0x26c   :  { %4498 = vmatmul.mubr.msk.f32.vlgmr.msra.gmra.mrb[8].mxu0 %vm1983_vm12, %v1982_v24  ;;  %v4737_v24 = vpack.c.bf16 %v1573_v23, %v1565_v59  ;;  %v1482_v58 = vld [vmem:[#allocation4 + $0x278] sm:$0xff]  ;;  %v1473_v59 = vld [vmem:[#allocation4 + $0x230] sm:$0xff] }
 0x26d   :  { %4706 = vmatpush1.bf16.msra.mxu1 %v4705_v53  ;;  %4516 = vmatprep.mubr.msk.f32.mxu0 %vm5692_vm13, %v5683_v63  ;;  %v1590_v53 = vld [vmem:[#allocation4 + $0x5d8] sm:$0xff]  ;;  %v1481_v23 = vld [vmem:[#allocation4 + $0x270] sm:$0xff] }
 0x26e   :  { %4708 = vmatprep.subr.bf16.mxu1 %v4707_v17  ;;  %v4739_v17 = vpack.c.bf16 %v1590_v53, %v1582_v51  ;;  %v1490_v51 = vld [vmem:[#allocation4 + $0x2b8] sm:$0xff] }
 0x26f   :  { %v1498_v53 = vld [vmem:[#allocation4 + $0x2f8] sm:$0xff] }
 0x271   :  { %4710 = vmatpush1.bf16.msra.mxu1 %v4709_v9  ;;  %v4741_v9 = vpack.c.bf16 %v1589_v42, %v1581_v54  ;;  %v1497_v54 = vld [vmem:[#allocation4 + $0x2f0] sm:$0xff]  ;;  %v1506_v42 = vld [vmem:[#allocation4 + $0x338] sm:$0xff] }
 0x272   :  { %4712 = vmatprep.subr.bf16.mxu1 %v4711_v30  ;;  %v4743_v30 = vpack.c.bf16 %v1606_v8, %v1598_v25  ;;  %v1514_v25 = vld [vmem:[#allocation4 + $0x378] sm:$0xff] }
 0x275   :  { %4714 = vmatpush1.bf16.msra.mxu1 %v4713_v35  ;;  %v4745_v35 = vpack.c.bf16 %v1605_v33, %v1597_v31  ;;  %v1513_v31 = vld [vmem:[#allocation4 + $0x370] sm:$0xff]  ;;  %v1522_v33 = vld [vmem:[#allocation4 + $0x3b8] sm:$0xff] }
 0x276   :  { %4716 = vmatprep.subr.bf16.mxu1 %v4715_v16  ;;  %v4747_v16 = vpack.c.bf16 %v1622_v32, %v1614_v52  ;;  %v1530_v52 = vld [vmem:[#allocation4 + $0x3f8] sm:$0xff] }
 0x279   :  { %4718 = vmatpush1.bf16.msra.mxu1 %v4717_v56  ;;  %v4750_v56 = vpack.c.bf16 %v1621_v49, %v1613_v46  ;;  %v1529_v46 = vld [vmem:[#allocation4 + $0x3f0] sm:$0xff]  ;;  %v1538_v49 = vld [vmem:[#allocation4 + $0x438] sm:$0xff] }
 0x27a   :  { %4720 = vmatprep.subr.bf16.mxu1 %v4719_v41  ;;  %v4811_v41 = vpack.c.bf16 %v1418_v34, %v1410_v50  ;;  %v1546_v50 = vld [vmem:[#allocation4 + $0x478] sm:$0xff] }
 0x27d   :  { %4722 = vmatpush1.bf16.msra.mxu1 %v4721_v48  ;;  %v4813_v48 = vpack.c.bf16 %v1417_v40, %v1409_v19  ;;  %v1545_v19 = vld [vmem:[#allocation4 + $0x470] sm:$0xff]  ;;  %v1554_v40 = vld [vmem:[#allocation4 + $0x4b8] sm:$0xff] }
 0x27e   :  { %4724 = vmatprep.subr.bf16.mxu1 %v4723_v15  ;;  %v4815_v15 = vpack.c.bf16 %v1434_v12, %v1426_v60  ;;  %v1562_v60 = vld [vmem:[#allocation4 + $0x4f8] sm:$0xff] }
 0x281   :  { %4726 = vmatpush1.bf16.msra.mxu1 %v4725_v21  ;;  %v4817_v21 = vpack.c.bf16 %v1433_v4, %v1425_v2  ;;  %v1561_v2 = vld [vmem:[#allocation4 + $0x4f0] sm:$0xff]  ;;  %v1570_v4 = vld [vmem:[#allocation4 + $0x538] sm:$0xff] }
 0x282   :  { %4728 = vmatprep.subr.bf16.mxu1 %v4727_v3  ;;  %v4819_v3 = vpack.c.bf16 %v1450_v5, %v1442_v6  ;;  %v1578_v6 = vld [vmem:[#allocation4 + $0x578] sm:$0xff] }
 0x285   :  { %4730 = vmatpush1.bf16.msra.mxu1 %v4729_v0  ;;  %v4821_v0 = vpack.c.bf16 %v1449_v11, %v1441_v26  ;;  %v1577_v26 = vld [vmem:[#allocation4 + $0x570] sm:$0xff]  ;;  %v1586_v11 = vld [vmem:[#allocation4 + $0x5b8] sm:$0xff] }
 0x286   :  { %4732 = vmatprep.subr.bf16.mxu1 %v4731_v1  ;;  %v4823_v1 = vpack.c.bf16 %v1466_v57, %v1458_v61  ;;  %v1594_v61 = vld [vmem:[#allocation4 + $0x5f8] sm:$0xff] }
 0x289   :  { %4734 = vmatpush1.bf16.msra.mxu1 %v4733_v37  ;;  %v4825_v37 = vpack.c.bf16 %v1465_v44, %v1457_v62  ;;  %v1593_v62 = vld [vmem:[#allocation4 + $0x5f0] sm:$0xff]  ;;  %v1602_v44 = vld [vmem:[#allocation4 + $0x638] sm:$0xff] }
 0x28a   :  { %4736 = vmatprep.subr.bf16.mxu1 %v4735_v47  ;;  %v4827_v47 = vpack.c.bf16 %v1482_v58, %v1474_v45  ;;  %v1610_v45 = vld [vmem:[#allocation4 + $0x678] sm:$0xff] }
 0x28d   :  { %4738 = vmatpush1.bf16.msra.mxu1 %v4737_v24  ;;  %v4829_v24 = vpack.c.bf16 %v1481_v23, %v1473_v59  ;;  %v1609_v59 = vld [vmem:[#allocation4 + $0x670] sm:$0xff]  ;;  %v1618_v23 = vld [vmem:[#allocation4 + $0x6b8] sm:$0xff] }
 0x28e   :  { %4740 = vmatprep.subr.bf16.mxu1 %v4739_v17  ;;  %v4831_v17 = vpack.c.bf16 %v1498_v53, %v1490_v51  ;;  %v1626_v51 = vld [vmem:[#allocation4 + $0x6f8] sm:$0x3f] }
 0x291   :  { %4742 = vmatpush1.bf16.msra.mxu1 %v4741_v9  ;;  %v4835_v9 = vpack.c.bf16 %v1514_v25, %v1506_v42 }
 0x292   :  { %4744 = vmatprep.subr.bf16.mxu1 %v4743_v30  ;;  %v1505_v30 = vld [vmem:[#allocation4 + $0x330] sm:$0xff] }
 0x293   :  { %v4837_v32 = vpack.c.bf16 %v1513_v31, %v1505_v30 }
 0x295   :  { %4746 = vmatpush1.bf16.msra.mxu1 %v4745_v35  ;;  %v4839_v35 = vpack.c.bf16 %v1530_v52, %v1522_v33 }
 0x296   :  { %4749 = vmatprep.subr.msk.bf16.mxu1 %vm6246_vm11, %v4747_v16  ;;  %v1521_v16 = vld [vmem:[#allocation4 + $0x3b0] sm:$0xff] }
 0x297   :  { %v4841_v34 = vpack.c.bf16 %v1529_v46, %v1521_v16 }
 0x299   :  { %4752 = vmatpush1.bf16.msk.msra.mxu1 %vm6246_vm11, %v4750_v56  ;;  %v4843_v56 = vpack.c.bf16 %v1546_v50, %v1538_v49 }
 0x29a   :  { %4812 = vmatprep.subr.bf16.mxu1 %v4811_v41  ;;  %v1537_v41 = vld [vmem:[#allocation4 + $0x430] sm:$0xff] }
 0x29b   :  { %v4845_v12 = vpack.c.bf16 %v1545_v19, %v1537_v41  ;;  %v5693_v41 = vmov 0.0|0.0   ;;  %v72_v19 = vld [vmem:[%s6761_s9 + $0x8] sm:$0xff] }
 0x29c   :  { %1800 = vmatmul.mubr.f32.vlgmr.msra.gmra.mrb[4].mxu1 %v6267_v22  ;;  %4869 = vmatprep.subr.bf16.mxu0 %v5693_v41 }
 0x29d   :  { %4397 = vmatprep.mubr.msk.f32.mxu1 %vm1285_vm8, %v6280_v27  ;;  %4814 = vmatpush1.bf16.msra.mxu1 %v4813_v48  ;;  %v4847_v48 = vpack.c.bf16 %v1562_v60, %v1554_v40  ;;  %v73_v60 = vld [vmem:[%s6761_s9 + $0x10] sm:$0xff] }
 0x29e   :  { %4816 = vmatprep.subr.bf16.mxu1 %v4815_v15  ;;  %v1553_v15 = vld [vmem:[#allocation4 + $0x4b0] sm:$0xff] }
 0x29f   :  { %v4849_v5 = vpack.c.bf16 %v1561_v2, %v1553_v15 }
 0x2a0   :  { %1806 = vmatmul.mubr.f32.gmra.mrb[6].mxu1 %v6282_v36 }
 0x2a1   :  { %4818 = vmatpush1.bf16.msra.mxu1 %v4817_v21  ;;  %4404 = vmatprep.mubr.msk.f32.mxu1 %vm1285_vm8, %v6265_v39  ;;  %v1489_v39 = vld [vmem:[#allocation4 + $0x2b0] sm:$0xff]  ;;  %v4851_v21 = vpack.c.bf16 %v1578_v6, %v1570_v4  ;;  %v75_v6 = vld [vmem:[%s6761_s9 + $0x20] sm:$0xff] }
 0x2a2   :  { %4820 = vmatprep.subr.bf16.mxu1 %v4819_v3  ;;  %v4833_v8 = vpack.c.bf16 %v1497_v54, %v1489_v39  ;;  %v1569_v3 = vld [vmem:[#allocation4 + $0x530] sm:$0xff] }
 0x2a3   :  { %v4853_v57 = vpack.c.bf16 %v1577_v26, %v1569_v3  ;;  %v1625_v39 = vld [vmem:[#allocation4 + $0x6f0] sm:$0x3f] }
 0x2a5   :  { %4822 = vmatpush1.bf16.msra.mxu1 %v4821_v0  ;;  %v4855_v0 = vpack.c.bf16 %v1594_v61, %v1586_v11  ;;  %v77_v61 = vld [vmem:[%s6761_s9 + $0x30] sm:$0xff] }
 0x2a6   :  { %4824 = vmatprep.subr.bf16.mxu1 %v4823_v1  ;;  %v1585_v1 = vld [vmem:[#allocation4 + $0x5b0] sm:$0xff] }
 0x2a7   :  { %v4857_v58 = vpack.c.bf16 %v1593_v62, %v1585_v1 }
 0x2a9   :  { %4826 = vmatpush1.bf16.msra.mxu1 %v4825_v37  ;;  %v4859_v37 = vpack.c.bf16 %v1610_v45, %v1602_v44  ;;  %v70_v44 = vld [vmem:[%s6760_s8] sm:$0x1] }
 0x2aa   :  { %4828 = vmatprep.subr.bf16.mxu1 %v4827_v47  ;;  %v1601_v47 = vld [vmem:[#allocation4 + $0x630] sm:$0xff] }
 0x2ab   :  { %v4861_v53 = vpack.c.bf16 %v1609_v59, %v1601_v47 }
 0x2ad   :  { %4830 = vmatpush1.bf16.msra.mxu1 %v4829_v24  ;;  %v4863_v24 = vpack.c.bf16 %v1626_v51, %v1618_v23 }
 0x2ae   :  { %4832 = vmatprep.subr.bf16.mxu1 %v4831_v17  ;;  %v1617_v17 = vld [vmem:[#allocation4 + $0x6b0] sm:$0xff] }
 0x2af   :  { %v4866_v54 = vpack.c.bf16 %v1625_v39, %v1617_v17 }
 0x2b1   :  { %4834 = vmatpush1.bf16.msra.mxu1 %v4833_v8 }
 0x2b2   :  { %4836 = vmatprep.subr.bf16.mxu1 %v4835_v9 }
 0x2b5   :  { %4838 = vmatpush1.bf16.msra.mxu1 %v4837_v32 }
 0x2b6   :  { %4840 = vmatprep.subr.bf16.mxu1 %v4839_v35 }
 0x2b9   :  { %4842 = vmatpush1.bf16.msra.mxu1 %v4841_v34  ;;  %v71_v34 = vld [vmem:[%s6761_s9] sm:$0xff] }
 0x2ba   :  { %4844 = vmatprep.subr.bf16.mxu1 %v4843_v56  ;;  %v6331_v40 = vpack.c.bf16 %v72_v19, %v71_v34  ;;  %v81_v34 = vld [vmem:[%s6763_s11 + $0x8] sm:$0xff] }
 0x2bc   :  { %4871 = vmatpush3.bf16.msra.mxu0 %v6331_v40 }
 0x2bd   :  { %4846 = vmatpush1.bf16.msra.mxu1 %v4845_v12  ;;  %v74_v12 = vld [vmem:[%s6761_s9 + $0x18] sm:$0xff]  ;;  %4872 = vmatprep.subr.bf16.mxu0 %v5693_v41 }
 0x2be   :  { %4848 = vmatprep.subr.bf16.mxu1 %v4847_v48  ;;  %v6340_v15 = vpack.c.bf16 %v74_v12, %v73_v60 }
 0x2c0   :  { %4874 = vmatpush3.bf16.msra.mxu0 %v6340_v15 }
 0x2c1   :  { %4850 = vmatpush1.bf16.msra.mxu1 %v4849_v5  ;;  %4875 = vmatprep.subr.bf16.mxu0 %v5693_v41  ;;  %v76_v5 = vld [vmem:[%s6761_s9 + $0x28] sm:$0xff] }
 0x2c2   :  { %4852 = vmatprep.subr.bf16.mxu1 %v4851_v21  ;;  %v6353_v3 = vpack.c.bf16 %v76_v5, %v75_v6 }
 0x2c4   :  { %4877 = vmatpush3.bf16.msra.mxu0 %v6353_v3 }
 0x2c5   :  { %4854 = vmatpush1.bf16.msra.mxu1 %v4853_v57  ;;  %4878 = vmatprep.subr.bf16.mxu0 %v5693_v41  ;;  %v78_v57 = vld [vmem:[%s6761_s9 + $0x38] sm:$0xff] }
 0x2c6   :  { %4856 = vmatprep.subr.bf16.mxu1 %v4855_v0  ;;  %v6363_v0 = vpack.c.bf16 %v78_v57, %v77_v61 }
 0x2c8   :  { %4880 = vmatpush3.bf16.msra.mxu0 %v6363_v0 }
 0x2c9   :  { %4858 = vmatpush1.bf16.msra.mxu1 %v4857_v58  ;;  %4881 = vmatprep.subr.bf16.mxu0 %v5693_v41 }
 0x2ca   :  { %4860 = vmatprep.subr.bf16.mxu1 %v4859_v37 }
 0x2cd   :  { %4862 = vmatpush1.bf16.msra.mxu1 %v4861_v53 }
 0x2ce   :  { %4865 = vmatprep.subr.msk.bf16.mxu1 %vm6246_vm11, %v4863_v24 }
 0x2d1   :  { %4868 = vmatpush1.bf16.msk.msra.mxu1 %vm6246_vm11, %v4866_v54 }
 0x2d4   :  { %1954 = vmatmul.mubr.f32.vlgmr.msra.gmra.mrb[8].mxu1 %v6267_v22 }
 0x2d5   :  { %4405 = vmatprep.mubr.msk.f32.mxu1 %vm1285_vm8, %v6280_v27 }
 0x2d8   :  { %1960 = vmatmul.mubr.f32.gmra.mrb[10].mxu1 %v6282_v36 }
 0x337   :  { %v1724_v42 = vpop.f32.mrb[0].mxu1  ;;  %v1878_v25 = vpop.f32.mrb[4].mxu0 }
 0x338   :  { %1966 = vst [vmem:[#allocation3] sm:$0xff] %v1724_v42  ;;  %v1726_v8 = vpop.f32.mrb[1].mxu1  ;;  %v1880_v9 = vpop.f32.mrb[5].mxu0 }
 0x339   :  { %1967 = vst [vmem:[#allocation3 + $0x8] sm:$0xff] %v1726_v8 }
 0x33b   :  { %v1730_v30 = vpop.f32.mrb[2].mxu1  ;;  %v1884_v31 = vpop.f32.mrb[6].mxu0 }
 0x33c   :  { %1978 = vst [vmem:[#allocation3 + $0x60] sm:$0xff] %v1884_v31  ;;  %v1732_v33 = vpop.f32.mrb[3].mxu1  ;;  %v1886_v52 = vpop.f32.mrb[7].mxu0 }
 0x33d   :  { %1979 = vst [vmem:[#allocation3 + $0x68] sm:$0xff] %v1886_v52 }
 0x33f   :  { %v6318_v32 = vpop.f32.mrb[8].mxu0  ;;  %v2059_v22 = vld [vmem:[#allocation3 + $0x1] ss:$0 sm:$0xff]  ;;  %v2057_v37 = vld [vmem:[#allocation3] ss:$0 sm:$0xff] }
 0x340   :  { %2061 = vrot.lane.b32.xlu1 %v2059_v22, %s5677_s19  ;;  %v2067_v27 = vld [vmem:[#allocation3 + $0xb] ss:$0 sm:$0xff]  ;;  %v4499_v35 = vpop.f32.mrb[9].mxu0  ;;  %v2054_v45 = vadd.f32 %v6318_v32, %v70_v44 }
 0x341   :  { %2069 = vrot.lane.b32.xlu0 %v2067_v27, %s5677_s19 }
 0x342   :  { %v2058_v47 = vadd.f32 %v2057_v37, %v2054_v45 }
 0x343   :  { %v2091_v48 = vld [vmem:[#allocation3 + $0x61] ss:$0 sm:$0xff]  ;;  %v2089_v8 = vld [vmem:[#allocation3 + $0x60] ss:$0 sm:$0xff] }
 0x344   :  { %v2099_v2 = vld [vmem:[#allocation3 + $0x6b] ss:$0 sm:$0xff]  ;;  %v2097_v31 = vld [vmem:[#allocation3 + $0x6a] ss:$0 sm:$0xff] }
 0x36f   :  { %v1801_v36 = vpop.f32.mrb[4].mxu1 }
 0x370   :  { %1968 = vst [vmem:[#allocation3 + $0x10] sm:$0xff] %v1801_v36  ;;  %v1803_v16 = vpop.f32.mrb[5].mxu1 }
 0x371   :  { %1969 = vst [vmem:[#allocation3 + $0x18] sm:$0xff] %v1803_v16 }
 0x373   :  { %v1807_v46 = vpop.f32.mrb[6].mxu1 }
 0x374   :  { %v1809_v49 = vpop.f32.mrb[7].mxu1 }
 0x377   :  { %v2075_v50 = vld [vmem:[#allocation3 + $0x15] ss:$0 sm:$0xff]  ;;  %v2073_v24 = vld [vmem:[#allocation3 + $0x14] ss:$0 sm:$0xff] }
 0x378   :  { %2077 = vrot.lane.b32.xlu1 %v2075_v50, %s5677_s19  ;;  %v2083_v56 = vld [vmem:[#allocation3 + $0x1f] ss:$0 sm:$0xff]  ;;  %v2081_v54 = vld [vmem:[#allocation3 + $0x1e] ss:$0 sm:$0xff]  ;;  %v80_v50 = vld [vmem:[%s6763_s11] sm:$0xff] }
 0x379   :  { %2085 = vrot.lane.b32.xlu0 %v2083_v56, %s5677_s19  ;;  %v6443_v6 = vpack.c.bf16 %v81_v34, %v80_v50 }
 0x37c   :  { %2093 = vrot.lane.b32.xlu1 %v2091_v48, %s5677_s19 }
 0x37d   :  { %2101 = vrot.lane.b32.xlu0 %v2099_v2, %s5677_s19 }
 0x3a7   :  { %v1955_v4 = vpop.f32.mrb[8].mxu1 }
 0x3a8   :  { %v1957_v21 = vpop.f32.mrb[9].mxu1 }
 0x3ab   :  { %v1961_v26 = vpop.f32.mrb[10].mxu1 }
 0x3ac   :  { %1980 = vst [vmem:[#allocation3 + $0x70] sm:$0xff] %v1961_v26  ;;  %v1963_v11 = vpop.f32.mrb[11].mxu1  ;;  %v82_v26 = vld [vmem:[%s6763_s11 + $0x10] sm:$0xff] }
 0x3ad   :  { %1981 = vst [vmem:[#allocation3 + $0x78] sm:$0xff] %v1963_v11  ;;  %v83_v11 = vld [vmem:[%s6763_s11 + $0x18] sm:$0xff] }
 0x3b2   :  { %v2062_v58 = vpop.permute.xlu1 %2061 }
 0x3b3   :  { %v2107_v1 = vld [vmem:[#allocation3 + $0x75] ss:$0 sm:$0xff]  ;;  %v2064_v59 = vadd.f32 %v2062_v58, %v2058_v47  ;;  %v2070_v51 = vpop.permute.xlu0 %2069  ;;  %v2105_v22 = vld [vmem:[#allocation3 + $0x74] ss:$0 sm:$0xff] }
 0x3b4   :  { %2109 = vrot.lane.b32.xlu1 %v2107_v1, %s5677_s19  ;;  %v2115_v62 = vld [vmem:[#allocation3 + $0x7f] ss:$0 sm:$0xff]  ;;  %v2113_v46 = vld [vmem:[#allocation3 + $0x7e] ss:$0 sm:$0xff]  ;;  %v6455_v1 = vpack.c.bf16 %v83_v11, %v82_v26 }
 0x3b5   :  { %2117 = vrot.lane.b32.xlu0 %v2115_v62, %s5677_s19 }
 0x3b8   :  { %5465 = vrot.lane.b32.xlu1 %v6028_v55, %s5682_s0 }
 0x3b9   :  { %5470 = vrot.lane.b32.xlu0 %v6062_v10, %s5682_s0 }
 0x3bc   :  { %5475 = vrot.lane.b32.xlu1 %v6064_v38, %s5682_s0 }
 0x3bd   :  { %5480 = vrot.lane.b32.xlu0 %v6066_v18, %s5682_s0 }
 0x3c0   :  { %5485 = vrot.lane.b32.xlu1 %v6028_v55, %s5684_s23 }
 0x3c1   :  { %5490 = vrot.lane.b32.xlu0 %v6062_v10, %s5684_s23 }
 0x3c4   :  { %5495 = vrot.lane.b32.xlu1 %v6064_v38, %s5684_s23 }
 0x3c5   :  { %5500 = vrot.lane.b32.xlu0 %v6066_v18, %s5684_s23 }
 0x3c8   :  { %5505 = vrot.lane.b32.xlu1 %v6028_v55, %s5685_s6 }
 0x3c9   :  { %5510 = vrot.lane.b32.xlu0 %v6062_v10, %s5685_s6 }
 0x3cc   :  { %5515 = vrot.lane.b32.xlu1 %v6064_v38, %s5685_s6 }
 0x3cd   :  { %5520 = vrot.lane.b32.xlu0 %v6066_v18, %s5685_s6 }
 0x3d0   :  { %5525 = vrot.lane.b32.xlu1 %v6028_v55, %s5686_s24 }
 0x3d1   :  { %5530 = vrot.lane.b32.xlu0 %v6062_v10, %s5686_s24 }
 0x3d4   :  { %5535 = vrot.lane.b32.xlu1 %v6064_v38, %s5686_s24 }
 0x3d5   :  { %5540 = vrot.lane.b32.xlu0 %v6066_v18, %s5686_s24 }
 0x3d8   :  { %5545 = vrot.lane.b32.xlu1 %v6028_v55, %s5687_s25 }
 0x3d9   :  { %5550 = vrot.lane.b32.xlu0 %v6062_v10, %s5687_s25 }
 0x3dc   :  { %5555 = vrot.lane.b32.xlu1 %v6064_v38, %s5687_s25 }
 0x3dd   :  { %5560 = vrot.lane.b32.xlu0 %v6066_v18, %s5687_s25 }
 0x3e0   :  { %5565 = vrot.lane.b32.xlu1 %v6028_v55, %s5688_s26 }
 0x3e1   :  { %5570 = vrot.lane.b32.xlu0 %v6062_v10, %s5688_s26 }
 0x3e4   :  { %5575 = vrot.lane.b32.xlu1 %v6064_v38, %s5688_s26 }
 0x3e5   :  { %5580 = vrot.lane.b32.xlu0 %v6066_v18, %s5688_s26  ;;  %s5694_s26 = smov [#allocation7]  }
 0x3e8   :  { %5585 = vrot.lane.b32.xlu1 %v6028_v55, %s5689_s27 }
 0x3e9   :  { %5590 = vrot.lane.b32.xlu0 %v6062_v10, %s5689_s27 }
 0x3ea   :  { %v2078_v53 = vpop.permute.xlu1 %2077 }
 0x3ec   :  { %5595 = vrot.lane.b32.xlu1 %v6064_v38, %s5689_s27 }
 0x3ed   :  { %5600 = vrot.lane.b32.xlu0 %v6066_v18, %s5689_s27  ;;  %s4347_s27 = sshll.u32 %s5694_s26, 4  ;;  %s4348_s27 = int_to_ptr.vmem [resolvable:$true] %s4347_s27 }
 0x3ee   :  { %v2094_v30 = vpop.permute.xlu1 %2093  ;;  %p5654_p9 = scmp.lt.s32.totalorder %s4348_s27, %s4348_s27 }
 0x3f0   :  { %5605 = vrot.lane.b32.xlu1 %v6028_v55, %s5690_s28  ;;  %v2065_v55 = vld [vmem:[#allocation3 + $0xa] ss:$0 sm:$0xff] }
 0x3f1   :  { %5610 = vrot.lane.b32.xlu0 %v6062_v10, %s5690_s28  ;;  %v2066_v23 = vadd.f32 %v2065_v55, %v2064_v59 }
 0x3f3   :  { %v2072_v10 = vadd.f32 %v2070_v51, %v2066_v23  ;;  %v79_v51 = vld [vmem:[%s6762_s10] sm:$0x1] }
 0x3f4   :  { %5615 = vrot.lane.b32.xlu1 %v6064_v38, %s5690_s28  ;;  %v2086_v38 = vpop.permute.xlu0 %2085 }
 0x3f5   :  { %5620 = vrot.lane.b32.xlu0 %v6066_v18, %s5690_s28  ;;  %v2074_v17 = vadd.f32 %v2073_v24, %v2072_v10  ;;  %s5649_s28 = scalar_lea.vmem %s4348_s27, 32 }
 0x3f6   :  { %p5650_p8 = scmp.ne.s32.totalorder %s4348_s27, %s5649_s28  ;;  %p5655_p10 = scmp.lt.s32.totalorder %s5649_s28, %s5649_s28 }
 0x3f7   :  { %v2080_v39 = vadd.f32 %v2078_v53, %v2074_v17 }
 0x3f8   :  { %v2102_v52 = vpop.permute.xlu0 %2101  ;;  %p5656_p11 = por %p5655_p10, %p5654_p9 }
 0x3f9   :  { %v2082_v42 = vadd.f32 %v2081_v54, %v2080_v39 }
 0x3fa   :  { %p5657_p12 = pnand %p5656_p11, %p5650_p8 }
 0x3fb   :  { %v2088_v25 = vadd.f32 %v2086_v38, %v2082_v42 }
 0x3fd   :  { %v2090_v9 = vadd.f32 %v2089_v8, %v2088_v25 }
 0x3ff   :  { %v2096_v18 = vadd.f32 %v2094_v30, %v2090_v9 }
 0x401   :  { %v2098_v33 = vadd.f32 %v2097_v31, %v2096_v18 }
 0x403   :  { %v2104_v32 = vadd.f32 %v2102_v52, %v2098_v33 }
 0x405   :  { %v2106_v27 = vadd.f32 %v2105_v22, %v2104_v32  ;;  %v4410_v32 = vld [vmem:[%s6756_s4 + $0x10] sm:$0xff] }
 0x426   :  { %v2110_v35 = vpop.permute.xlu1 %2109 }
 0x427   :  { %v2112_v36 = vadd.f32 %v2110_v35, %v2106_v27  ;;  %v2118_v16 = vpop.permute.xlu0 %2117 }
 0x429   :  { %v2114_v49 = vadd.f32 %v2113_v46, %v2112_v36 }
 0x42a   :  { %v5466_v56 = vpop.permute.xlu1 %5465 }
 0x42b   :  { %v2120_v19 = vadd.f32 %v2118_v16, %v2114_v49  ;;  %v5468_v60 = vunpack.i.h.bf16 %v5466_v56  ;;  %v5467_v12 = vunpack.i.l.bf16 %v5466_v56  ;;  %v5471_v48 = vpop.permute.xlu0 %5470  ;;  %v4411_v49 = vld [vmem:[%s6756_s4 + $0x18] sm:$0xff] }
 0x42c   :  { %v5473_v2 = vunpack.i.h.bf16 %v5471_v48  ;;  %v5472_v4 = vunpack.i.l.bf16 %v5471_v48 }
 0x42d   :  { %v2121_v5 = vmax.f32 %v2120_v19, 0.0  ;;  %v2471_v21 = vsel %vm372_vm0, %v5467_v12, %v5468_v60 }
 0x42e   :  { %v2472_v61 = vsel %vm372_vm0, %v5472_v4, %v5473_v2  ;;  %v4887_v62 = vpack.c.bf16 %v5473_v2, %v5468_v60  ;;  %v5476_v44 = vpop.permute.xlu1 %5475 }
 0x42f   :  { %v4889_v57 = vpack.c.bf16 %v2472_v61, %v2471_v21  ;;  %4517 = vmatmul.mubr.msk.f32.vlgmr.msra.gmra.mrb[10].mxu0 %vm2122_vm14, %v2121_v5  ;;  %v5481_v45 = vpop.permute.xlu0 %5480  ;;  %v5478_v10 = vunpack.i.h.bf16 %v5476_v44  ;;  %v5477_v24 = vunpack.i.l.bf16 %v5476_v44 }
 0x430   :  { %4883 = vmatpush3.bf16.msra.mxu0 %v6443_v6  ;;  %4527 = vmatprep.mubr.msk.f32.mxu0 %vm5692_vm13, %v5683_v63  ;;  %v5483_v17 = vunpack.i.h.bf16 %v5481_v45  ;;  %v5482_v39 = vunpack.i.l.bf16 %v5481_v45 }
 0x431   :  { %4884 = vmatprep.subr.bf16.mxu0 %v5693_v41  ;;  %v2473_v9 = vsel %vm372_vm0, %v5477_v24, %v5478_v10 }
 0x432   :  { %v5486_v58 = vpop.permute.xlu1 %5485  ;;  %v4891_v30 = vpack.c.bf16 %v5483_v17, %v5478_v10  ;;  %v2474_v18 = vsel %vm372_vm0, %v5482_v39, %v5483_v17  ;;  %v4416_v10 = vld [vmem:[%s6756_s4 + $0x20] sm:$0xff] }
 0x433   :  { %v5491_v37 = vpop.permute.xlu0 %5490  ;;  %v4893_v31 = vpack.c.bf16 %v2474_v18, %v2473_v9  ;;  %v5488_v22 = vunpack.i.h.bf16 %v5486_v58  ;;  %v5487_v27 = vunpack.i.l.bf16 %v5486_v58 }
 0x434   :  { %4886 = vmatpush3.bf16.msra.mxu0 %v6455_v1  ;;  %v5493_v35 = vunpack.i.h.bf16 %v5491_v37  ;;  %v5492_v36 = vunpack.i.l.bf16 %v5491_v37 }
 0x435   :  { %4888 = vmatprep.subr.bf16.mxu0 %v4887_v62 }
 0x436   :  { %v5496_v47 = vpop.permute.xlu1 %5495  ;;  %v4903_v50 = vpack.c.bf16 %v5493_v35, %v5488_v22  ;;  %v2668_v34 = vsel %vm571_vm2, %v5492_v36, %v5493_v35  ;;  %v4420_v36 = vld [vmem:[%s6756_s4 + $0x30] sm:$0xff] }
 0x437   :  { %v5501_v59 = vpop.permute.xlu0 %5500  ;;  %v5498_v56 = vunpack.i.h.bf16 %v5496_v47  ;;  %v5497_v19 = vunpack.i.l.bf16 %v5496_v47 }
 0x438   :  { %v5503_v60 = vunpack.i.h.bf16 %v5501_v59  ;;  %v5502_v12 = vunpack.i.l.bf16 %v5501_v59 }
 0x43a   :  { %v6461_v55 = vpop.permute.xlu1 %5505  ;;  %v4907_v11 = vpack.c.bf16 %v5503_v60, %v5498_v56  ;;  %v2670_v61 = vsel %vm571_vm2, %v5502_v12, %v5503_v60 }
 0x43b   :  { %v6463_v23 = vpop.permute.xlu0 %5510  ;;  %v5508_v48 = vunpack.i.h.bf16 %v6461_v55  ;;  %v5507_v2 = vunpack.i.l.bf16 %v6461_v55 }
 0x43c   :  { %v5513_v4 = vunpack.i.h.bf16 %v6463_v23  ;;  %v5512_v5 = vunpack.i.l.bf16 %v6463_v23 }
 0x43d   :  { %v2784_v44 = vsel %vm690_vm3, %v5507_v2, %v5508_v48 }
 0x43e   :  { %v6468_v38 = vpop.permute.xlu1 %5515  ;;  %v4911_v45 = vpack.c.bf16 %v5513_v4, %v5508_v48  ;;  %v2785_v58 = vsel %vm690_vm3, %v5512_v5, %v5513_v4 }
 0x43f   :  { %v6470_v25 = vpop.permute.xlu0 %5520  ;;  %v5518_v37 = vunpack.i.h.bf16 %v6468_v38  ;;  %v5517_v47 = vunpack.i.l.bf16 %v6468_v38 }
 0x440   :  { %v5523_v59 = vunpack.i.h.bf16 %v6470_v25  ;;  %v5522_v55 = vunpack.i.l.bf16 %v6470_v25 }
 0x442   :  { %v6476_v33 = vpop.permute.xlu1 %5525  ;;  %v4915_v38 = vpack.c.bf16 %v5523_v59, %v5518_v37  ;;  %v2787_v25 = vsel %vm690_vm3, %v5522_v55, %v5523_v59 }
 0x443   :  { %v6478_v52 = vpop.permute.xlu0 %5530  ;;  %v5528_v24 = vunpack.i.h.bf16 %v6476_v33  ;;  %v5527_v17 = vunpack.i.l.bf16 %v6476_v33 }
 0x444   :  { %v5533_v39 = vunpack.i.h.bf16 %v6478_v52 }
 0x446   :  { %v6485_v16 = vpop.permute.xlu1 %5535  ;;  %v4919_v18 = vpack.c.bf16 %v5533_v39, %v5528_v24 }
 0x447   :  { %v6487_v46 = vpop.permute.xlu0 %5540 }
 0x448   :  { %v5542_v35 = vunpack.i.l.bf16 %v6487_v46 }
 0x44a   :  { %v6507_v21 = vpop.permute.xlu1 %5545 }
 0x44b   :  { %v6509_v26 = vpop.permute.xlu0 %5550 }
 0x44e   :  { %v6525_v23 = vpop.permute.xlu1 %5555 }
 0x44f   :  { %v5558_v5 = vunpack.i.h.bf16 %v6525_v23 }
 0x452   :  { %v5566_v33 = vpop.permute.xlu1 %5565 }
 0x456   :  { %v5576_v60 = vpop.permute.xlu1 %5575 }
 0x502   :  { %v2192_v53 = vpop.f32.mrb[10].mxu0 }
 0x503   :  { %v2193_v54 = vadd.f32 %v2192_v53, %v79_v51  ;;  %v4518_v42 = vpop.f32.mrb[11].mxu0  ;;  %v6527_v51 = vpop.permute.xlu0 %5560  ;;  %v4913_v53 = vpack.c.bf16 %v2785_v58, %v2784_v44 }
 0x504   :  { %v2786_v42 = vsel %vm690_vm3, %v5517_v47, %v5518_v37  ;;  %v5586_v58 = vpop.permute.xlu1 %5585 }
 0x505   :  { %v2196_v8 = vmax.f32 %v2193_v54, 0.0  ;;  %v5532_v54 = vunpack.i.l.bf16 %v6478_v52  ;;  %v4917_v9 = vpack.c.bf16 %v2787_v25, %v2786_v42 }
 0x507   :  { %4528 = vmatmul.mubr.msk.f32.vlgmr.msra.gmra.mrb[12].mxu0 %vm385_vm1, %v2196_v8  ;;  %v4417_v8 = vld [vmem:[%s6756_s4 + $0x28] sm:$0xff]  ;;  %v5571_v52 = vpop.permute.xlu0 %5570 }
 0x508   :  { %4890 = vmatpush1.bf16.msra.mxu0 %v4889_v57  ;;  %2553 = vmatprep.mubr.f32.mxu0 %v5683_v63  ;;  %v2436_v57 = vld [vmem:[%s6756_s4 + $0x8] sm:$0xff]  ;;  %v5573_v44 = vunpack.i.h.bf16 %v5571_v52 }
 0x509   :  { %4892 = vmatprep.subr.bf16.mxu0 %v4891_v30  ;;  %v2901_v30 = vsel %vm809_vm4, %v5527_v17, %v5528_v24  ;;  %v5578_v17 = vunpack.i.h.bf16 %v5576_v60 }
 0x50b   :  { %v5581_v12 = vpop.permute.xlu0 %5580 }
 0x50c   :  { %4894 = vmatpush1.bf16.msra.mxu0 %v4893_v31  ;;  %v2902_v31 = vsel %vm809_vm4, %v5532_v54, %v5533_v39  ;;  %v5577_v39 = vunpack.i.l.bf16 %v5576_v60  ;;  %v5583_v54 = vunpack.i.h.bf16 %v5581_v12  ;;  %v5582_v42 = vunpack.i.l.bf16 %v5581_v12  ;;  %v4432_v60 = vld [vmem:[%s6756_s4 + $0x60] sm:$0xff] }
 0x50d   :  { %4896 = vmatprep.subr.bf16.mxu0 %v6075_v20  ;;  %v2667_v20 = vsel %vm571_vm2, %v5487_v27, %v5488_v22  ;;  %v5537_v22 = vunpack.i.l.bf16 %v6485_v16  ;;  %v5543_v27 = vunpack.i.h.bf16 %v6487_v46 }
 0x50f   :  { %4412 = vmatmul.mubr.msk.f32.vlgmr.msra.gmra.mrb[14].mxu0 %vm385_vm1, %v4410_v32  ;;  %v5538_v32 = vunpack.i.h.bf16 %v6485_v16  ;;  %v5553_v16 = vunpack.i.h.bf16 %v6509_v26  ;;  %v5591_v37 = vpop.permute.xlu0 %5590 }
 0x510   :  { %4898 = vmatpush1.bf16.msra.mxu0 %v6079_v13  ;;  %2559 = vmatprep.mubr.f32.mxu0 %v5683_v63  ;;  %v2435_v13 = vld [vmem:[%s6756_s4] sm:$0xff] }
 0x511   :  { %4900 = vmatprep.subr.bf16.mxu0 %v6081_v28  ;;  %v4905_v28 = vpack.c.bf16 %v2668_v34, %v2667_v20  ;;  %v5548_v20 = vunpack.i.h.bf16 %v6507_v21  ;;  %v5552_v34 = vunpack.i.l.bf16 %v6509_v26  ;;  %v2903_v46 = vsel %vm809_vm4, %v5537_v22, %v5538_v32 }
 0x512   :  { %v5563_v26 = vunpack.i.h.bf16 %v6527_v51  ;;  %v3138_v22 = vsel %vm1047_vm6, %v5582_v42, %v5583_v54  ;;  %v3485_v42 = vld [vmem:[#allocation4 + $0x48] sm:$0xff] }
 0x513   :  { %4413 = vmatmul.mubr.msk.f32.gmra.mrb[16].mxu0 %vm385_vm1, %v4411_v49  ;;  %v4921_v49 = vpack.c.bf16 %v2902_v31, %v2901_v30  ;;  %v4927_v2 = vpack.c.bf16 %v5553_v16, %v5548_v20  ;;  %v3019_v4 = vsel %vm928_vm5, %v5552_v34, %v5553_v16  ;;  %v5601_v25 = vpop.permute.xlu0 %5600  ;;  %v5588_v30 = vunpack.i.h.bf16 %v5586_v58 }
 0x514   :  { %4902 = vmatpush1.bf16.msra.mxu0 %v6083_v29  ;;  %2636 = vmatprep.mubr.f32.mxu0 %v5683_v63  ;;  %v2669_v29 = vsel %vm571_vm2, %v5497_v19, %v5498_v56  ;;  %v4923_v56 = vpack.c.bf16 %v5543_v27, %v5538_v32  ;;  %v2904_v19 = vsel %vm809_vm4, %v5542_v35, %v5543_v27  ;;  %v5593_v31 = vunpack.i.h.bf16 %v5591_v37  ;;  %v4429_v27 = vld [vmem:[%s6756_s4 + $0x58] sm:$0xff] }
 0x515   :  { %4904 = vmatprep.subr.bf16.mxu0 %v4903_v50  ;;  %v4909_v62 = vpack.c.bf16 %v2670_v61, %v2669_v29  ;;  %v5547_v50 = vunpack.i.l.bf16 %v6507_v21  ;;  %v5557_v21 = vunpack.i.l.bf16 %v6525_v23  ;;  %v5562_v29 = vunpack.i.l.bf16 %v6527_v51  ;;  %v4425_v23 = vld [vmem:[%s6756_s4 + $0x48] sm:$0xff] }
 0x516   :  { %v4931_v59 = vpack.c.bf16 %v5563_v26, %v5558_v5  ;;  %v4939_v32 = vpack.c.bf16 %v5583_v54, %v5578_v17  ;;  %v3477_v54 = vld [vmem:[#allocation4 + $0x8] sm:$0xff] }
 0x517   :  { %4414 = vmatmul.mubr.msk.f32.vlgmr.msra.gmra.mrb[14].mxu0 %vm385_vm1, %v2435_v13  ;;  %v4421_v13 = vld [vmem:[%s6756_s4 + $0x38] sm:$0xff]  ;;  %v3018_v48 = vsel %vm928_vm5, %v5547_v50, %v5548_v20  ;;  %v3020_v47 = vsel %vm928_vm5, %v5557_v21, %v5558_v5  ;;  %v3021_v55 = vsel %vm928_vm5, %v5562_v29, %v5563_v26  ;;  %v5611_v16 = vpop.permute.xlu0 %5610 }
 0x518   :  { %4906 = vmatpush1.bf16.msra.mxu0 %v4905_v28  ;;  %2642 = vmatprep.mubr.f32.mxu0 %v5683_v63  ;;  %v4925_v28 = vpack.c.bf16 %v2904_v19, %v2903_v46  ;;  %v4929_v61 = vpack.c.bf16 %v3019_v4, %v3018_v48  ;;  %v4933_v51 = vpack.c.bf16 %v3021_v55, %v3020_v47  ;;  %v5602_v19 = vunpack.i.l.bf16 %v5601_v25 }
 0x519   :  { %4908 = vmatprep.subr.bf16.mxu0 %v4907_v11  ;;  %v4424_v11 = vld [vmem:[%s6756_s4 + $0x40] sm:$0xff]  ;;  %v5613_v48 = vunpack.i.h.bf16 %v5611_v16 }
 0x51b   :  { %4415 = vmatmul.mubr.msk.f32.gmra.mrb[16].mxu0 %vm385_vm1, %v2436_v57  ;;  %v5568_v57 = vunpack.i.h.bf16 %v5566_v33  ;;  %v5621_v29 = vpop.permute.xlu0 %5620 }
 0x51c   :  { %4910 = vmatpush1.bf16.msra.mxu0 %v4909_v62  ;;  %2749 = vmatprep.mubr.f32.mxu0 %v5683_v63  ;;  %v5567_v62 = vunpack.i.l.bf16 %v5566_v33  ;;  %v5592_v33 = vunpack.i.l.bf16 %v5591_v37  ;;  %v5623_v37 = vunpack.i.h.bf16 %v5621_v29  ;;  %v5622_v47 = vunpack.i.l.bf16 %v5621_v29 }
 0x51d   :  { %4912 = vmatprep.subr.bf16.mxu0 %v4911_v45  ;;  %v5572_v45 = vunpack.i.l.bf16 %v5571_v52  ;;  %v3137_v52 = vsel %vm1047_vm6, %v5577_v39, %v5578_v17  ;;  %v4440_v17 = vld [vmem:[%s6756_s4 + $0x80] sm:$0xff]  ;;  %v4441_v39 = vld [vmem:[%s6756_s4 + $0x88] sm:$0xff] }
 0x51e   :  { %v4941_v35 = vpack.c.bf16 %v3138_v22, %v3137_v52  ;;  %v3253_v20 = vsel %vm1166_vm7, %v5592_v33, %v5593_v31  ;;  %v3480_v33 = vld [vmem:[#allocation4 + $0x20] sm:$0xff] }
 0x51f   :  { %4418 = vmatmul.mubr.msk.f32.vlgmr.msra.gmra.mrb[14].mxu0 %vm385_vm1, %v4416_v10  ;;  %v3135_v10 = vsel %vm1047_vm6, %v5567_v62, %v5568_v57  ;;  %v3136_v24 = vsel %vm1047_vm6, %v5572_v45, %v5573_v44  ;;  %v3488_v52 = vld [vmem:[#allocation4 + $0x60] sm:$0xff] }
 0x520   :  { %4914 = vmatpush1.bf16.msra.mxu0 %v4913_v53  ;;  %2755 = vmatprep.mubr.f32.mxu0 %v5683_v63  ;;  %v4935_v53 = vpack.c.bf16 %v5573_v44, %v5568_v57  ;;  %v5077_v22 = vpack.c.bf16 %v3488_v52, %v3480_v33 }
 0x521   :  { %4916 = vmatprep.subr.bf16.mxu0 %v4915_v38  ;;  %v5596_v38 = vpop.permute.xlu1 %5595 }
 0x522   :  { %v5598_v34 = vunpack.i.h.bf16 %v5596_v38  ;;  %v5597_v46 = vunpack.i.l.bf16 %v5596_v38  ;;  %v3476_v38 = vld [vmem:[#allocation4] sm:$0xff] }
 0x523   :  { %4419 = vmatmul.mubr.msk.f32.gmra.mrb[16].mxu0 %vm385_vm1, %v4417_v8  ;;  %v4428_v8 = vld [vmem:[%s6756_s4 + $0x50] sm:$0xff] }
 0x524   :  { %4918 = vmatpush1.bf16.msra.mxu0 %v4917_v9  ;;  %2866 = vmatprep.mubr.f32.mxu0 %v5683_v63  ;;  %v4937_v9 = vpack.c.bf16 %v3136_v24, %v3135_v10  ;;  %v3254_v4 = vsel %vm1166_vm7, %v5597_v46, %v5598_v34  ;;  %v3372_v10 = vsel %vm1285_vm8, %v5622_v47, %v5623_v37 }
 0x525   :  { %4920 = vmatprep.subr.bf16.mxu0 %v4919_v18  ;;  %v5587_v18 = vunpack.i.l.bf16 %v5586_v58  ;;  %v5606_v50 = vpop.permute.xlu1 %5605 }
 0x527   :  { %4422 = vmatmul.mubr.msk.f32.vlgmr.msra.gmra.mrb[14].mxu0 %vm385_vm1, %v4420_v36  ;;  %v3252_v36 = vsel %vm1166_vm7, %v5587_v18, %v5588_v30 }
 0x528   :  { %4922 = vmatpush1.bf16.msra.mxu0 %v4921_v49  ;;  %2872 = vmatprep.mubr.f32.mxu0 %v5683_v63  ;;  %v4943_v49 = vpack.c.bf16 %v5593_v31, %v5588_v30  ;;  %v4945_v12 = vpack.c.bf16 %v3253_v20, %v3252_v36  ;;  %v3489_v30 = vld [vmem:[#allocation4 + $0x68] sm:$0xff]  ;;  %v3500_v36 = vld [vmem:[#allocation4 + $0xc0] sm:$0xff] }
 0x529   :  { %4924 = vmatprep.subr.bf16.mxu0 %v4923_v56  ;;  %v5603_v56 = vunpack.i.h.bf16 %v5601_v25  ;;  %v5616_v26 = vpop.permute.xlu1 %5615  ;;  %v4959_v25 = vpack.c.bf16 %v3485_v42, %v3477_v54  ;;  %v3540_v54 = vld [vmem:[#allocation4 + $0x200] sm:$0xff] }
 0x52a   :  { %v5618_v45 = vunpack.i.h.bf16 %v5616_v26  ;;  %v5617_v58 = vunpack.i.l.bf16 %v5616_v26  ;;  %v3548_v42 = vld [vmem:[#allocation4 + $0x240] sm:$0xff] }
 0x52b   :  { %4423 = vmatmul.mubr.msk.f32.gmra.mrb[16].mxu0 %vm385_vm1, %v4421_v13  ;;  %v5608_v13 = vunpack.i.h.bf16 %v5606_v50  ;;  %v4947_v5 = vpack.c.bf16 %v5603_v56, %v5598_v34  ;;  %v3255_v21 = vsel %vm1166_vm7, %v5602_v19, %v5603_v56  ;;  %4960 = vmatprep.subr.bf16.mxu1 %v4959_v25  ;;  %v3496_v34 = vld [vmem:[#allocation4 + $0xa0] sm:$0xff]  ;;  %v3509_v19 = vld [vmem:[#allocation4 + $0x108] sm:$0xff]  ;;  %v4977_v33 = vpack.c.bf16 %v3548_v42, %v3540_v54 }
 0x52c   :  { %4926 = vmatpush1.bf16.msra.mxu0 %v4925_v28  ;;  %2983 = vmatprep.mubr.f32.mxu0 %v5683_v63  ;;  %v5607_v28 = vunpack.i.l.bf16 %v5606_v50  ;;  %v3497_v50 = vld [vmem:[#allocation4 + $0xa8] sm:$0xff]  ;;  %v3504_v56 = vld [vmem:[#allocation4 + $0xe0] sm:$0xff] }
 0x52d   :  { %4928 = vmatprep.subr.bf16.mxu0 %v4927_v2  ;;  %v5612_v2 = vunpack.i.l.bf16 %v5611_v16  ;;  %v4951_v62 = vpack.c.bf16 %v5613_v48, %v5608_v13  ;;  %v3505_v16 = vld [vmem:[#allocation4 + $0xe8] sm:$0xff] }
 0x52e   :  { %v3369_v57 = vsel %vm1285_vm8, %v5607_v28, %v5608_v13  ;;  %v5079_v46 = vpack.c.bf16 %v3505_v16, %v3497_v50  ;;  %v3508_v28 = vld [vmem:[#allocation4 + $0x100] sm:$0xff]  ;;  %v3581_v50 = vld [vmem:[#allocation4 + $0x348] sm:$0xff] }
 0x52f   :  { %4426 = vmatmul.mubr.msk.f32.vlgmr.msra.gmra.mrb[14].mxu0 %vm385_vm1, %v4424_v11  ;;  %v4433_v11 = vld [vmem:[%s6756_s4 + $0x68] sm:$0xff]  ;;  %v3370_v44 = vsel %vm1285_vm8, %v5612_v2, %v5613_v48  ;;  %v3516_v48 = vld [vmem:[#allocation4 + $0x140] sm:$0xff] }
 0x530   :  { %4930 = vmatpush1.bf16.msra.mxu0 %v4929_v61  ;;  %2989 = vmatprep.mubr.f32.mxu0 %v5683_v63  ;;  %v4949_v61 = vpack.c.bf16 %v3255_v21, %v3254_v4  ;;  %v4953_v55 = vpack.c.bf16 %v3370_v44, %v3369_v57  ;;  %v3513_v2 = vld [vmem:[#allocation4 + $0x128] sm:$0xff]  ;;  %v3520_v21 = vld [vmem:[#allocation4 + $0x160] sm:$0xff]  ;;  %v4969_v26 = vpack.c.bf16 %v3516_v48, %v3508_v28 }
 0x531   :  { %4932 = vmatprep.subr.bf16.mxu0 %v4931_v59  ;;  %v4436_v59 = vld [vmem:[%s6756_s4 + $0x70] sm:$0xff]  ;;  %v3521_v4 = vld [vmem:[#allocation4 + $0x168] sm:$0xff]  ;;  %v3524_v57 = vld [vmem:[#allocation4 + $0x180] sm:$0xff] }
 0x532   :  { %v5083_v29 = vpack.c.bf16 %v3521_v4, %v3513_v2  ;;  %v3577_v16 = vld [vmem:[#allocation4 + $0x328] sm:$0xff]  ;;  %v3584_v48 = vld [vmem:[#allocation4 + $0x360] sm:$0xff] }
 0x533   :  { %4427 = vmatmul.mubr.msk.f32.gmra.mrb[16].mxu0 %vm385_vm1, %v4425_v23  ;;  %v3371_v23 = vsel %vm1285_vm8, %v5617_v58, %v5618_v45  ;;  %v3529_v58 = vld [vmem:[#allocation4 + $0x1a8] sm:$0xff] }
 0x534   :  { %4934 = vmatpush1.bf16.msra.mxu0 %v4933_v51  ;;  %3100 = vmatprep.mubr.f32.mxu0 %v5683_v63  ;;  %v4955_v51 = vpack.c.bf16 %v5623_v37, %v5618_v45  ;;  %v4957_v24 = vpack.c.bf16 %v3372_v10, %v3371_v23  ;;  %v3532_v45 = vld [vmem:[#allocation4 + $0x1c0] sm:$0xff]  ;;  %v3537_v37 = vld [vmem:[#allocation4 + $0x1e8] sm:$0xff] }
 0x535   :  { %4936 = vmatprep.subr.bf16.mxu0 %v4935_v53  ;;  %v4437_v53 = vld [vmem:[%s6756_s4 + $0x78] sm:$0xff]  ;;  %v5087_v47 = vpack.c.bf16 %v3537_v37, %v3529_v58  ;;  %v3541_v23 = vld [vmem:[#allocation4 + $0x208] sm:$0xff]  ;;  %v4973_v10 = vpack.c.bf16 %v3532_v45, %v3524_v57  ;;  %v3596_v57 = vld [vmem:[#allocation4 + $0x3c0] sm:$0xff] }
 0x536   :  { %v3589_v2 = vld [vmem:[#allocation4 + $0x388] sm:$0xff]  ;;  %v3600_v45 = vld [vmem:[#allocation4 + $0x3e0] sm:$0xff] }
 0x537   :  { %4430 = vmatmul.mubr.msk.f32.vlgmr.msra.gmra.mrb[14].mxu0 %vm385_vm1, %v4428_v8  ;;  %v3484_v8 = vld [vmem:[#allocation4 + $0x40] sm:$0xff]  ;;  %v3597_v4 = vld [vmem:[#allocation4 + $0x3c8] sm:$0xff] }
 0x538   :  { %4938 = vmatpush1.bf16.msra.mxu0 %v4937_v9  ;;  %3106 = vmatprep.mubr.f32.mxu0 %v5683_v63  ;;  %v3481_v9 = vld [vmem:[#allocation4 + $0x28] sm:$0xff]  ;;  %v4961_v18 = vpack.c.bf16 %v3484_v8, %v3476_v38  ;;  %v3544_v38 = vld [vmem:[#allocation4 + $0x220] sm:$0xff] }
 0x539   :  { %4940 = vmatprep.subr.bf16.mxu0 %v4939_v32  ;;  %v5075_v31 = vpack.c.bf16 %v3489_v30, %v3481_v9  ;;  %v3493_v32 = vld [vmem:[#allocation4 + $0x88] sm:$0xff]  ;;  %v3552_v8 = vld [vmem:[#allocation4 + $0x260] sm:$0xff] }
 0x53a   :  { %4962 = vmatpush1.bf16.msra.mxu1 %v4961_v18  ;;  %v3557_v9 = vld [vmem:[#allocation4 + $0x288] sm:$0xff]  ;;  %v5093_v52 = vpack.c.bf16 %v3552_v8, %v3544_v38 }
 0x53b   :  { %4431 = vmatmul.mubr.msk.f32.gmra.mrb[16].mxu0 %vm385_vm1, %v4429_v27  ;;  %v3501_v27 = vld [vmem:[#allocation4 + $0xc8] sm:$0xff] }
 0x53c   :  { %4942 = vmatpush1.bf16.msra.mxu0 %v4941_v35  ;;  %3217 = vmatprep.mubr.f32.mxu0 %v5683_v63  ;;  %v3492_v35 = vld [vmem:[#allocation4 + $0x80] sm:$0xff]  ;;  %v3565_v30 = vld [vmem:[#allocation4 + $0x2c8] sm:$0xff] }
 0x53d   :  { %4944 = vmatprep.subr.bf16.mxu0 %v4943_v49  ;;  %v4963_v49 = vpack.c.bf16 %v3501_v27, %v3493_v32  ;;  %v4965_v20 = vpack.c.bf16 %v3500_v36, %v3492_v35  ;;  %v3561_v18 = vld [vmem:[#allocation4 + $0x2a8] sm:$0xff]  ;;  %v4979_v32 = vpack.c.bf16 %v3565_v30, %v3557_v9  ;;  %v3564_v27 = vld [vmem:[#allocation4 + $0x2c0] sm:$0xff] }
 0x53e   :  { %v3560_v35 = vld [vmem:[#allocation4 + $0x2a0] sm:$0xff]  ;;  %v3605_v58 = vld [vmem:[#allocation4 + $0x408] sm:$0xff] }
 0x53f   :  { %4434 = vmatmul.mubr.msk.f32.vlgmr.msra.gmra.mrb[14].mxu0 %vm385_vm1, %v4432_v60  ;;  %v3517_v60 = vld [vmem:[#allocation4 + $0x148] sm:$0xff]  ;;  %4964 = vmatprep.subr.bf16.mxu1 %v4963_v49  ;;  %v3568_v49 = vld [vmem:[#allocation4 + $0x2e0] sm:$0xff] }
 0x540   :  { %4946 = vmatpush1.bf16.msra.mxu0 %v4945_v12  ;;  %3223 = vmatprep.mubr.f32.mxu0 %v5683_v63  ;;  %v5081_v12 = vpack.c.bf16 %v3504_v56, %v3496_v34  ;;  %v4967_v13 = vpack.c.bf16 %v3517_v60, %v3509_v19  ;;  %v3585_v34 = vld [vmem:[#allocation4 + $0x368] sm:$0xff]  ;;  %v5097_v56 = vpack.c.bf16 %v3568_v49, %v3560_v35  ;;  %v3572_v60 = vld [vmem:[#allocation4 + $0x300] sm:$0xff] }
 0x541   :  { %4948 = vmatprep.subr.bf16.mxu0 %v4947_v5  ;;  %v3512_v5 = vld [vmem:[#allocation4 + $0x120] sm:$0xff]  ;;  %4966 = vmatpush1.bf16.msra.mxu1 %v4965_v20  ;;  %v3573_v20 = vld [vmem:[#allocation4 + $0x308] sm:$0xff]  ;;  %v5099_v28 = vpack.c.bf16 %v3585_v34, %v3577_v16 }
 0x542   :  { %4968 = vmatprep.subr.bf16.mxu1 %v4967_v13  ;;  %v4983_v19 = vpack.c.bf16 %v3581_v50, %v3573_v20  ;;  %v3576_v13 = vld [vmem:[#allocation4 + $0x320] sm:$0xff]  ;;  %v3613_v37 = vld [vmem:[#allocation4 + $0x448] sm:$0xff] }
 0x543   :  { %4435 = vmatmul.mubr.msk.f32.gmra.mrb[16].mxu0 %vm385_vm1, %v4433_v11  ;;  %v3525_v11 = vld [vmem:[#allocation4 + $0x188] sm:$0xff]  ;;  %v3636_v16 = vld [vmem:[#allocation4 + $0x500] sm:$0xff] }
 0x544   :  { %4950 = vmatpush1.bf16.msra.mxu0 %v4949_v61  ;;  %3334 = vmatprep.mubr.f32.mxu0 %v5683_v63  ;;  %v3533_v61 = vld [vmem:[#allocation4 + $0x1c8] sm:$0xff]  ;;  %v3644_v34 = vld [vmem:[#allocation4 + $0x540] sm:$0xff] }
 0x545   :  { %4952 = vmatprep.subr.bf16.mxu0 %v4951_v62  ;;  %v5085_v62 = vpack.c.bf16 %v3520_v21, %v3512_v5  ;;  %v4971_v44 = vpack.c.bf16 %v3533_v61, %v3525_v11  ;;  %4970 = vmatpush1.bf16.msra.mxu1 %v4969_v26  ;;  %v3593_v5 = vld [vmem:[#allocation4 + $0x3a8] sm:$0xff]  ;;  %v4987_v11 = vpack.c.bf16 %v3597_v4, %v3589_v2  ;;  %v3588_v61 = vld [vmem:[#allocation4 + $0x380] sm:$0xff] }
 0x546   :  { %v3601_v21 = vld [vmem:[#allocation4 + $0x3e8] sm:$0xff] }
 0x547   :  { %4438 = vmatmul.mubr.msk.f32.vlgmr.msra.gmra.mrb[14].mxu0 %vm385_vm1, %v4436_v59  ;;  %v3528_v59 = vld [vmem:[#allocation4 + $0x1a0] sm:$0xff]  ;;  %4972 = vmatprep.subr.bf16.mxu1 %v4971_v44  ;;  %v5103_v44 = vpack.c.bf16 %v3601_v21, %v3593_v5  ;;  %v3621_v54 = vld [vmem:[#allocation4 + $0x488] sm:$0xff] }
 0x548   :  { %4954 = vmatpush1.bf16.msra.mxu0 %v4953_v55  ;;  %3340 = vmatprep.mubr.f32.mxu0 %v5683_v63  ;;  %v3536_v55 = vld [vmem:[#allocation4 + $0x1e0] sm:$0xff]  ;;  %v3629_v42 = vld [vmem:[#allocation4 + $0x4c8] sm:$0xff] }
 0x549   :  { %4956 = vmatprep.subr.bf16.mxu0 %v4955_v51  ;;  %v3549_v51 = vld [vmem:[#allocation4 + $0x248] sm:$0xff]  ;;  %4974 = vmatpush1.bf16.msra.mxu1 %v4973_v10  ;;  %v3604_v10 = vld [vmem:[#allocation4 + $0x400] sm:$0xff]  ;;  %v4995_v30 = vpack.c.bf16 %v3629_v42, %v3621_v54 }
 0x54a   :  { %v3625_v38 = vld [vmem:[#allocation4 + $0x4a8] sm:$0xff]  ;;  %v3652_v5 = vld [vmem:[#allocation4 + $0x580] sm:$0xff] }
 0x54b   :  { %4439 = vmatmul.mubr.msk.f32.gmra.mrb[16].mxu0 %vm385_vm1, %v4437_v53  ;;  %v3545_v53 = vld [vmem:[#allocation4 + $0x228] sm:$0xff]  ;;  %v3660_v21 = vld [vmem:[#allocation4 + $0x5c0] sm:$0xff] }
 0x54c   :  { %4958 = vmatpush1.bf16.msra.mxu0 %v4957_v24  ;;  %3451 = vmatprep.mubr.f32.mxu0 %v5683_v63  ;;  %v3553_v24 = vld [vmem:[#allocation4 + $0x268] sm:$0xff]  ;;  %v3692_v42 = vld [vmem:[#allocation4 + $0x6c0] sm:$0x3f] }
 0x54d   :  { %5076 = vmatprep.subr.bf16.mxu0 %v5075_v31  ;;  %v5091_v25 = vpack.c.bf16 %v3553_v24, %v3545_v53  ;;  %v3569_v31 = vld [vmem:[#allocation4 + $0x2e8] sm:$0xff]  ;;  %v3612_v53 = vld [vmem:[#allocation4 + $0x440] sm:$0xff] }
 0x54e   :  { %v5095_v36 = vpack.c.bf16 %v3569_v31, %v3561_v18  ;;  %v3608_v24 = vld [vmem:[#allocation4 + $0x420] sm:$0xff]  ;;  %v4993_v8 = vpack.c.bf16 %v3612_v53, %v3604_v10  ;;  %v3641_v35 = vld [vmem:[#allocation4 + $0x528] sm:$0xff] }
 0x54f   :  { %4442 = vmatmul.mubr.msk.f32.vlgmr.msra.gmra.mrb[14].mxu0 %vm385_vm1, %v4440_v17  ;;  %v5089_v17 = vpack.c.bf16 %v3536_v55, %v3528_v59  ;;  %v3617_v59 = vld [vmem:[#allocation4 + $0x468] sm:$0xff]  ;;  %v4989_v55 = vpack.c.bf16 %v3596_v57, %v3588_v61  ;;  %v3620_v18 = vld [vmem:[#allocation4 + $0x480] sm:$0xff] }
 0x550   :  { %3457 = vmatprep.mubr.f32.mxu0 %v5683_v63  ;;  %5078 = vmatpush1.bf16.msra.mxu0 %v5077_v22  ;;  %v3556_v22 = vld [vmem:[#allocation4 + $0x280] sm:$0xff]  ;;  %v3669_v61 = vld [vmem:[#allocation4 + $0x608] sm:$0xff] }
 0x551   :  { %5080 = vmatprep.subr.bf16.mxu0 %v5079_v46  ;;  %v4981_v46 = vpack.c.bf16 %v3564_v27, %v3556_v22  ;;  %v3628_v31 = vld [vmem:[#allocation4 + $0x4c0] sm:$0xff]  ;;  %v3637_v22 = vld [vmem:[#allocation4 + $0x508] sm:$0xff] }
 0x552   :  { %v3645_v27 = vld [vmem:[#allocation4 + $0x548] sm:$0xff]  ;;  %v4997_v49 = vpack.c.bf16 %v3628_v31, %v3620_v18  ;;  %v3680_v10 = vld [vmem:[#allocation4 + $0x660] sm:$0xff] }
 0x553   :  { %4443 = vmatmul.mubr.msk.f32.gmra.mrb[16].mxu0 %vm385_vm1, %v4441_v39  ;;  %v4975_v39 = vpack.c.bf16 %v3549_v51, %v3541_v23  ;;  %v4991_v51 = vpack.c.bf16 %v3613_v37, %v3605_v58  ;;  %v4999_v50 = vpack.c.bf16 %v3645_v27, %v3637_v22  ;;  %v3677_v57 = vld [vmem:[#allocation4 + $0x648] sm:$0xff]  ;;  %v3696_v18 = vld [vmem:[#allocation4 + $0x6e0] sm:$0x3f] }
 0x554   :  { %5082 = vmatpush1.bf16.msra.mxu0 %v5081_v12  ;;  %v3580_v12 = vld [vmem:[#allocation4 + $0x340] sm:$0xff]  ;;  %v5007_v37 = vpack.c.bf16 %v3677_v57, %v3669_v61 }
 0x555   :  { %5084 = vmatprep.subr.bf16.mxu0 %v5083_v29  ;;  %4976 = vmatprep.subr.bf16.mxu1 %v4975_v39  ;;  %v4985_v26 = vpack.c.bf16 %v3580_v12, %v3572_v60  ;;  %v5101_v29 = vpack.c.bf16 %v3584_v48, %v3576_v13  ;;  %v3616_v39 = vld [vmem:[#allocation4 + $0x460] sm:$0xff]  ;;  %v3653_v60 = vld [vmem:[#allocation4 + $0x588] sm:$0xff]  ;;  %v5001_v48 = vpack.c.bf16 %v3644_v34, %v3636_v16  ;;  %v3478_v16 = vld [vmem:[#allocation4 + $0x10] sm:$0xff] }
 0x556   :  { %4978 = vmatpush1.bf16.msra.mxu1 %v4977_v33  ;;  %v5109_v9 = vpack.c.bf16 %v3616_v39, %v3608_v24  ;;  %v3624_v33 = vld [vmem:[#allocation4 + $0x4a0] sm:$0xff]  ;;  %v3661_v12 = vld [vmem:[#allocation4 + $0x5c8] sm:$0xff]  ;;  %v3486_v34 = vld [vmem:[#allocation4 + $0x50] sm:$0xff] }
 0x557   :  { %4980 = vmatprep.subr.bf16.mxu1 %v4979_v32  ;;  %v3632_v32 = vld [vmem:[#allocation4 + $0x4e0] sm:$0xff]  ;;  %v3657_v13 = vld [vmem:[#allocation4 + $0x5a8] sm:$0xff]  ;;  %v5003_v4 = vpack.c.bf16 %v3661_v12, %v3653_v60 }
 0x558   :  { %5086 = vmatpush1.bf16.msra.mxu0 %v5085_v62  ;;  %v3592_v62 = vld [vmem:[#allocation4 + $0x3a0] sm:$0xff]  ;;  %v5113_v20 = vpack.c.bf16 %v3632_v32, %v3624_v33  ;;  %v3685_v24 = vld [vmem:[#allocation4 + $0x688] sm:$0xff]  ;;  %v3479_v33 = vld [vmem:[#allocation4 + $0x18] sm:$0xff] }
 0x559   :  { %5088 = vmatprep.subr.bf16.mxu0 %v5087_v47  ;;  %v3609_v47 = vld [vmem:[#allocation4 + $0x428] sm:$0xff]  ;;  %v5105_v23 = vpack.c.bf16 %v3600_v45, %v3592_v62  ;;  %v5005_v45 = vpack.c.bf16 %v3660_v21, %v3652_v5  ;;  %v3684_v39 = vld [vmem:[#allocation4 + $0x680] sm:$0xff]  ;;  %v3494_v5 = vld [vmem:[#allocation4 + $0x90] sm:$0xff] }
 0x55a   :  { %4982 = vmatpush1.bf16.msra.mxu1 %v4981_v46  ;;  %v3640_v46 = vld [vmem:[#allocation4 + $0x520] sm:$0xff]  ;;  %v3673_v62 = vld [vmem:[#allocation4 + $0x628] sm:$0xff]  ;;  %v3502_v21 = vld [vmem:[#allocation4 + $0xd0] sm:$0xff] }
 0x55b   :  { %4984 = vmatprep.subr.bf16.mxu1 %v4983_v19  ;;  %v3648_v19 = vld [vmem:[#allocation4 + $0x560] sm:$0xff]  ;;  %v5023_v61 = vpack.c.bf16 %v3502_v21, %v3494_v5  ;;  %v3647_v5 = vld [vmem:[#allocation4 + $0x558] sm:$0xff] }
 0x55c   :  { %5090 = vmatpush1.bf16.msra.mxu0 %v5089_v17  ;;  %v5107_v17 = vpack.c.bf16 %v3617_v59, %v3609_v47  ;;  %v5117_v2 = vpack.c.bf16 %v3648_v19, %v3640_v46  ;;  %v3668_v47 = vld [vmem:[#allocation4 + $0x600] sm:$0xff]  ;;  %v3503_v19 = vld [vmem:[#allocation4 + $0xd8] sm:$0xff] }
 0x55d   :  { %5092 = vmatprep.subr.bf16.mxu0 %v5091_v25  ;;  %v3633_v25 = vld [vmem:[#allocation4 + $0x4e8] sm:$0xff]  ;;  %v3676_v59 = vld [vmem:[#allocation4 + $0x640] sm:$0xff] }
 0x55e   :  { %4986 = vmatpush1.bf16.msra.mxu1 %v4985_v26  ;;  %v3656_v26 = vld [vmem:[#allocation4 + $0x5a0] sm:$0xff] }
 0x55f   :  { %4988 = vmatprep.subr.bf16.mxu1 %v4987_v11  ;;  %v3664_v11 = vld [vmem:[#allocation4 + $0x5e0] sm:$0xff] }
 0x560   :  { %5094 = vmatpush1.bf16.msra.mxu0 %v5093_v52  ;;  %v5111_v52 = vpack.c.bf16 %v3633_v25, %v3625_v38  ;;  %v5121_v58 = vpack.c.bf16 %v3664_v11, %v3656_v26  ;;  %v3689_v38 = vld [vmem:[#allocation4 + $0x6a8] sm:$0xff]  ;;  %v6649_v22 = vld [vmem:[%s6764_s12] sm:$0x1] }
 0x561   :  { %5096 = vmatprep.subr.bf16.mxu0 %v5095_v36  ;;  %v3649_v36 = vld [vmem:[#allocation4 + $0x568] sm:$0xff] }
 0x562   :  { %4990 = vmatpush1.bf16.msra.mxu1 %v4989_v55  ;;  %v3697_v25 = vld [vmem:[#allocation4 + $0x6e8] sm:$0x3f] }
 0x563   :  { %4992 = vmatprep.subr.bf16.mxu1 %v4991_v51  ;;  %v3672_v51 = vld [vmem:[#allocation4 + $0x620] sm:$0xff] }
 0x564   :  { %5098 = vmatpush1.bf16.msra.mxu0 %v5097_v56  ;;  %v5115_v56 = vpack.c.bf16 %v3649_v36, %v3641_v35  ;;  %v5125_v53 = vpack.c.bf16 %v3680_v10, %v3672_v51  ;;  %v3534_v51 = vld [vmem:[#allocation4 + $0x1d0] sm:$0xff]  ;;  %v3543_v10 = vld [vmem:[#allocation4 + $0x218] sm:$0xff] }
 0x565   :  { %5100 = vmatprep.subr.bf16.mxu0 %v5099_v28  ;;  %v3665_v28 = vld [vmem:[#allocation4 + $0x5e8] sm:$0xff] }
 0x566   :  { %4994 = vmatpush1.bf16.msra.mxu1 %v4993_v8  ;;  %v5014_v8 = vpack.c.bf16 %v3692_v42, %v3684_v39  ;;  %v3542_v39 = vld [vmem:[#allocation4 + $0x210] sm:$0xff]  ;;  %v3559_v42 = vld [vmem:[#allocation4 + $0x298] sm:$0xff] }
 0x567   :  { %4996 = vmatprep.subr.bf16.mxu1 %v4995_v30  ;;  %v3688_v30 = vld [vmem:[#allocation4 + $0x6a0] sm:$0xff] }
 0x568   :  { %5102 = vmatpush1.bf16.msra.mxu0 %v5101_v29  ;;  %v5119_v29 = vpack.c.bf16 %v3665_v28, %v3657_v13  ;;  %v5130_v31 = vpack.c.bf16 %v3696_v18, %v3688_v30  ;;  %v5019_v13 = vpack.c.bf16 %v3486_v34, %v3478_v16  ;;  %v3566_v30 = vld [vmem:[#allocation4 + $0x2d0] sm:$0xff]  ;;  %v3583_v18 = vld [vmem:[#allocation4 + $0x358] sm:$0xff] }
 0x569   :  { %5104 = vmatprep.subr.bf16.mxu0 %v5103_v44  ;;  %v3681_v44 = vld [vmem:[#allocation4 + $0x668] sm:$0xff] }
 0x56a   :  { %4998 = vmatpush1.bf16.msra.mxu1 %v4997_v49  ;;  %v5123_v55 = vpack.c.bf16 %v3681_v44, %v3673_v62  ;;  %v3510_v44 = vld [vmem:[#allocation4 + $0x110] sm:$0xff] }
 0x56b   :  { %5000 = vmatprep.subr.bf16.mxu1 %v4999_v50 }
 0x56c   :  { %5106 = vmatpush1.bf16.msra.mxu0 %v5105_v23  ;;  %v5009_v23 = vpack.c.bf16 %v3676_v59, %v3668_v47  ;;  %v4054_v59 = vld [vmem:[%s6753_s1 + $0x1] sm:$0x1] }
 0x56d   :  { %5108 = vmatprep.subr.bf16.mxu0 %v5107_v17  ;;  %v3693_v17 = vld [vmem:[#allocation4 + $0x6c8] sm:$0x3f] }
 0x56e   :  { %5002 = vmatpush1.bf16.msra.mxu1 %v5001_v48  ;;  %v5011_v54 = vpack.c.bf16 %v3693_v17, %v3685_v24 }
 0x56f   :  { %5004 = vmatprep.subr.bf16.mxu1 %v5003_v4 }
 0x570   :  { %5110 = vmatpush1.bf16.msra.mxu0 %v5109_v9  ;;  %v5127_v9 = vpack.c.bf16 %v3697_v25, %v3689_v38  ;;  %v3567_v38 = vld [vmem:[#allocation4 + $0x2d8] sm:$0xff] }
 0x571   :  { %5112 = vmatprep.subr.bf16.mxu0 %v5111_v52  ;;  %v3487_v52 = vld [vmem:[#allocation4 + $0x58] sm:$0xff] }
 0x572   :  { %5006 = vmatpush1.bf16.msra.mxu1 %v5005_v45  ;;  %v5017_v32 = vpack.c.bf16 %v3487_v52, %v3479_v33  ;;  %v3518_v45 = vld [vmem:[#allocation4 + $0x150] sm:$0xff] }
 0x573   :  { %5008 = vmatprep.subr.bf16.mxu1 %v5007_v37  ;;  %v3535_v37 = vld [vmem:[#allocation4 + $0x1d8] sm:$0xff]  ;;  %v5027_v47 = vpack.c.bf16 %v3518_v45, %v3510_v44  ;;  %v3574_v52 = vld [vmem:[#allocation4 + $0x310] sm:$0xff] }
 0x574   :  { %5114 = vmatpush1.bf16.msra.mxu0 %v5113_v20  ;;  %v3654_v45 = vld [vmem:[#allocation4 + $0x590] sm:$0xff] }
 0x575   :  { %5116 = vmatprep.subr.bf16.mxu0 %v5115_v56  ;;  %v3495_v56 = vld [vmem:[#allocation4 + $0x98] sm:$0xff] }
 0x576   :  { %5010 = vmatpush1.bf16.msra.mxu1 %v5009_v23  ;;  %v5021_v4 = vpack.c.bf16 %v3503_v19, %v3495_v56  ;;  %v3526_v23 = vld [vmem:[#allocation4 + $0x190] sm:$0xff]  ;;  %v3623_v19 = vld [vmem:[#allocation4 + $0x498] sm:$0xff] }
 0x577   :  { %5013 = vmatprep.subr.msk.bf16.mxu1 %vm6246_vm11, %v5011_v54  ;;  %v5031_v24 = vpack.c.bf16 %v3534_v51, %v3526_v23  ;;  %v3550_v54 = vld [vmem:[#allocation4 + $0x250] sm:$0xff] }
 0x578   :  { %5118 = vmatpush1.bf16.msra.mxu0 %v5117_v2  ;;  %v5035_v25 = vpack.c.bf16 %v3550_v54, %v3542_v39  ;;  %v3614_v56 = vld [vmem:[#allocation4 + $0x450] sm:$0xff] }
 0x579   :  { %5120 = vmatprep.subr.bf16.mxu0 %v5119_v29  ;;  %v3519_v29 = vld [vmem:[#allocation4 + $0x158] sm:$0xff]  ;;  %v3670_v23 = vld [vmem:[#allocation4 + $0x610] sm:$0xff] }
 0x57a   :  { %5016 = vmatpush1.bf16.msk.msra.mxu1 %vm6246_vm11, %v5014_v8  ;;  %v5037_v8 = vpack.c.bf16 %v3567_v38, %v3559_v42  ;;  %v3678_v51 = vld [vmem:[#allocation4 + $0x650] sm:$0xff]  ;;  %v3483_v42 = vld [vmem:[#allocation4 + $0x38] sm:$0xff] }
 0x57b   :  { %5018 = vmatprep.subr.bf16.mxu1 %v5017_v32  ;;  %v3582_v32 = vld [vmem:[#allocation4 + $0x350] sm:$0xff]  ;;  %v3491_v38 = vld [vmem:[#allocation4 + $0x78] sm:$0xff] }
 0x57c   :  { %5122 = vmatpush1.bf16.msra.mxu0 %v5121_v58  ;;  %v3527_v58 = vld [vmem:[#allocation4 + $0x198] sm:$0xff]  ;;  %v3686_v39 = vld [vmem:[#allocation4 + $0x690] sm:$0xff] }
 0x57d   :  { %5124 = vmatprep.subr.bf16.mxu0 %v5123_v55  ;;  %v5029_v55 = vpack.c.bf16 %v3535_v37, %v3527_v58  ;;  %v3662_v58 = vld [vmem:[#allocation4 + $0x5d0] sm:$0xff]  ;;  %v3671_v37 = vld [vmem:[#allocation4 + $0x618] sm:$0xff] }
 0x57e   :  { %v3694_v54 = vld [vmem:[#allocation4 + $0x6d0] sm:$0x3f] }
 0x580   :  { %5126 = vmatpush1.bf16.msra.mxu0 %v5125_v53  ;;  %v3551_v53 = vld [vmem:[#allocation4 + $0x258] sm:$0xff] }
 0x581   :  { %5129 = vmatprep.subr.msk.bf16.mxu0 %vm6246_vm11, %v5127_v9  ;;  %v5033_v17 = vpack.c.bf16 %v3551_v53, %v3543_v10  ;;  %v3558_v9 = vld [vmem:[#allocation4 + $0x290] sm:$0xff]  ;;  %v3687_v10 = vld [vmem:[#allocation4 + $0x698] sm:$0xff] }
 0x582   :  { %v3695_v53 = vld [vmem:[#allocation4 + $0x6d8] sm:$0x3f] }
 0x584   :  { %5132 = vmatpush1.bf16.msk.msra.mxu0 %vm6246_vm11, %v5130_v31  ;;  %v5039_v31 = vpack.c.bf16 %v3566_v30, %v3558_v9  ;;  %v3482_v9 = vld [vmem:[#allocation4 + $0x30] sm:$0xff] }
 0x585   :  { %4530 = vmatprep.subr.mxu0 %v5683_v63  ;;  %v3490_v30 = vld [vmem:[#allocation4 + $0x70] sm:$0xff] }
 0x5da   :  { %v2266_v27 = vpop.f32.mrb[12].mxu0 }
 0x5db   :  { %v2267_v35 = vadd.f32 %v2266_v27, %v6649_v22  ;;  %v4529_v36 = vpop.f32.mrb[13].mxu0  ;;  %v3591_v27 = vld [vmem:[#allocation4 + $0x398] sm:$0xff] }
 0x5dd   :  { %2271 = vst.msk [vmem:[#allocation7] sm:$0x1] %vm2270_vm15, %v2267_v35  ;;  %v5043_v35 = vpack.c.bf16 %v3582_v32, %v3574_v52  ;;  %v3498_v52 = vld [vmem:[#allocation4 + $0xb0] sm:$0xff] }
 0x5de   :  { %v3506_v32 = vld [vmem:[#allocation4 + $0xf0] sm:$0xff] }
 0x622   :  { %v3453_v49 = vpop.f32.mrb[14].mxu0 }
 0x623   :  { %v3468_v20 = vadd.f32 %v3453_v49, %v6259_v43  ;;  %v3455_v50 = vpop.f32.mrb[15].mxu0  ;;  %v3590_v49 = vld [vmem:[#allocation4 + $0x390] sm:$0xff] }
 0x624   :  { %v3469_v46 = vadd.f32 %v3455_v50, %v6259_v43  ;;  %v3511_v43 = vld [vmem:[#allocation4 + $0x118] sm:$0xff] }
 0x625   :  { %v6657_v28 = vmax.f32 %v3468_v20, 0.0  ;;  %v5025_v62 = vpack.c.bf16 %v3519_v29, %v3511_v43  ;;  %v3598_v20 = vld [vmem:[#allocation4 + $0x3d0] sm:$0xff]  ;;  %v3607_v50 = vld [vmem:[#allocation4 + $0x418] sm:$0xff] }
 0x626   :  { %v6655_v60 = vmax.f32 %v3469_v46, 0.0  ;;  %v3459_v12 = vpop.f32.mrb[16].mxu0  ;;  %v5047_v16 = vpack.c.bf16 %v3598_v20, %v3590_v49  ;;  %v3606_v46 = vld [vmem:[#allocation4 + $0x410] sm:$0xff] }
 0x627   :  { %v3470_v48 = vadd.f32 %v3459_v12, %v6263_v7  ;;  %v3461_v2 = vpop.f32.mrb[17].mxu0  ;;  %v3631_v12 = vld [vmem:[#allocation4 + $0x4d8] sm:$0xff]  ;;  %v3638_v43 = vld [vmem:[#allocation4 + $0x510] sm:$0xff] }
 0x628   :  { %v3471_v26 = vadd.f32 %v3461_v2, %v6263_v7  ;;  %4446 = vmatprep.mubr.msk.f32.mxu1 %vm1285_vm8, %v6655_v60  ;;  %4454 = vmatprep.mubr.msk.f32.mxu0 %vm1285_vm8, %v6655_v60  ;;  %v5624_v7 = vld [vmem:[%s6759_s7] sm:$0xff]  ;;  %v3630_v2 = vld [vmem:[#allocation4 + $0x4d0] sm:$0xff] }
 0x629   :  { %3795 = vmatmul.mubr.f32.vlgmr.msra.gmra.mrb[12].mxu1 %v6657_v28  ;;  %3949 = vmatmul.mubr.f32.vlgmr.msra.gmra.mrb[18].mxu0 %v6657_v28  ;;  %v6672_v57 = vmax.f32 %v3470_v48, 0.0  ;;  %v3622_v48 = vld [vmem:[#allocation4 + $0x490] sm:$0xff] }
 0x62a   :  { %v6667_v11 = vmax.f32 %v3471_v26, 0.0  ;;  %5020 = vmatpush1.bf16.msra.mxu1 %v5019_v13  ;;  %4531 = vmatpush3.msra.mxu0 %v5624_v7  ;;  %v5051_v13 = vpack.c.bf16 %v3614_v56, %v3606_v46  ;;  %v5055_v21 = vpack.c.bf16 %v3630_v2, %v3622_v48  ;;  %v3646_v29 = vld [vmem:[#allocation4 + $0x550] sm:$0xff]  ;;  %v3663_v7 = vld [vmem:[#allocation4 + $0x5d8] sm:$0xff] }
 0x62b   :  { %5022 = vmatprep.subr.bf16.mxu1 %v5021_v4  ;;  %5191 = vmatprep.subr.bf16.mxu0 %v5693_v41  ;;  %v3639_v4 = vld [vmem:[#allocation4 + $0x518] sm:$0xff]  ;;  %v3514_v49 = vld [vmem:[#allocation4 + $0x130] sm:$0xff] }
 0x62c   :  { %4447 = vmatprep.mubr.msk.f32.mxu1 %vm1285_vm8, %v6667_v11  ;;  %4455 = vmatprep.mubr.msk.f32.mxu0 %vm1285_vm8, %v6667_v11  ;;  %v5057_v26 = vpack.c.bf16 %v3647_v5, %v3639_v4  ;;  %v3522_v20 = vld [vmem:[#allocation4 + $0x170] sm:$0xff]  ;;  %v3563_v4 = vld [vmem:[#allocation4 + $0x2b8] sm:$0xff] }
 0x62d   :  { %3801 = vmatmul.mubr.f32.gmra.mrb[14].mxu1 %v6672_v57  ;;  %3955 = vmatmul.mubr.f32.gmra.mrb[20].mxu0 %v6672_v57  ;;  %v3530_v46 = vld [vmem:[#allocation4 + $0x1b0] sm:$0xff]  ;;  %v3571_v5 = vld [vmem:[#allocation4 + $0x2f8] sm:$0xff] }
 0x62e   :  { %5024 = vmatpush1.bf16.msra.mxu1 %v5023_v61  ;;  %4450 = vmatprep.mubr.msk.f32.mxu1 %vm1285_vm8, %v6655_v60  ;;  %v3655_v61 = vld [vmem:[#allocation4 + $0x598] sm:$0xff]  ;;  %v3538_v56 = vld [vmem:[#allocation4 + $0x1f0] sm:$0xff] }
 0x62f   :  { %5026 = vmatprep.subr.bf16.mxu1 %v5025_v62  ;;  %4532 = vmatprep.mubr.msk.f32.mxu0 %vm5692_vm13, %v5683_v63  ;;  %v5059_v62 = vpack.c.bf16 %v3646_v29, %v3638_v43  ;;  %v5061_v44 = vpack.c.bf16 %v3663_v7, %v3655_v61  ;;  %v3546_v48 = vld [vmem:[#allocation4 + $0x230] sm:$0xff]  ;;  %v3579_v29 = vld [vmem:[#allocation4 + $0x338] sm:$0xff] }
 0x630   :  { %v3554_v2 = vld [vmem:[#allocation4 + $0x270] sm:$0xff]  ;;  %v3587_v61 = vld [vmem:[#allocation4 + $0x378] sm:$0xff] }
 0x631   :  { %4533 = vmatmul.mubr.msk.f32.vlgmr.msra.gmra.mrb[22].mxu0 %vm1983_vm12, %v4054_v59  ;;  %v5063_v59 = vpack.c.bf16 %v3662_v58, %v3654_v45  ;;  %v3570_v43 = vld [vmem:[#allocation4 + $0x2f0] sm:$0xff]  ;;  %v3595_v58 = vld [vmem:[#allocation4 + $0x3b8] sm:$0xff] }
 0x632   :  { %5028 = vmatpush1.bf16.msra.mxu1 %v5027_v47  ;;  %5193 = vmatpush3.bf16.msra.mxu0 %v6331_v40  ;;  %v3575_v40 = vld [vmem:[#allocation4 + $0x318] sm:$0xff]  ;;  %v3586_v45 = vld [vmem:[#allocation4 + $0x370] sm:$0xff] }
 0x633   :  { %5030 = vmatprep.subr.bf16.mxu1 %v5029_v55  ;;  %5194 = vmatprep.subr.bf16.mxu0 %v5693_v41  ;;  %v5041_v33 = vpack.c.bf16 %v3583_v18, %v3575_v40  ;;  %v3679_v47 = vld [vmem:[#allocation4 + $0x658] sm:$0xff] }
 0x634   :  { %4551 = vmatprep.mubr.msk.f32.mxu0 %vm5692_vm13, %v5683_v63  ;;  %v5065_v55 = vpack.c.bf16 %v3679_v47, %v3671_v37  ;;  %v3499_v40 = vld [vmem:[#allocation4 + $0xb8] sm:$0xff] }
 0x635   :  { %v3507_v18 = vld [vmem:[#allocation4 + $0xf8] sm:$0xff] }
 0x636   :  { %5032 = vmatpush1.bf16.msra.mxu1 %v5031_v24  ;;  %5196 = vmatpush3.bf16.msra.mxu0 %v6340_v15  ;;  %v3599_v15 = vld [vmem:[#allocation4 + $0x3d8] sm:$0xff]  ;;  %v5067_v24 = vpack.c.bf16 %v3678_v51, %v3670_v23  ;;  %v3602_v23 = vld [vmem:[#allocation4 + $0x3f0] sm:$0xff] }
 0x637   :  { %5034 = vmatprep.subr.bf16.mxu1 %v5033_v17  ;;  %5197 = vmatprep.subr.bf16.mxu0 %v5693_v41  ;;  %v5045_v36 = vpack.c.bf16 %v3599_v15, %v3591_v27  ;;  %v5069_v17 = vpack.c.bf16 %v3695_v53, %v3687_v10  ;;  %v3515_v27 = vld [vmem:[#allocation4 + $0x138] sm:$0xff] }
 0x638   :  { %v3523_v15 = vld [vmem:[#allocation4 + $0x178] sm:$0xff] }
 0x639   :  { %v3603_v37 = vld [vmem:[#allocation4 + $0x3f8] sm:$0xff] }
 0x63a   :  { %5036 = vmatpush1.bf16.msra.mxu1 %v5035_v25  ;;  %5199 = vmatpush3.bf16.msra.mxu0 %v6353_v3  ;;  %v3615_v3 = vld [vmem:[#allocation4 + $0x458] sm:$0xff]  ;;  %v5072_v25 = vpack.c.bf16 %v3694_v54, %v3686_v39  ;;  %v3618_v39 = vld [vmem:[#allocation4 + $0x470] sm:$0xff] }
 0x63b   :  { %5038 = vmatprep.subr.bf16.mxu1 %v5037_v8  ;;  %5200 = vmatprep.subr.bf16.mxu0 %v5693_v41  ;;  %v5049_v34 = vpack.c.bf16 %v3615_v3, %v3607_v50  ;;  %v5133_v8 = vpack.c.bf16 %v3491_v38, %v3483_v42  ;;  %v3531_v50 = vld [vmem:[#allocation4 + $0x1b8] sm:$0xff] }
 0x63c   :  { %v3539_v3 = vld [vmem:[#allocation4 + $0x1f8] sm:$0xff] }
 0x63d   :  { %v3611_v51 = vld [vmem:[#allocation4 + $0x438] sm:$0xff] }
 0x63e   :  { %5040 = vmatpush1.bf16.msra.mxu1 %v5039_v31  ;;  %5202 = vmatpush3.bf16.msra.mxu0 %v6363_v0  ;;  %v5053_v0 = vpack.c.bf16 %v3631_v12, %v3623_v19  ;;  %v5135_v31 = vpack.c.bf16 %v3490_v30, %v3482_v9  ;;  %v3547_v19 = vld [vmem:[#allocation4 + $0x238] sm:$0xff]  ;;  %v3634_v9 = vld [vmem:[#allocation4 + $0x4f0] sm:$0xff] }
 0x63f   :  { %5042 = vmatprep.subr.bf16.mxu1 %v5041_v33  ;;  %5203 = vmatprep.subr.bf16.mxu0 %v5693_v41  ;;  %v5137_v33 = vpack.c.bf16 %v3507_v18, %v3499_v40  ;;  %v3555_v12 = vld [vmem:[#allocation4 + $0x278] sm:$0xff] }
 0x640   :  { %v3619_v10 = vld [vmem:[#allocation4 + $0x478] sm:$0xff] }
 0x641   :  { %v3627_v54 = vld [vmem:[#allocation4 + $0x4b8] sm:$0xff] }
 0x642   :  { %5044 = vmatpush1.bf16.msra.mxu1 %v5043_v35  ;;  %v5139_v35 = vpack.c.bf16 %v3506_v32, %v3498_v52  ;;  %v3635_v42 = vld [vmem:[#allocation4 + $0x4f8] sm:$0xff]  ;;  %v3650_v52 = vld [vmem:[#allocation4 + $0x570] sm:$0xff] }
 0x643   :  { %5046 = vmatprep.subr.bf16.mxu1 %v5045_v36  ;;  %v5141_v36 = vpack.c.bf16 %v3523_v15, %v3515_v27  ;;  %v3643_v30 = vld [vmem:[#allocation4 + $0x538] sm:$0xff] }
 0x644   :  { %v3651_v40 = vld [vmem:[#allocation4 + $0x578] sm:$0xff] }
 0x645   :  { %v3659_v32 = vld [vmem:[#allocation4 + $0x5b8] sm:$0xff] }
 0x646   :  { %5048 = vmatpush1.bf16.msra.mxu1 %v5047_v16  ;;  %v5143_v16 = vpack.c.bf16 %v3522_v20, %v3514_v49  ;;  %v3667_v27 = vld [vmem:[#allocation4 + $0x5f8] sm:$0xff]  ;;  %v3666_v49 = vld [vmem:[#allocation4 + $0x5f0] sm:$0xff] }
 0x647   :  { %5050 = vmatprep.subr.bf16.mxu1 %v5049_v34  ;;  %v5145_v34 = vpack.c.bf16 %v3539_v3, %v3531_v50  ;;  %v3675_v20 = vld [vmem:[#allocation4 + $0x638] sm:$0xff] }
 0x648   :  { %v3683_v50 = vld [vmem:[#allocation4 + $0x678] sm:$0xff] }
 0x64a   :  { %5052 = vmatpush1.bf16.msra.mxu1 %v5051_v13  ;;  %v5147_v13 = vpack.c.bf16 %v3538_v56, %v3530_v46  ;;  %v3682_v46 = vld [vmem:[#allocation4 + $0x670] sm:$0xff]  ;;  %v3691_v56 = vld [vmem:[#allocation4 + $0x6b8] sm:$0xff] }
 0x64b   :  { %5054 = vmatprep.subr.bf16.mxu1 %v5053_v0  ;;  %v5149_v0 = vpack.c.bf16 %v3555_v12, %v3547_v19  ;;  %v3699_v19 = vld [vmem:[#allocation4 + $0x6f8] sm:$0x3f] }
 0x64e   :  { %5056 = vmatpush1.bf16.msra.mxu1 %v5055_v21  ;;  %v5151_v21 = vpack.c.bf16 %v3554_v2, %v3546_v48  ;;  %v3698_v48 = vld [vmem:[#allocation4 + $0x6f0] sm:$0x3f] }
 0x64f   :  { %5058 = vmatprep.subr.bf16.mxu1 %v5057_v26  ;;  %v5153_v26 = vpack.c.bf16 %v3571_v5, %v3563_v4 }
 0x652   :  { %5060 = vmatpush1.bf16.msra.mxu1 %v5059_v62  ;;  %v5157_v62 = vpack.c.bf16 %v3587_v61, %v3579_v29 }
 0x653   :  { %5062 = vmatprep.subr.bf16.mxu1 %v5061_v44  ;;  %v3578_v44 = vld [vmem:[#allocation4 + $0x330] sm:$0xff] }
 0x654   :  { %v5159_v47 = vpack.c.bf16 %v3586_v45, %v3578_v44 }
 0x656   :  { %5064 = vmatpush1.bf16.msra.mxu1 %v5063_v59  ;;  %v5161_v59 = vpack.c.bf16 %v3603_v37, %v3595_v58 }
 0x657   :  { %5066 = vmatprep.subr.bf16.mxu1 %v5065_v55  ;;  %v3594_v55 = vld [vmem:[#allocation4 + $0x3b0] sm:$0xff] }
 0x658   :  { %v5163_v53 = vpack.c.bf16 %v3602_v23, %v3594_v55 }
 0x65a   :  { %5068 = vmatpush1.bf16.msra.mxu1 %v5067_v24  ;;  %v5165_v24 = vpack.c.bf16 %v3619_v10, %v3611_v51 }
 0x65b   :  { %5071 = vmatprep.subr.msk.bf16.mxu1 %vm6246_vm11, %v5069_v17  ;;  %v3610_v17 = vld [vmem:[#allocation4 + $0x430] sm:$0xff] }
 0x65c   :  { %v5167_v38 = vpack.c.bf16 %v3618_v39, %v3610_v17  ;;  %v5625_v17 = vld [vmem:[%s6760_s8] sm:$0x1] }
 0x65e   :  { %5074 = vmatpush1.bf16.msk.msra.mxu1 %vm6246_vm11, %v5072_v25  ;;  %v5169_v25 = vpack.c.bf16 %v3635_v42, %v3627_v54 }
 0x65f   :  { %5134 = vmatprep.subr.bf16.mxu1 %v5133_v8  ;;  %v3626_v8 = vld [vmem:[#allocation4 + $0x4b0] sm:$0xff] }
 0x660   :  { %v5171_v18 = vpack.c.bf16 %v3634_v9, %v3626_v8 }
 0x661   :  { %3872 = vmatmul.mubr.f32.vlgmr.msra.gmra.mrb[16].mxu1 %v6657_v28 }
 0x662   :  { %4451 = vmatprep.mubr.msk.f32.mxu1 %vm1285_vm8, %v6667_v11  ;;  %5136 = vmatpush1.bf16.msra.mxu1 %v5135_v31  ;;  %v5173_v31 = vpack.c.bf16 %v3651_v40, %v3643_v30 }
 0x663   :  { %5138 = vmatprep.subr.bf16.mxu1 %v5137_v33  ;;  %v3642_v33 = vld [vmem:[#allocation4 + $0x530] sm:$0xff] }
 0x664   :  { %v5175_v15 = vpack.c.bf16 %v3650_v52, %v3642_v33 }
 0x665   :  { %3878 = vmatmul.mubr.f32.gmra.mrb[18].mxu1 %v6672_v57 }
 0x666   :  { %5140 = vmatpush1.bf16.msra.mxu1 %v5139_v35  ;;  %4458 = vmatprep.mubr.msk.f32.mxu1 %vm1285_vm8, %v6655_v60  ;;  %v3562_v60 = vld [vmem:[#allocation4 + $0x2b0] sm:$0xff]  ;;  %v5177_v35 = vpack.c.bf16 %v3667_v27, %v3659_v32 }
 0x667   :  { %5142 = vmatprep.subr.bf16.mxu1 %v5141_v36  ;;  %v5155_v7 = vpack.c.bf16 %v3570_v43, %v3562_v60  ;;  %v3658_v36 = vld [vmem:[#allocation4 + $0x5b0] sm:$0xff] }
 0x668   :  { %v5179_v3 = vpack.c.bf16 %v3666_v49, %v3658_v36 }
 0x66a   :  { %5144 = vmatpush1.bf16.msra.mxu1 %v5143_v16  ;;  %v5181_v16 = vpack.c.bf16 %v3683_v50, %v3675_v20 }
 0x66b   :  { %5146 = vmatprep.subr.bf16.mxu1 %v5145_v34  ;;  %v3674_v34 = vld [vmem:[#allocation4 + $0x630] sm:$0xff] }
 0x66c   :  { %v5183_v12 = vpack.c.bf16 %v3682_v46, %v3674_v34 }
 0x66e   :  { %5148 = vmatpush1.bf16.msra.mxu1 %v5147_v13  ;;  %v5185_v13 = vpack.c.bf16 %v3699_v19, %v3691_v56 }
 0x66f   :  { %5150 = vmatprep.subr.bf16.mxu1 %v5149_v0  ;;  %v3690_v0 = vld [vmem:[#allocation4 + $0x6b0] sm:$0xff] }
 0x670   :  { %v5188_v2 = vpack.c.bf16 %v3698_v48, %v3690_v0 }
 0x672   :  { %5152 = vmatpush1.bf16.msra.mxu1 %v5151_v21 }
 0x673   :  { %5154 = vmatprep.subr.bf16.mxu1 %v5153_v26 }
 0x676   :  { %5156 = vmatpush1.bf16.msra.mxu1 %v5155_v7 }
 0x677   :  { %5158 = vmatprep.subr.bf16.mxu1 %v5157_v62 }
 0x67a   :  { %5160 = vmatpush1.bf16.msra.mxu1 %v5159_v47 }
 0x67b   :  { %5162 = vmatprep.subr.bf16.mxu1 %v5161_v59 }
 0x67e   :  { %5164 = vmatpush1.bf16.msra.mxu1 %v5163_v53 }
 0x67f   :  { %5166 = vmatprep.subr.bf16.mxu1 %v5165_v24 }
 0x682   :  { %5168 = vmatpush1.bf16.msra.mxu1 %v5167_v38 }
 0x683   :  { %5170 = vmatprep.subr.bf16.mxu1 %v5169_v25 }
 0x686   :  { %5172 = vmatpush1.bf16.msra.mxu1 %v5171_v18 }
 0x687   :  { %5174 = vmatprep.subr.bf16.mxu1 %v5173_v31 }
 0x68a   :  { %5176 = vmatpush1.bf16.msra.mxu1 %v5175_v15 }
 0x68b   :  { %5178 = vmatprep.subr.bf16.mxu1 %v5177_v35 }
 0x68e   :  { %5180 = vmatpush1.bf16.msra.mxu1 %v5179_v3 }
 0x68f   :  { %5182 = vmatprep.subr.bf16.mxu1 %v5181_v16 }
 0x692   :  { %5184 = vmatpush1.bf16.msra.mxu1 %v5183_v12 }
 0x693   :  { %5187 = vmatprep.subr.msk.bf16.mxu1 %vm6246_vm11, %v5185_v13 }
 0x696   :  { %5190 = vmatpush1.bf16.msk.msra.mxu1 %vm6246_vm11, %v5188_v2 }
 0x699   :  { %4026 = vmatmul.mubr.f32.vlgmr.msra.gmra.mrb[20].mxu1 %v6657_v28 }
 0x69a   :  { %4459 = vmatprep.mubr.msk.f32.mxu1 %vm1285_vm8, %v6667_v11 }
 0x69d   :  { %4032 = vmatmul.mubr.f32.gmra.mrb[22].mxu1 %v6672_v57 }
 0x6fc   :  { %v3796_v4 = vpop.f32.mrb[12].mxu1  ;;  %v3950_v5 = vpop.f32.mrb[18].mxu0 }
 0x6fd   :  { %4038 = vst [vmem:[#allocation3] sm:$0xff] %v3796_v4  ;;  %v3798_v21 = vpop.f32.mrb[13].mxu1  ;;  %v3952_v26 = vpop.f32.mrb[19].mxu0 }
 0x6fe   :  { %4039 = vst [vmem:[#allocation3 + $0x8] sm:$0xff] %v3798_v21  ;;  %v5626_v26 = vld [vmem:[%s6762_s10] sm:$0x1] }
 0x700   :  { %v3802_v60 = vpop.f32.mrb[14].mxu1  ;;  %v3956_v43 = vpop.f32.mrb[20].mxu0 }
 0x701   :  { %4050 = vst [vmem:[#allocation3 + $0x60] sm:$0xff] %v3956_v43  ;;  %v3804_v29 = vpop.f32.mrb[15].mxu1  ;;  %v3958_v61 = vpop.f32.mrb[21].mxu0 }
 0x702   :  { %4051 = vst [vmem:[#allocation3 + $0x68] sm:$0xff] %v3958_v61 }
 0x704   :  { %v4124_v14 = vpop.f32.mrb[22].mxu0  ;;  %v4130_v7 = vld [vmem:[#allocation3 + $0x1] ss:$0 sm:$0xff]  ;;  %v4128_v42 = vld [vmem:[#allocation3] ss:$0 sm:$0xff] }
 0x705   :  { %4132 = vrot.lane.b32.xlu1 %v4130_v7, %s5677_s19  ;;  %v4138_v28 = vld [vmem:[#allocation3 + $0xb] ss:$0 sm:$0xff]  ;;  %v4534_v11 = vpop.f32.mrb[23].mxu0  ;;  %v4125_v39 = vadd.f32 %v5625_v17, %v4124_v14  ;;  %v4136_v8 = vld [vmem:[#allocation3 + $0xa] ss:$0 sm:$0xff] }
 0x706   :  { %4140 = vrot.lane.b32.xlu0 %v4138_v28, %s5677_s19 }
 0x707   :  { %v4129_v38 = vadd.f32 %v4128_v42, %v4125_v39 }
 0x708   :  { %v4162_v47 = vld [vmem:[#allocation3 + $0x61] ss:$0 sm:$0xff]  ;;  %v4160_v36 = vld [vmem:[#allocation3 + $0x60] ss:$0 sm:$0xff] }
 0x709   :  { %v4170_v59 = vld [vmem:[#allocation3 + $0x6b] ss:$0 sm:$0xff]  ;;  %v4168_v3 = vld [vmem:[#allocation3 + $0x6a] ss:$0 sm:$0xff] }
 0x734   :  { %v3873_v57 = vpop.f32.mrb[16].mxu1 }
 0x735   :  { %4040 = vst [vmem:[#allocation3 + $0x10] sm:$0xff] %v3873_v57  ;;  %v3875_v62 = vpop.f32.mrb[17].mxu1 }
 0x736   :  { %4041 = vst [vmem:[#allocation3 + $0x18] sm:$0xff] %v3875_v62 }
 0x738   :  { %v3879_v44 = vpop.f32.mrb[18].mxu1 }
 0x739   :  { %v3881_v45 = vpop.f32.mrb[19].mxu1 }
 0x73c   :  { %v4146_v58 = vld [vmem:[#allocation3 + $0x15] ss:$0 sm:$0xff]  ;;  %v4144_v31 = vld [vmem:[#allocation3 + $0x14] ss:$0 sm:$0xff] }
 0x73d   :  { %4148 = vrot.lane.b32.xlu1 %v4146_v58, %s5677_s19  ;;  %v4154_v37 = vld [vmem:[#allocation3 + $0x1f] ss:$0 sm:$0xff]  ;;  %v4152_v32 = vld [vmem:[#allocation3 + $0x1e] ss:$0 sm:$0xff] }
 0x73e   :  { %4156 = vrot.lane.b32.xlu0 %v4154_v37, %s5677_s19 }
 0x741   :  { %4164 = vrot.lane.b32.xlu1 %v4162_v47, %s5677_s19 }
 0x742   :  { %4172 = vrot.lane.b32.xlu0 %v4170_v59, %s5677_s19 }
 0x76c   :  { %v4027_v55 = vpop.f32.mrb[20].mxu1 }
 0x76d   :  { %v4029_v23 = vpop.f32.mrb[21].mxu1 }
 0x770   :  { %v4033_v51 = vpop.f32.mrb[22].mxu1 }
 0x771   :  { %4052 = vst [vmem:[#allocation3 + $0x70] sm:$0xff] %v4033_v51  ;;  %v4035_v10 = vpop.f32.mrb[23].mxu1 }
 0x772   :  { %4053 = vst [vmem:[#allocation3 + $0x78] sm:$0xff] %v4035_v10 }
 0x777   :  { %v4133_v54 = vpop.permute.xlu1 %4132 }
 0x778   :  { %v4178_v53 = vld [vmem:[#allocation3 + $0x75] ss:$0 sm:$0xff]  ;;  %v4135_v25 = vadd.f32 %v4133_v54, %v4129_v38  ;;  %v4141_v30 = vpop.permute.xlu0 %4140  ;;  %v4176_v56 = vld [vmem:[#allocation3 + $0x74] ss:$0 sm:$0xff] }
 0x779   :  { %4180 = vrot.lane.b32.xlu1 %v4178_v53, %s5677_s19  ;;  %v4186_v24 = vld [vmem:[#allocation3 + $0x7f] ss:$0 sm:$0xff]  ;;  %v4184_v0 = vld [vmem:[#allocation3 + $0x7e] ss:$0 sm:$0xff] }
 0x77a   :  { %4188 = vrot.lane.b32.xlu0 %v4186_v24, %s5677_s19  ;;  %v4137_v9 = vadd.f32 %v4136_v8, %v4135_v25 }
 0x77c   :  { %v4143_v40 = vadd.f32 %v4141_v30, %v4137_v9 }
 0x77e   :  { %v4145_v33 = vadd.f32 %v4144_v31, %v4143_v40 }
 0x7af   :  { %v4149_v18 = vpop.permute.xlu1 %4148 }
 0x7b0   :  { %v4151_v52 = vadd.f32 %v4149_v18, %v4145_v33  ;;  %v4157_v15 = vpop.permute.xlu0 %4156 }
 0x7b2   :  { %v4153_v27 = vadd.f32 %v4152_v32, %v4151_v52 }
 0x7b3   :  { %v4165_v20 = vpop.permute.xlu1 %4164 }
 0x7b4   :  { %v4159_v35 = vadd.f32 %v4157_v15, %v4153_v27  ;;  %v4173_v34 = vpop.permute.xlu0 %4172 }
 0x7b6   :  { %v4161_v49 = vadd.f32 %v4160_v36, %v4159_v35 }
 0x7b8   :  { %v4167_v50 = vadd.f32 %v4165_v20, %v4161_v49 }
 0x7ba   :  { %v4169_v16 = vadd.f32 %v4168_v3, %v4167_v50 }
 0x7bc   :  { %v4175_v46 = vadd.f32 %v4173_v34, %v4169_v16 }
 0x7be   :  { %v4177_v19 = vadd.f32 %v4176_v56, %v4175_v46 }
 0x7eb   :  { %v4181_v12 = vpop.permute.xlu1 %4180 }
 0x7ec   :  { %v4183_v13 = vadd.f32 %v4181_v12, %v4177_v19  ;;  %v4189_v2 = vpop.permute.xlu0 %4188 }
 0x7ee   :  { %v4185_v48 = vadd.f32 %v4184_v0, %v4183_v13 }
 0x7f0   :  { %v4191_v4 = vadd.f32 %v4189_v2, %v4185_v48 }
 0x7f2   :  { %v4192_v5 = vmax.f32 %v4191_v4, 0.0 }
 0x7f4   :  { %4552 = vmatmul.mubr.msk.f32.vlgmr.msra.gmra.mrb[24].mxu0 %vm2122_vm14, %v4192_v5 }
 0x7f5   :  { %5205 = vmatpush3.bf16.msra.mxu0 %v6443_v6  ;;  %4562 = vmatprep.mubr.msk.f32.mxu0 %vm5692_vm13, %v5683_v63 }
 0x7f6   :  { %5206 = vmatprep.subr.bf16.mxu0 %v5693_v41 }
 0x7f9   :  { %5208 = vmatpush3.bf16.msra.mxu0 %v6455_v1 }
 0x8c7   :  { %v4262_v21 = vpop.f32.mrb[24].mxu0 }
 0x8c8   :  { %v4263_v60 = vadd.f32 %v5626_v26, %v4262_v21  ;;  %v4553_v43 = vpop.f32.mrb[25].mxu0 }
 0x8ca   :  { %v4266_v29 = vmax.f32 %v4263_v60, 0.0 }
 0x8cc   :  { %4563 = vmatmul.mubr.msk.f32.vlgmr.msra.gmra.mrb[26].mxu0 %vm385_vm1, %v4266_v29 }
 0x99f   :  { %v4336_v6 = vpop.f32.mrb[26].mxu0 }
 0x9a0   :  { %v4337_v61 = vadd.f32 %v4336_v6, %v6649_v22  ;;  %v4564_v63 = vpop.f32.mrb[27].mxu0 }
 0x9a2   :  { %4340 = vst.msk [vmem:[#allocation7 + $0x1] sm:$0x1] %vm2270_vm15, %v4337_v61 }
 0x9a3   :  { %5660 = shalt.err (!%p5657_p12)
}
 0x9a4   :  { %s5661_s11 = scalar_lea.hbm %s6765_s13, 32 }
 0x9a5   :  { %p5662_p13 = scmp.ne.s32.totalorder %s6765_s13, %s5661_s11  ;;  %p5665_p0 = scmp.lt.u32.totalorder %s5661_s11, %s6765_s13 }
 0x9a7   :  { %p5667_p1 = pnand %p5665_p0, %p5662_p13 }
 0x9a9   :  { %5670 = shalt.err (!%p5667_p1)
}
 0x9aa   :  { %4350 = dma.vmem_to_hbm [thread:$0]  %s4348_s27, 32, %s6765_s13, [#allocation6]  }
 0x9ab   :  { %5673 = dma.done.wait [#allocation6], 32  }
 0x9ac   :  { %5674 = vsyncadd [#allocation6], 4294967264 }
 0x9ad   :  { %4354 = vsyncpa [#allocation5], 1 }
 0x9ae   :  { %4355 = vsyncpa [#allocation6], 1 }

</bundles_post_ra>
